<compile_context>
chip_gen: v6e
topology: v6e:2x2x1
jax: 0.10.0
libtpu: 0.0.40
codegen_flags: <defaults>
</compile_context>

<pallas_src>
import functools
import math

import jax
import jax.numpy as jnp
from jax.experimental import pallas as pl
from jax.experimental.pallas import tpu as pltpu

_LANE = 128
_MIB = 1024 * 1024


def _to_pair(v):
    if isinstance(v, int):
        return (v, v)
    return tuple(v)


def _resolve_padding(padding, strides, dilation, ksize):
    """Replicates Conv2D.__init__ padding logic (incl. ZeroPad2d for stride-2 'same')."""
    sh, sw = strides
    dh, dw = dilation
    KH, KW = ksize
    extra = (0, 0, 0, 0)                          # (top, bottom, left, right)
    if padding == "same" and (sh, sw) == (2, 2):
        extra = (0, 1, 0, 1)                      # torch.nn.ZeroPad2d([0,1,0,1])
        padding = "valid"

    if padding == "same":
        th, tw = dh * (KH - 1), dw * (KW - 1)
        pt, pb = th // 2, th - th // 2            # torch 'same': extra pad on high side
        pleft, pright = tw // 2, tw - tw // 2
    elif padding == "valid":
        pt = pb = pleft = pright = 0
    else:
        ph, pw = _to_pair(padding)
        pt = pb = ph
        pleft = pright = pw

    return (pt + extra[0], pb + extra[1], pleft + extra[2], pright + extra[3])


def _device_kind():
    try:
        return jax.devices()[0].device_kind.lower()
    except Exception:
        return ""


def _pick_tn(cout_p):
    # v6e/v7x MXUs are 256 columns wide; v5e (and older) are 128.
    if cout_p % 256 == 0:
        kind = _device_kind()
        if not any(t in kind for t in ("v2", "v3", "v4", "v5")):
            return 256
    return _LANE


def _pick_t_oh(OH, OW, tn, max_oh_tile=64):
    # Target M = t_oh*OW while keeping the f32 register accumulator <= ~128 KiB
    # (32 vregs), so the unrolled KH*KW loop does not thrash the vreg file.
    acc_rows = max(8, (128 * 1024) // (tn * 4))
    return max(1, min(OH, max_oh_tile, acc_rows // max(OW, 1)))


def _vmem_limit_bytes(block_bytes):
    kind = _device_kind()
    physical = 64 * _MIB if "v7" in kind else 128 * _MIB      # v7x: 64 MiB/TC
    cap = physical - 16 * _MIB                                # leave headroom
    return int(max(32 * _MIB, min(cap, block_bytes + 8 * _MIB)))


def _conv_kernel(x_ref, w_ref, b_ref, o_ref, *, t_oh, OW, KH, KW,
                 sh, sw, dh, dw, Hrows, activation):
    # x_ref : (sh*sw*Hrows, OWcols, Cin) bf16 — (row,col) phase-extracted image of batch n
    # w_ref : (KH, KW, Cin, tn)           bf16
    # b_ref : (1, tn)                     f32
    # o_ref : (t_oh, OW, tn)              out dtype (lane-dense, tn multiple of 128)
    oh0 = pl.program_id(2) * t_oh
    Cin = x_ref.shape[-1]
    tn = b_ref.shape[-1]
    M = t_oh * OW

    acc = jnp.zeros((M, tn), jnp.float32)
    for kh in range(KH):
        ph, off_h = (kh * dh) % sh, (kh * dh) // sh
        for kw in range(KW):
            pw, off_w = (kw * dw) % sw, (kw * dw) // sw
            row0 = (ph * sw + pw) * Hrows + off_h + oh0            # dynamic start
            sl = x_ref[pl.ds(row0, t_oh), pl.ds(off_w, OW), :]     # (t_oh, OW, Cin) bf16
            # TODO(synk): for Cin << 128, concatenate the KH*KW windows along
            # the lane dim instead and do a single matmul with K = KH*KW*Cin.
            acc = acc + jnp.dot(sl.reshape(M, Cin), w_ref[kh, kw],
                                preferred_element_type=jnp.float32)

    acc = acc + b_ref[...]
    if activation == "relu":
        acc = jnp.maximum(acc, 0.0)
    elif activation == "relu6":
        acc = jnp.clip(acc, 0.0, 6.0)
    o_ref[...] = acc.reshape(t_oh, OW, tn).astype(o_ref.dtype)


def conv2d_forward(x, weight, bias=None, *, strides=(1, 1), padding="same",
                   dilation_rate=(1, 1), activation=None, max_oh_tile=64):
    """zeropad -> conv -> activation, matching rex_torch Conv2D.forward (NCHW)."""
    N, Cin, H, W = x.shape
    Cout, _, KH, KW = weight.shape
    sh, sw = _to_pair(strides)
    dh, dw = _to_pair(dilation_rate)
    if bias is None:
        bias = jnp.zeros((Cout,), jnp.float32)

    pt, pb, pleft, pright = _resolve_padding(padding, (sh, sw), (dh, dw), (KH, KW))
    xp = jnp.pad(x, ((0, 0), (0, 0), (pt, pb), (pleft, pright)))
    Hp, Wp = H + pt + pb, W + pleft + pright
    eff_kh, eff_kw = dh * (KH - 1) + 1, dw * (KW - 1) + 1
    OH = (Hp - eff_kh) // sh + 1
    OW = (Wp - eff_kw) // sw + 1

    # Generation-aware Cout / OH tiling; ceil-div OH (padded rows sliced off).
    Cout_p = -(-Cout // _LANE) * _LANE
    tn = _pick_tn(Cout_p)
    t_oh = _pick_t_oh(OH, OW, tn, max_oh_tile)
    OH_p = -(-OH // t_oh) * t_oh

    # NHWC, bf16 operands (f32 accumulation inside the kernel).
    xh = jnp.transpose(xp, (0, 2, 3, 1)).astype(jnp.bfloat16)       # (N, Hp, Wp, Cin)

    # Row+column stride-phase extraction so every in-kernel load is a
    # contiguous (t_oh, OW, Cin) slab (<= 1 extra input copy); also provides
    # the zero rows backing the OH_p padding.
    Hrows = OH_p + ((KH - 1) * dh) // sh
    OWcols = OW + ((KW - 1) * dw) // sw
    P = sh * sw
    if P == 1 and Hrows == Hp and OWcols == Wp:
        xs = xh
    else:
        slabs = []
        for ph in range(sh):
            for pw in range(sw):
                s = xh[:, ph::sh, pw::sw, :]
                s = s[:, :Hrows, :OWcols, :]
                pad_h, pad_w = Hrows - s.shape[1], OWcols - s.shape[2]
                if pad_h or pad_w:
                    s = jnp.pad(s, ((0, 0), (0, pad_h), (0, pad_w), (0, 0)))
                slabs.append(s)
        xs = jnp.concatenate(slabs, axis=1)                         # (N, P*Hrows, OWcols, Cin)

    # Weights -> (KH, KW, Cin, Cout_p) bf16; bias -> (1, Cout_p) f32.
    wt = jnp.transpose(weight, (2, 3, 1, 0))
    wt = jnp.pad(wt, ((0, 0), (0, 0), (0, 0), (0, Cout_p - Cout))).astype(jnp.bfloat16)
    b2 = jnp.pad(bias.astype(jnp.float32), (0, Cout_p - Cout)).reshape(1, Cout_p)

    # Grid = (N, Cout tiles, OH tiles): OH innermost so the weight block index
    # is constant across consecutive steps (weights stay resident).
    grid = (N, Cout_p // tn, OH_p // t_oh)

    out_dtype = x.dtype
    block_bytes = (2 * P * Hrows * OWcols * Cin * 2            # image (double-buffered, bf16)
                   + 2 * KH * KW * Cin * tn * 2                # weight tile x2
                   + 2 * tn * 4                                # bias tile x2
                   + 2 * t_oh * OW * tn * jnp.dtype(out_dtype).itemsize)

    kern = functools.partial(
        _conv_kernel, t_oh=t_oh, OW=OW, KH=KH, KW=KW,
        sh=sh, sw=sw, dh=dh, dw=dw, Hrows=Hrows, activation=activation)

    out = pl.pallas_call(
        kern,
        out_shape=jax.ShapeDtypeStruct((N, OH_p, OW, Cout_p), out_dtype),
        grid_spec=pltpu.PrefetchScalarGridSpec(
            num_scalar_prefetch=0,
            grid=grid,
            in_specs=[
                # Whole phase-extracted image of batch n; resident across Cout/OH tiles.
                pl.BlockSpec((None, P * Hrows, OWcols, Cin),
                             lambda n, j, i: (n, 0, 0, 0)),
                # Weight tile indexed only by j -> not re-DMA'd across OH tiles.
                pl.BlockSpec((KH, KW, Cin, tn), lambda n, j, i: (0, 0, 0, j)),
                pl.BlockSpec((1, tn), lambda n, j, i: (0, j)),
            ],
            out_specs=pl.BlockSpec((None, t_oh, OW, tn),
                                   lambda n, j, i: (n, i, 0, j)),
        ),
        compiler_params=pltpu.CompilerParams(
            dimension_semantics=("parallel", "parallel", "parallel"),
            vmem_limit_bytes=_vmem_limit_bytes(block_bytes)),
    )(xs, wt, b2)

    y = out[:, :OH, :, :Cout]                     # strip OH / Cout padding
    return jnp.transpose(y, (0, 3, 1, 2))         # back to NCHW (module output layout)


def _reference(x, weight, bias, *, strides, padding, dilation_rate, activation):
    sh, sw = _to_pair(strides)
    dh, dw = _to_pair(dilation_rate)
    KH, KW = weight.shape[2], weight.shape[3]
    pt, pb, pleft, pright = _resolve_padding(padding, (sh, sw), (dh, dw), (KH, KW))
    # Quantize operands to bf16 like the kernel (accumulation is f32 in both).
    xq = x.astype(jnp.bfloat16).astype(jnp.float32)
    wq = weight.astype(jnp.bfloat16).astype(jnp.float32)
    xp = jnp.pad(xq, ((0, 0), (0, 0), (pt, pb), (pleft, pright)))
    y = jax.lax.conv_general_dilated(
        xp, wq, window_strides=(sh, sw), padding="VALID",
        rhs_dilation=(dh, dw),
        dimension_numbers=("NCHW", "OIHW", "NCHW"),
        precision=jax.lax.Precision.HIGHEST)
    y = y + bias[None, :, None, None]
    if activation == "relu":
        y = jnp.maximum(y, 0.0)
    elif activation == "relu6":
        y = jnp.clip(y, 0.0, 6.0)
    return y


if __name__ == "__main__":
    key = jax.random.PRNGKey(0)
    k_w, k_b, k_x = jax.random.split(key, 3)

    N, Cin, H, W = 2, 4, 16, 16
    Cout, KH, KW = 8, 3, 3

    # Deterministic, PyTorch-Conv2d-style (kaiming-uniform-bound) init.
    fan_in = Cin * KH * KW
    bound = 1.0 / math.sqrt(fan_in)
    weight = jax.random.uniform(k_w, (Cout, Cin, KH, KW), dtype=jnp.float32,
                                minval=-bound, maxval=bound)
    bias = jax.random.uniform(k_b, (Cout,), dtype=jnp.float32,
                              minval=-bound, maxval=bound)
    x = jax.random.normal(k_x, (N, Cin, H, W), dtype=jnp.float32)

    # Case 1: padding='same', stride 1, relu.
    y1 = conv2d_forward(x, weight, bias, strides=(1, 1), padding="same",
                        dilation_rate=(1, 1), activation="relu")
    jax.block_until_ready(y1)

    # Case 2: padding='same', stride 2 -> ZeroPad2d([0,1,0,1]) + 'valid' conv, relu6.
    y2 = conv2d_forward(x, weight, bias, strides=(2, 2), padding="same",
                        dilation_rate=(1, 1), activation="relu6")
    jax.block_until_ready(y2)

    r1 = _reference(x, weight, bias, strides=(1, 1), padding="same",
                    dilation_rate=(1, 1), activation="relu")
    r2 = _reference(x, weight, bias, strides=(2, 2), padding="same",
                    dilation_rate=(1, 1), activation="relu6")

    assert y1.shape == (N, Cout, H, W), y1.shape
    assert y2.shape == (N, Cout, H // 2, W // 2), y2.shape
    assert jnp.allclose(y1, r1, atol=1e-3, rtol=1e-3), float(jnp.max(jnp.abs(y1 - r1)))
    assert jnp.allclose(y2, r2, atol=1e-3, rtol=1e-3), float(jnp.max(jnp.abs(y2 - r2)))

    print("KERNEL_OK")
</pallas_src>

<mosaic_0001>
module attributes {stable_mosaic.version = 11 : i64} {
  func.func @_conv_kernel(%arg0: i32, %arg1: i32, %arg2: i32, %arg3: memref<1x18x18x4xbf16, #tpu.memory_space<vmem>>, %arg4: memref<3x3x4x128xbf16, #tpu.memory_space<vmem>>, %arg5: memref<1x128xf32, #tpu.memory_space<vmem>>, %arg6: memref<1x16x16x128xf32, #tpu.memory_space<vmem>>) attributes {dimension_semantics = [#tpu.dimension_semantics<parallel>, #tpu.dimension_semantics<parallel>, #tpu.dimension_semantics<parallel>], iteration_bounds = array<i64: 2, 1, 1>, scalar_prefetch = 0 : i64, scratch_operands = 0 : i64, tpu.core_type = #tpu.core_type<tc>, window_params = [{transform_indices = @transform_0, window_bounds = array<i64: 1, 18, 18, 4>}, {transform_indices = @transform_1, window_bounds = array<i64: 3, 3, 4, 128>}, {transform_indices = @transform_2, window_bounds = array<i64: 1, 128>}, {transform_indices = @transform_3, window_bounds = array<i64: 1, 16, 16, 128>}]} {
    %c16_i32 = arith.constant 16 : i32
    %0 = arith.muli %arg2, %c16_i32 : i32
    %cst = arith.constant 0.000000e+00 : f32
    %1 = vector.broadcast %cst : f32 to vector<256x128xf32>
    %c0_i32 = arith.constant 0 : i32
    %2 = arith.addi %c0_i32, %0 : i32
    %c0 = arith.constant 0 : index
    %3 = arith.index_cast %2 : i32 to index
    %c0_0 = arith.constant 0 : index
    %c0_1 = arith.constant 0 : index
    %4 = vector.load %arg3[%c0, %3, %c0_0, %c0_1] : memref<1x18x18x4xbf16, #tpu.memory_space<vmem>>, vector<1x16x16x4xbf16>
    %5 = vector.shape_cast %4 : vector<1x16x16x4xbf16> to vector<16x16x4xbf16>
    %6 = vector.shape_cast %5 : vector<16x16x4xbf16> to vector<256x4xbf16>
    %c0_2 = arith.constant 0 : index
    %c0_3 = arith.constant 0 : index
    %c0_4 = arith.constant 0 : index
    %c0_5 = arith.constant 0 : index
    %7 = vector.load %arg4[%c0_2, %c0_3, %c0_4, %c0_5] : memref<3x3x4x128xbf16, #tpu.memory_space<vmem>>, vector<1x1x4x128xbf16>
    %8 = vector.shape_cast %7 : vector<1x1x4x128xbf16> to vector<4x128xbf16>
    %cst_6 = arith.constant dense<0.000000e+00> : vector<256x128xf32>
    %9 = tpu.matmul %6, %8, %cst_6 {dimension_numbers = #tpu.dot_dimension_numbers<[1], [0], [0], [1], [0, 0, 1, 1], [], []>} : vector<256x4xbf16>, vector<4x128xbf16>, vector<256x128xf32> -> vector<256x128xf32>
    %10 = arith.addf %1, %9 : vector<256x128xf32>
    %c0_i32_7 = arith.constant 0 : i32
    %11 = arith.addi %c0_i32_7, %0 : i32
    %c0_8 = arith.constant 0 : index
    %12 = arith.index_cast %11 : i32 to index
    %c1 = arith.constant 1 : index
    %c0_9 = arith.constant 0 : index
    %13 = vector.load %arg3[%c0_8, %12, %c1, %c0_9] : memref<1x18x18x4xbf16, #tpu.memory_space<vmem>>, vector<1x16x16x4xbf16>
    %14 = vector.shape_cast %13 : vector<1x16x16x4xbf16> to vector<16x16x4xbf16>
    %15 = vector.shape_cast %14 : vector<16x16x4xbf16> to vector<256x4xbf16>
    %c0_10 = arith.constant 0 : index
    %c1_11 = arith.constant 1 : index
    %c0_12 = arith.constant 0 : index
    %c0_13 = arith.constant 0 : index
    %16 = vector.load %arg4[%c0_10, %c1_11, %c0_12, %c0_13] : memref<3x3x4x128xbf16, #tpu.memory_space<vmem>>, vector<1x1x4x128xbf16>
    %17 = vector.shape_cast %16 : vector<1x1x4x128xbf16> to vector<4x128xbf16>
    %cst_14 = arith.constant dense<0.000000e+00> : vector<256x128xf32>
    %18 = tpu.matmul %15, %17, %cst_14 {dimension_numbers = #tpu.dot_dimension_numbers<[1], [0], [0], [1], [0, 0, 1, 1], [], []>} : vector<256x4xbf16>, vector<4x128xbf16>, vector<256x128xf32> -> vector<256x128xf32>
    %19 = arith.addf %10, %18 : vector<256x128xf32>
    %c0_i32_15 = arith.constant 0 : i32
    %20 = arith.addi %c0_i32_15, %0 : i32
    %c0_16 = arith.constant 0 : index
    %21 = arith.index_cast %20 : i32 to index
    %c2 = arith.constant 2 : index
    %c0_17 = arith.constant 0 : index
    %22 = vector.load %arg3[%c0_16, %21, %c2, %c0_17] : memref<1x18x18x4xbf16, #tpu.memory_space<vmem>>, vector<1x16x16x4xbf16>
    %23 = vector.shape_cast %22 : vector<1x16x16x4xbf16> to vector<16x16x4xbf16>
    %24 = vector.shape_cast %23 : vector<16x16x4xbf16> to vector<256x4xbf16>
    %c0_18 = arith.constant 0 : index
    %c2_19 = arith.constant 2 : index
    %c0_20 = arith.constant 0 : index
    %c0_21 = arith.constant 0 : index
    %25 = vector.load %arg4[%c0_18, %c2_19, %c0_20, %c0_21] : memref<3x3x4x128xbf16, #tpu.memory_space<vmem>>, vector<1x1x4x128xbf16>
    %26 = vector.shape_cast %25 : vector<1x1x4x128xbf16> to vector<4x128xbf16>
    %cst_22 = arith.constant dense<0.000000e+00> : vector<256x128xf32>
    %27 = tpu.matmul %24, %26, %cst_22 {dimension_numbers = #tpu.dot_dimension_numbers<[1], [0], [0], [1], [0, 0, 1, 1], [], []>} : vector<256x4xbf16>, vector<4x128xbf16>, vector<256x128xf32> -> vector<256x128xf32>
    %28 = arith.addf %19, %27 : vector<256x128xf32>
    %c1_i32 = arith.constant 1 : i32
    %29 = arith.addi %c1_i32, %0 : i32
    %c0_23 = arith.constant 0 : index
    %30 = arith.index_cast %29 : i32 to index
    %c0_24 = arith.constant 0 : index
    %c0_25 = arith.constant 0 : index
    %31 = vector.load %arg3[%c0_23, %30, %c0_24, %c0_25] : memref<1x18x18x4xbf16, #tpu.memory_space<vmem>>, vector<1x16x16x4xbf16>
    %32 = vector.shape_cast %31 : vector<1x16x16x4xbf16> to vector<16x16x4xbf16>
    %33 = vector.shape_cast %32 : vector<16x16x4xbf16> to vector<256x4xbf16>
    %c1_26 = arith.constant 1 : index
    %c0_27 = arith.constant 0 : index
    %c0_28 = arith.constant 0 : index
    %c0_29 = arith.constant 0 : index
    %34 = vector.load %arg4[%c1_26, %c0_27, %c0_28, %c0_29] : memref<3x3x4x128xbf16, #tpu.memory_space<vmem>>, vector<1x1x4x128xbf16>
    %35 = vector.shape_cast %34 : vector<1x1x4x128xbf16> to vector<4x128xbf16>
    %cst_30 = arith.constant dense<0.000000e+00> : vector<256x128xf32>
    %36 = tpu.matmul %33, %35, %cst_30 {dimension_numbers = #tpu.dot_dimension_numbers<[1], [0], [0], [1], [0, 0, 1, 1], [], []>} : vector<256x4xbf16>, vector<4x128xbf16>, vector<256x128xf32> -> vector<256x128xf32>
    %37 = arith.addf %28, %36 : vector<256x128xf32>
    %c1_i32_31 = arith.constant 1 : i32
    %38 = arith.addi %c1_i32_31, %0 : i32
    %c0_32 = arith.constant 0 : index
    %39 = arith.index_cast %38 : i32 to index
    %c1_33 = arith.constant 1 : index
    %c0_34 = arith.constant 0 : index
    %40 = vector.load %arg3[%c0_32, %39, %c1_33, %c0_34] : memref<1x18x18x4xbf16, #tpu.memory_space<vmem>>, vector<1x16x16x4xbf16>
    %41 = vector.shape_cast %40 : vector<1x16x16x4xbf16> to vector<16x16x4xbf16>
    %42 = vector.shape_cast %41 : vector<16x16x4xbf16> to vector<256x4xbf16>
    %c1_35 = arith.constant 1 : index
    %c1_36 = arith.constant 1 : index
    %c0_37 = arith.constant 0 : index
    %c0_38 = arith.constant 0 : index
    %43 = vector.load %arg4[%c1_35, %c1_36, %c0_37, %c0_38] : memref<3x3x4x128xbf16, #tpu.memory_space<vmem>>, vector<1x1x4x128xbf16>
    %44 = vector.shape_cast %43 : vector<1x1x4x128xbf16> to vector<4x128xbf16>
    %cst_39 = arith.constant dense<0.000000e+00> : vector<256x128xf32>
    %45 = tpu.matmul %42, %44, %cst_39 {dimension_numbers = #tpu.dot_dimension_numbers<[1], [0], [0], [1], [0, 0, 1, 1], [], []>} : vector<256x4xbf16>, vector<4x128xbf16>, vector<256x128xf32> -> vector<256x128xf32>
    %46 = arith.addf %37, %45 : vector<256x128xf32>
    %c1_i32_40 = arith.constant 1 : i32
    %47 = arith.addi %c1_i32_40, %0 : i32
    %c0_41 = arith.constant 0 : index
    %48 = arith.index_cast %47 : i32 to index
    %c2_42 = arith.constant 2 : index
    %c0_43 = arith.constant 0 : index
    %49 = vector.load %arg3[%c0_41, %48, %c2_42, %c0_43] : memref<1x18x18x4xbf16, #tpu.memory_space<vmem>>, vector<1x16x16x4xbf16>
    %50 = vector.shape_cast %49 : vector<1x16x16x4xbf16> to vector<16x16x4xbf16>
    %51 = vector.shape_cast %50 : vector<16x16x4xbf16> to vector<256x4xbf16>
    %c1_44 = arith.constant 1 : index
    %c2_45 = arith.constant 2 : index
    %c0_46 = arith.constant 0 : index
    %c0_47 = arith.constant 0 : index
    %52 = vector.load %arg4[%c1_44, %c2_45, %c0_46, %c0_47] : memref<3x3x4x128xbf16, #tpu.memory_space<vmem>>, vector<1x1x4x128xbf16>
    %53 = vector.shape_cast %52 : vector<1x1x4x128xbf16> to vector<4x128xbf16>
    %cst_48 = arith.constant dense<0.000000e+00> : vector<256x128xf32>
    %54 = tpu.matmul %51, %53, %cst_48 {dimension_numbers = #tpu.dot_dimension_numbers<[1], [0], [0], [1], [0, 0, 1, 1], [], []>} : vector<256x4xbf16>, vector<4x128xbf16>, vector<256x128xf32> -> vector<256x128xf32>
    %55 = arith.addf %46, %54 : vector<256x128xf32>
    %c2_i32 = arith.constant 2 : i32
    %56 = arith.addi %c2_i32, %0 : i32
    %c0_49 = arith.constant 0 : index
    %57 = arith.index_cast %56 : i32 to index
    %c0_50 = arith.constant 0 : index
    %c0_51 = arith.constant 0 : index
    %58 = vector.load %arg3[%c0_49, %57, %c0_50, %c0_51] : memref<1x18x18x4xbf16, #tpu.memory_space<vmem>>, vector<1x16x16x4xbf16>
    %59 = vector.shape_cast %58 : vector<1x16x16x4xbf16> to vector<16x16x4xbf16>
    %60 = vector.shape_cast %59 : vector<16x16x4xbf16> to vector<256x4xbf16>
    %c2_52 = arith.constant 2 : index
    %c0_53 = arith.constant 0 : index
    %c0_54 = arith.constant 0 : index
    %c0_55 = arith.constant 0 : index
    %61 = vector.load %arg4[%c2_52, %c0_53, %c0_54, %c0_55] : memref<3x3x4x128xbf16, #tpu.memory_space<vmem>>, vector<1x1x4x128xbf16>
    %62 = vector.shape_cast %61 : vector<1x1x4x128xbf16> to vector<4x128xbf16>
    %cst_56 = arith.constant dense<0.000000e+00> : vector<256x128xf32>
    %63 = tpu.matmul %60, %62, %cst_56 {dimension_numbers = #tpu.dot_dimension_numbers<[1], [0], [0], [1], [0, 0, 1, 1], [], []>} : vector<256x4xbf16>, vector<4x128xbf16>, vector<256x128xf32> -> vector<256x128xf32>
    %64 = arith.addf %55, %63 : vector<256x128xf32>
    %c2_i32_57 = arith.constant 2 : i32
    %65 = arith.addi %c2_i32_57, %0 : i32
    %c0_58 = arith.constant 0 : index
    %66 = arith.index_cast %65 : i32 to index
    %c1_59 = arith.constant 1 : index
    %c0_60 = arith.constant 0 : index
    %67 = vector.load %arg3[%c0_58, %66, %c1_59, %c0_60] : memref<1x18x18x4xbf16, #tpu.memory_space<vmem>>, vector<1x16x16x4xbf16>
    %68 = vector.shape_cast %67 : vector<1x16x16x4xbf16> to vector<16x16x4xbf16>
    %69 = vector.shape_cast %68 : vector<16x16x4xbf16> to vector<256x4xbf16>
    %c2_61 = arith.constant 2 : index
    %c1_62 = arith.constant 1 : index
    %c0_63 = arith.constant 0 : index
    %c0_64 = arith.constant 0 : index
    %70 = vector.load %arg4[%c2_61, %c1_62, %c0_63, %c0_64] : memref<3x3x4x128xbf16, #tpu.memory_space<vmem>>, vector<1x1x4x128xbf16>
    %71 = vector.shape_cast %70 : vector<1x1x4x128xbf16> to vector<4x128xbf16>
    %cst_65 = arith.constant dense<0.000000e+00> : vector<256x128xf32>
    %72 = tpu.matmul %69, %71, %cst_65 {dimension_numbers = #tpu.dot_dimension_numbers<[1], [0], [0], [1], [0, 0, 1, 1], [], []>} : vector<256x4xbf16>, vector<4x128xbf16>, vector<256x128xf32> -> vector<256x128xf32>
    %73 = arith.addf %64, %72 : vector<256x128xf32>
    %c2_i32_66 = arith.constant 2 : i32
    %74 = arith.addi %c2_i32_66, %0 : i32
    %c0_67 = arith.constant 0 : index
    %75 = arith.index_cast %74 : i32 to index
    %c2_68 = arith.constant 2 : index
    %c0_69 = arith.constant 0 : index
    %76 = vector.load %arg3[%c0_67, %75, %c2_68, %c0_69] : memref<1x18x18x4xbf16, #tpu.memory_space<vmem>>, vector<1x16x16x4xbf16>
    %77 = vector.shape_cast %76 : vector<1x16x16x4xbf16> to vector<16x16x4xbf16>
    %78 = vector.shape_cast %77 : vector<16x16x4xbf16> to vector<256x4xbf16>
    %c2_70 = arith.constant 2 : index
    %c2_71 = arith.constant 2 : index
    %c0_72 = arith.constant 0 : index
    %c0_73 = arith.constant 0 : index
    %79 = vector.load %arg4[%c2_70, %c2_71, %c0_72, %c0_73] : memref<3x3x4x128xbf16, #tpu.memory_space<vmem>>, vector<1x1x4x128xbf16>
    %80 = vector.shape_cast %79 : vector<1x1x4x128xbf16> to vector<4x128xbf16>
    %cst_74 = arith.constant dense<0.000000e+00> : vector<256x128xf32>
    %81 = tpu.matmul %78, %80, %cst_74 {dimension_numbers = #tpu.dot_dimension_numbers<[1], [0], [0], [1], [0, 0, 1, 1], [], []>} : vector<256x4xbf16>, vector<4x128xbf16>, vector<256x128xf32> -> vector<256x128xf32>
    %82 = arith.addf %73, %81 : vector<256x128xf32>
    %c0_75 = arith.constant 0 : index
    %c0_76 = arith.constant 0 : index
    %83 = vector.load %arg5[%c0_75, %c0_76] : memref<1x128xf32, #tpu.memory_space<vmem>>, vector<1x128xf32>
    %84 = vector.broadcast %83 : vector<1x128xf32> to vector<256x128xf32>
    %85 = arith.addf %82, %84 : vector<256x128xf32>
    %cst_77 = arith.constant 0.000000e+00 : f32
    %86 = vector.broadcast %cst_77 : f32 to vector<256x128xf32>
    %87 = arith.maximumf %85, %86 : vector<256x128xf32>
    %88 = vector.shape_cast %87 : vector<256x128xf32> to vector<16x16x128xf32>
    %c0_78 = arith.constant 0 : index
    %c0_79 = arith.constant 0 : index
    %c0_80 = arith.constant 0 : index
    %c0_81 = arith.constant 0 : index
    %89 = vector.load %arg6[%c0_78, %c0_79, %c0_80, %c0_81] : memref<1x16x16x128xf32, #tpu.memory_space<vmem>>, vector<1x16x16x128xf32>
    %90 = vector.shape_cast %89 : vector<1x16x16x128xf32> to vector<16x16x128xf32>
    %91 = vector.shape_cast %88 : vector<16x16x128xf32> to vector<1x16x16x128xf32>
    tpu.vector_store %arg6[%c0_78, %c0_79, %c0_80, %c0_81], %91 {strides = array<i32>} : memref<1x16x16x128xf32, #tpu.memory_space<vmem>>, vector<1x16x16x128xf32>,
    return
  }
  func.func @transform_0(%arg0: i32, %arg1: i32, %arg2: i32) -> (i32, i32, i32, i32) {
    %c0_i32 = arith.constant 0 : i32
    %c0_i32_0 = arith.constant 0 : i32
    %c0_i32_1 = arith.constant 0 : i32
    %c0_i32_2 = arith.constant 0 : i32
    return %arg0, %c0_i32, %c0_i32_0, %c0_i32_1 : i32, i32, i32, i32
  }
  func.func @transform_1(%arg0: i32, %arg1: i32, %arg2: i32) -> (i32, i32, i32, i32) {
    %c0_i32 = arith.constant 0 : i32
    %c0_i32_0 = arith.constant 0 : i32
    %c0_i32_1 = arith.constant 0 : i32
    %c0_i32_2 = arith.constant 0 : i32
    return %c0_i32, %c0_i32_0, %c0_i32_1, %arg1 : i32, i32, i32, i32
  }
  func.func @transform_2(%arg0: i32, %arg1: i32, %arg2: i32) -> (i32, i32) {
    %c0_i32 = arith.constant 0 : i32
    %c0_i32_0 = arith.constant 0 : i32
    return %c0_i32, %arg1 : i32, i32
  }
  func.func @transform_3(%arg0: i32, %arg1: i32, %arg2: i32) -> (i32, i32, i32, i32) {
    %c0_i32 = arith.constant 0 : i32
    %c0_i32_0 = arith.constant 0 : i32
    return %arg0, %arg2, %c0_i32, %arg1 : i32, i32, i32, i32
  }
}

</mosaic_0001>

<bundles_post_ra>
// kernel: tpu_custom_call.1
= control target key start
LH: loop header
LB: loop body
LE: loop exit
PB: predicated region body
PF: predicated region fallthrough
CT: control target
= control target key end

     0   :  { %8 = vsyncpa [#allocation3], 0  ;;  %s9004_s0 = inlined_call_operand.vmem [shape: bf16[2,18,18,4], index: 0, kind: input, shape index: {}]   ;;  %s9005_s1 = inlined_call_operand.vmem [shape: bf16[3,3,4,128], index: 1, kind: input, shape index: {}]   ;;  %s9006_s2 = inlined_call_operand.vmem [shape: f32[1,128], index: 2, kind: input, shape index: {}]   ;;  %s9007_s3 = inlined_call_operand.hbm [shape: f32[2,16,16,128], index: 3, kind: output, shape index: {}]  }
   0x1   :  { %10 = vsyncpa [#allocation3 + $0x1], 0  ;;  %s6261_s12 = smov 0   ;;  %s6263_s13 = smov 0  }
   0x2   :  { %s6265_s14 = smov 0   ;;  %s6267_s15 = smov 0  }
   0x3   :  { %s6269_s16 = smov 0   ;;  %s6271_s17 = smov 0  }
   0x4 LB: > { %s5029_s18 = sadd.s32 4294967295, %s6236_s17   ;;  %s5030_s19 = sadd.s32 4294967294, %s6236_s17   ;;  %s6236_s17 = sphi %s6271_s17, %s16_s17   ;;  %s6232_s16 = sphi %s6269_s16, %s9288_s16   ;;  %s6228_s15 = sphi %s6267_s15, %s9287_s15   ;;  %s6224_s14 = sphi %s6265_s14, %s9286_s14   ;;  %s6220_s13 = sphi %s6263_s13, %s9285_s13   ;;  %s6216_s12 = sphi %s6261_s12, %s9284_s12  }
   0x5   : > { %s35_s20 = sadd.s32 1, %s6232_s16  ;;  %s124_s21 = sadd.s32 1, %s6224_s14 }
   0x6   : > { %p37_p0 = scmp.ge.s32.totalorder %s35_s20, 2  ;;  %p134_p1 = scmp.ne.s32.totalorder %s6224_s14, %s6220_s13 }
   0x7   : > { %p135_p2 = scmp.eq.s32.totalorder %s5029_s18, 1  ;;  %p140_p3 = scmp.ne.s32.totalorder %s6220_s13, %s6216_s12 }
   0x8   : > { %s9290_s20 = smov (%p37_p0, %s35_s20), 0  ;;  %p141_p5 = scmp.eq.s32.totalorder %s5030_s19, 1 }
   0x9   : > { %p6301_p4 = por %p135_p2, %p134_p1  ;;  %s117_s23 = ssub.s32 %s6232_s16, %s9290_s20 }
   0xa   : > { %p5035_p6 = scmp.ge.s32.totalorder %s6236_s17, 1  ;;  %p122_p7 = scmp.eq.s32.totalorder %s117_s23, 0 }
   0xb   : > { %p6308_p8 = por %p141_p5, %p140_p3  ;;  %p180_p9 = scmp.lt.s32.totalorder %s6236_s17, 3 }
   0xc   : > { %s6314_s25 = scalar_select %p122_p7, %s6224_s14, %s124_s21  }
   0xd   : > { %p181_p10 = pnand %p5035_p6, %p180_p9 }
   0xf   : > { %184 = sbr.rel (%p181_p10) target bundleno = 579 (0x243), region = 32 }
  0x14   : > { %v5038_v0 = vld [vmem:[%s9005_s1 + $0x2] sm:$0x3]  ;;  %vm764_vm0 = vcmask 1041408   ;;  %p211_p11 = scmp.lt.s32.totalorder %s6228_s15, 1  ;;  %v261_v2 = vld [vmem:[%s9005_s1] sm:$0x3] }
  0x15   : > { %6043 = vmatprep.subr.msk.bf16.mxu1 %vm764_vm0, %v5038_v0  ;;  %6042 = vmatprep.subr.msk.bf16.mxu0 %vm764_vm0, %v5038_v0  ;;  %v766_v1 = vsel %vm764_vm0, %v5038_v0, 0  ;;  %v5119_v3 = vld [vmem:[%s9005_s1 + $0x4] sm:$0x3]  ;;  %vm278_vm1 = vsmask.f32 3328  ;;  %v6338_v4 = vsel %vm764_vm0, %v261_v2, 0 }
  0x16   : > { %6041 = vmatpush3.bf16.msra.mxu1 %v766_v1  ;;  %5735 = vmatpush3.bf16.msra.mxu0 %v766_v1  ;;  %s212_s30 = scalar_select %p211_p11, %s6228_s15, 1  ;;  %vm279_vm2 = vsmask.f32 7440  ;;  %vm715_vm3 = vcmask 31744   ;;  %v6364_v16 = vsel %vm764_vm0, %v5119_v3, 0  ;;  %vm1269_vm5 = vcmask 1042432  }
  0x17   : > { %6044 = vmatprep.subr.msk.bf16.mxu1 %vm764_vm0, %v261_v2  ;;  %6045 = vmatprep.subr.msk.bf16.mxu0 %vm764_vm0, %v5119_v3  ;;  %vm6379_vm4 = vmor %vm278_vm1, %vm279_vm2  ;;  %vm1270_vm6 = vcmask 1046532   ;;  %s208_s5 = sand.u32 1, %s6220_s13   ;;  %s5580_s10 = sshll.u32 %s6228_s15, 12 }
  0x18   : > { %s6052_s6 = smul.u32 216, %s212_s30  ;;  %vm6665_vm7 = vmor %vm1269_vm5, %vm1270_vm6  ;;  %s5036_s8 = sshll.u32 %s208_s5, 8 }
  0x19   : > { %s8951_s21 = scalar_lea.hbm %s9007_s3, %s5580_s10  ;;  %s8959_s15 = scalar_lea.sflag [#allocation3], %s208_s5 }
  0x1a   : > { %s6335_s9 = scalar_lea.vmem %s9004_s0, %s6052_s6  ;;  %s6238_s26 = smov [#allocation2]  }
  0x1b   : > { %v6341_v5 = vld [vmem:[%s6335_s9] sm:$0xf]  ;;  %v6344_v6 = vld [vmem:[%s6335_s9 + $0x4] sm:$0xf]  ;;  %v6347_v7 = vld [vmem:[%s6335_s9 + $0x8] sm:$0x1] }
  0x1c   : > { %v282_v8 = vshrl.u32 %v6341_v5, 16  ;;  %v285_v9 = vshll.u32 %v6341_v5, 16  ;;  %v291_v10 = vshll.u32 %v6344_v6, 16  ;;  %v295_v11 = vshrl.u32 %v6344_v6, 16  ;;  %v6354_v12 = vld [vmem:[%s6335_s9 + $0x60] sm:$0xf] }
  0x1d   : > { %v301_v13 = vshll.u32 %v6347_v7, 16  ;;  %v6358_v14 = vld [vmem:[%s6335_s9 + $0x64] sm:$0xf]  ;;  %v6361_v15 = vld [vmem:[%s6335_s9 + $0x68] sm:$0x1]  ;;  %v474_v22 = vshrl.u32 %v6354_v12, 16 }
  0x1e   : > { %v284_v17 = vrot.slane %v282_v8, 4  ;;  %v287_v18 = vrot.slane %v285_v9, 5  ;;  %v293_v19 = vrot.slane %v291_v10, 5  ;;  %v297_v20 = vrot.slane %v295_v11, 4  ;;  %v6372_v29 = vld [vmem:[%s6335_s9 + $0xc] sm:$0xf] }
  0x1f   : > { %v303_v21 = vrot.slane %v301_v13, 5  ;;  %v477_v23 = vshll.u32 %v6354_v12, 16  ;;  %v483_v24 = vshll.u32 %v6358_v14, 16  ;;  %v487_v27 = vshrl.u32 %v6358_v14, 16  ;;  %v6375_v30 = vld [vmem:[%s6335_s9 + $0x10] sm:$0xf] }
  0x20   : > { %v288_v25 = vor.u32 %v287_v18, %v284_v17  ;;  %v298_v26 = vor.u32 %v297_v20, %v293_v19  ;;  %v493_v28 = vshll.u32 %v6361_v15, 16  ;;  %v476_v33 = vrot.slane %v474_v22, 4  ;;  %v6385_v41 = vld [vmem:[%s6335_s9 + $0x14] sm:$0x1]  ;;  %v6396_v53 = vld [vmem:[%s6335_s9 + $0x6c] sm:$0xf] }
  0x21   : > { %v479_v34 = vrot.slane %v477_v23, 5  ;;  %v485_v35 = vrot.slane %v483_v24, 5  ;;  %v489_v38 = vrot.slane %v487_v27, 4  ;;  %v306_v42 = vshrl.u32 %v6372_v29, 16  ;;  %v6400_v58 = vld [vmem:[%s6335_s9 + $0x70] sm:$0xf] }
  0x22   : > { %v289_v36 = vrot.slane %v288_v25, 4  ;;  %v299_v37 = vrot.slane %v298_v26, 4  ;;  %v495_v39 = vrot.slane %v493_v28, 5  ;;  %v309_v43 = vshll.u32 %v6372_v29, 16  ;;  %v6408_v63 = vld [vmem:[%s6335_s9 + $0x74] sm:$0x1] }
  0x23   : > { %v480_v40 = vor.u32 %v479_v34, %v476_v33  ;;  %v315_v44 = vshll.u32 %v6375_v30, 16  ;;  %v490_v47 = vor.u32 %v489_v38, %v485_v35  ;;  %v319_v48 = vshrl.u32 %v6375_v30, 16  ;;  %v6414_v8 = vld [vmem:[%s6335_s9 + $0x18] sm:$0xf]  ;;  %v6427_v25 = vld [vmem:[%s6335_s9 + $0x20] sm:$0x1] }
  0x24   : > { %v294_v45 = vsel %vm6379_vm4, %v289_v36, %v293_v19  ;;  %v304_v46 = vsel %vm6379_vm4, %v299_v37, %v303_v21  ;;  %v308_v51 = vrot.slane %v306_v42, 4  ;;  %v311_v52 = vrot.slane %v309_v43, 5  ;;  %v6421_v21 = vld [vmem:[%s6335_s9 + $0x1c] sm:$0xf]  ;;  %s6164_s27 = sshll.u32 %s6238_s26, 4  ;;  %s6165_s27 = int_to_ptr.vmem [resolvable:$false] %s6164_s27 }
  0x25   : > { %v5039_v49 = vcombine.low %v294_v45, %v304_v46  ;;  %v481_v50 = vrot.slane %v480_v40, 4  ;;  %v491_v54 = vrot.slane %v490_v47, 4  ;;  %v317_v55 = vrot.slane %v315_v44, 5  ;;  %v6440_v40 = vld [vmem:[%s9005_s1 + $0x8] sm:$0x3]  ;;  %s6166_s28 = scalar_lea.vmem %s6165_s27, 8192 }
  0x26   : > { %v321_v56 = vrot.slane %v319_v48, 4  ;;  %v325_v57 = vshll.u32 %v6385_v41, 16  ;;  %v312_v60 = vor.u32 %v311_v52, %v308_v51  ;;  %v498_v3 = vshrl.u32 %v6396_v53, 16  ;;  %v6445_v46 = vld [vmem:[%s6335_s9 + $0x7c] sm:$0xf] }
  0x27   : > { %5736 = vmatprep.mubr.msk.bf16.mxu0 %vm715_vm3, %v5039_v49  ;;  %v486_v59 = vsel %vm6379_vm4, %v481_v50, %v485_v35  ;;  %v496_v0 = vsel %vm6379_vm4, %v491_v54, %v495_v39  ;;  %v501_v11 = vshll.u32 %v6396_v53, 16  ;;  %v507_v13 = vshll.u32 %v6400_v58, 16  ;;  %v6434_v35 = vld [vmem:[%s6335_s9 + $0x78] sm:$0xf] }
  0x28   : > { %v322_v1 = vor.u32 %v321_v56, %v317_v55  ;;  %v327_v2 = vrot.slane %v325_v57, 5  ;;  %v5047_v9 = vcombine.low %v486_v59, %v496_v0  ;;  %v313_v10 = vrot.slane %v312_v60, 4  ;;  %v6452_v56 = vld [vmem:[%s6335_s9 + $0x80] sm:$0x1] }
  0x29   : > { %v500_v18 = vrot.slane %v498_v3, 4  ;;  %v511_v19 = vshrl.u32 %v6400_v58, 16  ;;  %v517_v20 = vshll.u32 %v6408_v63, 16  ;;  %v503_v23 = vrot.slane %v501_v11, 5  ;;  %9045 = vst [vmem:[#allocation5_spill] sm:$0xff] %v6452_v56 }
  0x2a   : > { %v323_v17 = vrot.slane %v322_v1, 4  ;;  %5752 = vmatprep.mubr.msk.bf16.mxu1 %vm715_vm3, %v5047_v9  ;;  %v318_v22 = vsel %vm6379_vm4, %v313_v10, %v317_v55  ;;  %v509_v24 = vrot.slane %v507_v13, 5  ;;  %v330_v26 = vshrl.u32 %v6414_v8, 16  ;;  %v6458_v1 = vld [vmem:[%s6335_s9 + $0x24] sm:$0xf] }
  0x2b   : > { %v513_v28 = vrot.slane %v511_v19, 4  ;;  %v519_v33 = vrot.slane %v517_v20, 5  ;;  %v333_v34 = vshll.u32 %v6414_v8, 16  ;;  %v504_v37 = vor.u32 %v503_v23, %v500_v18  ;;  %v6466_v10 = vld [vmem:[%s6335_s9 + $0x28] sm:$0xf] }
  0x2c   : > { %v328_v27 = vsel %vm6379_vm4, %v323_v17, %v327_v2  ;;  %v332_v38 = vrot.slane %v330_v26, 4  ;;  %v339_v39 = vshll.u32 %v6421_v21, 16  ;;  %v343_v44 = vshrl.u32 %v6421_v21, 16  ;;  %v6472_v19 = vld [vmem:[%s9005_s1 + $0x6] sm:$0x3] }
  0x2d   : > { %v5040_v36 = vcombine.low %v318_v22, %v328_v27  ;;  %v514_v42 = vor.u32 %v513_v28, %v509_v24  ;;  %v335_v43 = vrot.slane %v333_v34, 5  ;;  %v349_v45 = vshll.u32 %v6427_v25, 16 }
  0x2e   : > { %v505_v47 = vrot.slane %v504_v37, 4  ;;  %v341_v48 = vrot.slane %v339_v39, 5  ;;  %v522_v49 = vshrl.u32 %v6434_v35, 16  ;;  %v525_v50 = vshll.u32 %v6434_v35, 16 }
  0x2f   : > { %5737 = vmatmul.mubr.msk.bf16.vlgmr.msra.gmra.mxu0 %vm715_vm3, %v5040_v36  ;;  %v515_v51 = vrot.slane %v514_v42, 4  ;;  %v336_v52 = vor.u32 %v335_v43, %v332_v38  ;;  %v345_v54 = vrot.slane %v343_v44, 4  ;;  %v351_v55 = vrot.slane %v349_v45, 5  ;;  %v6484_v36 = vld [vmem:[%s6335_s9 + $0x84] sm:$0xf] }
  0x30   : > { %5803 = vmatpush3.bf16.msra.mxu0 %v6364_v16  ;;  %v510_v57 = vsel %vm6379_vm4, %v505_v47, %v509_v24  ;;  %v524_v59 = vrot.slane %v522_v49, 4  ;;  %v527_v60 = vrot.slane %v525_v50, 5  ;;  %v531_v0 = vshll.u32 %v6445_v46, 16  ;;  %v6477_v24 = vld [vmem:[%s6335_s9 + $0x2c] sm:$0x1] }
  0x31   : > { %6047 = vmatprep.subr.msk.bf16.mxu0 %vm764_vm0, %v6440_v40  ;;  %v520_v16 = vsel %vm6379_vm4, %v515_v51, %v519_v33  ;;  %v337_v2 = vrot.slane %v336_v52, 4  ;;  %v346_v3 = vor.u32 %v345_v54, %v341_v48  ;;  %v535_v9 = vshrl.u32 %v6445_v46, 16  ;;  %v6491_v43 = vld [vmem:[%s6335_s9 + $0x88] sm:$0xf]  ;;  %v6499_v51 = vld [vmem:[%s6335_s9 + $0x8c] sm:$0x1] }
  0x32   : > { %v5048_v11 = vcombine.low %v510_v57, %v520_v16  ;;  %v528_v13 = vor.u32 %v527_v60, %v524_v59  ;;  %v533_v17 = vrot.slane %v531_v0, 5  ;;  %v541_v18 = vshll.u32 %v6452_v56, 16  ;;  %9046 = vst [vmem:[#allocation6_spill] sm:$0xff] %v6499_v51  ;;  %v6507_v60 = vld [vmem:[%s6335_s9 + $0x30] sm:$0xf] }
  0x33   : > { %v342_v20 = vsel %vm6379_vm4, %v337_v2, %v341_v48  ;;  %v347_v22 = vrot.slane %v346_v3, 4  ;;  %v537_v23 = vrot.slane %v535_v9, 4  ;;  %v354_v26 = vshrl.u32 %v6458_v1, 16  ;;  %v6512_v9 = vld [vmem:[%s6335_s9 + $0x34] sm:$0xf] }
  0x34   : > { %5753 = vmatmul.mubr.msk.bf16.vlgmr.msra.gmra.mxu1 %vm715_vm3, %v5048_v11  ;;  %v529_v27 = vrot.slane %v528_v13, 4  ;;  %v543_v28 = vrot.slane %v541_v18, 5  ;;  %v357_v33 = vshll.u32 %v6458_v1, 16  ;;  %v363_v34 = vshll.u32 %v6466_v10, 16 }
  0x35   : > { %5769 = vmatpush3.bf16.msra.mxu1 %v6338_v4  ;;  %v352_v37 = vsel %vm6379_vm4, %v347_v22, %v351_v55  ;;  %v538_v38 = vor.u32 %v537_v23, %v533_v17  ;;  %v356_v39 = vrot.slane %v354_v26, 4  ;;  %v367_v42 = vshrl.u32 %v6466_v10, 16 }
  0x36   : > { %v5041_v44 = vcombine.low %v342_v20, %v352_v37  ;;  %v534_v45 = vsel %vm6379_vm4, %v529_v27, %v533_v17  ;;  %v359_v47 = vrot.slane %v357_v33, 5  ;;  %v365_v48 = vrot.slane %v363_v34, 5  ;;  %6046 = vmatprep.subr.msk.bf16.mxu1 %vm764_vm0, %v6472_v19  ;;  %v6520_v33 = vld [vmem:[%s6335_s9 + $0x38] sm:$0x1] }
  0x37   : > { %v539_v4 = vrot.slane %v538_v38, 4  ;;  %v369_v49 = vrot.slane %v367_v42, 4  ;;  %v373_v50 = vshll.u32 %v6477_v24, 16  ;;  %v546_v52 = vshrl.u32 %v6484_v36, 16  ;;  %v6525_v38 = vld [vmem:[%s6335_s9 + $0x90] sm:$0xf] }
  0x38   : > { %5740 = vmatprep.mubr.msk.bf16.mxu0 %vm715_vm3, %v5041_v44  ;;  %v360_v54 = vor.u32 %v359_v47, %v356_v39  ;;  %v549_v55 = vshll.u32 %v6484_v36, 16  ;;  %v555_v57 = vshll.u32 %v6491_v43, 16  ;;  %v559_v59 = vshrl.u32 %v6491_v43, 16  ;;  %9047 = vst [vmem:[#allocation7_spill] sm:$0xff] %v6525_v38  ;;  %v6530_v47 = vld [vmem:[%s6335_s9 + $0x94] sm:$0xf] }
  0x39   : > { %v544_v0 = vsel %vm6379_vm4, %v539_v4, %v543_v28  ;;  %v370_v16 = vor.u32 %v369_v49, %v365_v48  ;;  %v375_v2 = vrot.slane %v373_v50, 5  ;;  %v548_v3 = vrot.slane %v546_v52, 4  ;;  %9048 = vst [vmem:[#allocation8_spill] sm:$0xff] %v6530_v47 }
  0x3a   : > { %v5049_v11 = vcombine.low %v534_v45, %v544_v0  ;;  %v361_v13 = vrot.slane %v360_v54, 4  ;;  %v551_v17 = vrot.slane %v549_v55, 5  ;;  %v557_v18 = vrot.slane %v555_v57, 5 }
  0x3b   : > { %v371_v20 = vrot.slane %v370_v16, 4  ;;  %v561_v22 = vrot.slane %v559_v59, 4  ;;  %v565_v23 = vshll.u32 %v6499_v51, 16  ;;  %v378_v26 = vshrl.u32 %v6507_v60, 16  ;;  %v6539_v16 = vld [vmem:[%s6335_s9 + $0x98] sm:$0x1] }
  0x3c   : > { %5756 = vmatprep.mubr.msk.bf16.mxu1 %vm715_vm3, %v5049_v11  ;;  %v366_v27 = vsel %vm6379_vm4, %v361_v13, %v365_v48  ;;  %v552_v28 = vor.u32 %v551_v17, %v548_v3  ;;  %v381_v34 = vshll.u32 %v6507_v60, 16  ;;  %v387_v37 = vshll.u32 %v6512_v9, 16  ;;  %9049 = vst [vmem:[#allocation9_spill] sm:$0xff] %v6539_v16  ;;  %v6544_v11 = vld [vmem:[%s6335_s9 + $0x3c] sm:$0xf] }
  0x3d   : > { %v376_v39 = vsel %vm6379_vm4, %v371_v20, %v375_v2  ;;  %v562_v42 = vor.u32 %v561_v22, %v557_v18  ;;  %v567_v44 = vrot.slane %v565_v23, 5  ;;  %v380_v45 = vrot.slane %v378_v26, 4  ;;  %v6549_v23 = vld [vmem:[%s6335_s9 + $0x40] sm:$0xf]  ;;  %v1222_v51 = vld [vmem:[%s6335_s9 + $0xc] sm:$0xe] }
  0x3e   : > { %v5042_v48 = vcombine.low %v366_v27, %v376_v39  ;;  %v553_v4 = vrot.slane %v552_v28, 4  ;;  %v383_v49 = vrot.slane %v381_v34, 5  ;;  %v389_v50 = vrot.slane %v387_v37, 5 }
  0x3f   : > { %v563_v52 = vrot.slane %v562_v42, 4  ;;  %v391_v54 = vshrl.u32 %v6512_v9, 16  ;;  %v397_v55 = vshll.u32 %v6520_v33, 16  ;;  %v570_v57 = vshrl.u32 %v6525_v38, 16 }
  0x40   : > { %5741 = vmatmul.mubr.msk.bf16.gmra.mxu0 %vm715_vm3, %v5042_v48  ;;  %v558_v59 = vsel %vm6379_vm4, %v553_v4, %v557_v18  ;;  %v384_v0 = vor.u32 %v383_v49, %v380_v45  ;;  %v573_v2 = vshll.u32 %v6525_v38, 16  ;;  %v579_v3 = vshll.u32 %v6530_v47, 16  ;;  %v6558_v48 = vld [vmem:[%s6335_s9 + $0x44] sm:$0x1] }
  0x41   : > { %v568_v13 = vsel %vm6379_vm4, %v563_v52, %v567_v44  ;;  %v393_v17 = vrot.slane %v391_v54, 4  ;;  %v399_v20 = vrot.slane %v397_v55, 5  ;;  %v572_v22 = vrot.slane %v570_v57, 4  ;;  %v6563_v52 = vld [vmem:[%s6335_s9 + $0x9c] sm:$0xf] }
  0x42   : > { %v5050_v18 = vcombine.low %v558_v59, %v568_v13  ;;  %v385_v26 = vrot.slane %v384_v0, 4  ;;  %v575_v27 = vrot.slane %v573_v2, 5  ;;  %v581_v28 = vrot.slane %v579_v3, 5  ;;  %9050 = vst [vmem:[#allocation10_spill] sm:$0xff] %v6563_v52  ;;  %v6567_v13 = vld [vmem:[%s6335_s9 + $0xa0] sm:$0xf] }
  0x43   : > { %v394_v34 = vor.u32 %v393_v17, %v389_v50  ;;  %v583_v37 = vshrl.u32 %v6530_v47, 16  ;;  %v589_v39 = vshll.u32 %v6539_v16, 16  ;;  %v402_v42 = vshrl.u32 %v6544_v11, 16  ;;  %9051 = vst [vmem:[#allocation11_spill] sm:$0xff] %v6567_v13 }
  0x44   : > { %5757 = vmatmul.mubr.msk.bf16.gmra.mxu1 %vm715_vm3, %v5050_v18  ;;  %v390_v44 = vsel %vm6379_vm4, %v385_v26, %v389_v50  ;;  %v576_v45 = vor.u32 %v575_v27, %v572_v22  ;;  %v405_v4 = vshll.u32 %v6544_v11, 16  ;;  %v411_v49 = vshll.u32 %v6549_v23, 16  ;;  %v6573_v26 = vld [vmem:[%s6335_s9 + $0xa4] sm:$0x1] }
  0x45   : > { %v395_v54 = vrot.slane %v394_v34, 4  ;;  %v585_v55 = vrot.slane %v583_v37, 4  ;;  %v591_v57 = vrot.slane %v589_v39, 5  ;;  %v404_v59 = vrot.slane %v402_v42, 4  ;;  %9052 = vst [vmem:[#allocation12_spill] sm:$0xff] %v6573_v26 }
  0x46   : > { %v577_v0 = vrot.slane %v576_v45, 4  ;;  %v407_v2 = vrot.slane %v405_v4, 5  ;;  %v413_v3 = vrot.slane %v411_v49, 5  ;;  %v415_v50 = vshrl.u32 %v6549_v23, 16  ;;  %v6577_v34 = vld [vmem:[%s6335_s9 + $0x48] sm:$0xf] }
  0x47   : > { %v400_v17 = vsel %vm6379_vm4, %v395_v54, %v399_v20  ;;  %v586_v22 = vor.u32 %v585_v55, %v581_v28  ;;  %v421_v18 = vshll.u32 %v6558_v48, 16  ;;  %v594_v27 = vshrl.u32 %v6563_v52, 16 }
  0x48   : > { %v5043_v37 = vcombine.low %v390_v44, %v400_v17  ;;  %v582_v39 = vsel %vm6379_vm4, %v577_v0, %v581_v28  ;;  %v408_v42 = vor.u32 %v407_v2, %v404_v59  ;;  %v417_v45 = vrot.slane %v415_v50, 4  ;;  %v6586_v17 = vld [vmem:[%s6335_s9 + $0x4c] sm:$0xf]  ;;  %v6592_v2 = vld [vmem:[%s6335_s9 + $0x50] sm:$0x1] }
  0x49   : > { %v587_v4 = vrot.slane %v586_v22, 4  ;;  %v423_v49 = vrot.slane %v421_v18, 5  ;;  %v596_v20 = vrot.slane %v594_v27, 4  ;;  %v597_v54 = vshll.u32 %v6563_v52, 16 }
  0x4a   : > { %5744 = vmatprep.mubr.msk.bf16.mxu0 %vm715_vm3, %v5043_v37  ;;  %v409_v55 = vrot.slane %v408_v42, 4  ;;  %v418_v62 = vor.u32 %v417_v45, %v413_v3  ;;  %v603_v32 = vshll.u32 %v6567_v13, 16  ;;  %v607_v44 = vshrl.u32 %v6567_v13, 16  ;;  %v6598_v42 = vld [vmem:[%s6335_s9 + $0xa8] sm:$0xf] }
  0x4b   : > { %v592_v28 = vsel %vm6379_vm4, %v587_v4, %v591_v57  ;;  %v599_v59 = vrot.slane %v597_v54, 5  ;;  %v613_v0 = vshll.u32 %v6573_v26, 16  ;;  %v426_v50 = vshrl.u32 %v6577_v34, 16  ;;  %9053 = vst [vmem:[#allocation13_spill] sm:$0xff] %v6598_v42 }
  0x4c   : > { %v5051_v22 = vcombine.low %v582_v39, %v592_v28  ;;  %v414_v18 = vsel %vm6379_vm4, %v409_v55, %v413_v3  ;;  %v419_v27 = vrot.slane %v418_v62, 4  ;;  %v605_v37 = vrot.slane %v603_v32, 5 }
  0x4d   : > { %v600_v45 = vor.u32 %v599_v59, %v596_v20  ;;  %v609_v61 = vrot.slane %v607_v44, 4  ;;  %v615_v57 = vrot.slane %v613_v0, 5  ;;  %v428_v4 = vrot.slane %v426_v50, 4  ;;  %v6608_v44 = vld [vmem:[%s6335_s9 + $0xac] sm:$0xf] }
  0x4e   : > { %5760 = vmatprep.mubr.msk.bf16.mxu1 %vm715_vm3, %v5051_v22  ;;  %v424_v54 = vsel %vm6379_vm4, %v419_v27, %v423_v49  ;;  %v429_v39 = vshll.u32 %v6577_v34, 16  ;;  %v435_v28 = vshll.u32 %v6586_v17, 16  ;;  %v439_v62 = vshrl.u32 %v6586_v17, 16  ;;  %9054 = vst [vmem:[#allocation14_spill] sm:$0xff] %v6608_v44  ;;  %v6611_v22 = vld [vmem:[%s6335_s9 + $0xb0] sm:$0x1] }
  0x4f   : > { %v5044_v3 = vcombine.low %v414_v18, %v424_v54  ;;  %v601_v32 = vrot.slane %v600_v45, 4  ;;  %v610_v55 = vor.u32 %v609_v61, %v605_v37  ;;  %v445_v20 = vshll.u32 %v6592_v2, 16  ;;  %9055 = vst [vmem:[#allocation15_spill] sm:$0xff] %v6611_v22 }
  0x50   : > { %v431_v59 = vrot.slane %v429_v39, 5  ;;  %v437_v0 = vrot.slane %v435_v28, 5  ;;  %v441_v50 = vrot.slane %v439_v62, 4  ;;  %v618_v49 = vshrl.u32 %v6598_v42, 16  ;;  %v6620_v62 = vld [vmem:[%s6335_s9 + $0x54] sm:$0xf] }
  0x51   : > { %5745 = vmatmul.mubr.msk.bf16.gmra.mxu0 %vm715_vm3, %v5044_v3  ;;  %v606_v18 = vsel %vm6379_vm4, %v601_v32, %v605_v37  ;;  %v611_v27 = vrot.slane %v610_v55, 4  ;;  %v447_v61 = vrot.slane %v445_v20, 5  ;;  %v621_v45 = vshll.u32 %v6598_v42, 16  ;;  %v6627_v55 = vld [vmem:[%s6335_s9 + $0x58] sm:$0xf] }
  0x52   : > { %v432_v54 = vor.u32 %v431_v59, %v428_v4  ;;  %v442_v56 = vor.u32 %v441_v50, %v437_v0  ;;  %v620_v39 = vrot.slane %v618_v49, 4  ;;  %v627_v28 = vshll.u32 %v6608_v44, 16  ;;  %v6630_v49 = vld [vmem:[%s6335_s9 + $0x5c] sm:$0x1] }
  0x53   : > { %v616_v3 = vsel %vm6379_vm4, %v611_v27, %v615_v57  ;;  %v623_v26 = vrot.slane %v621_v45, 5  ;;  %v631_v37 = vshrl.u32 %v6608_v44, 16  ;;  %v637_v32 = vshll.u32 %v6611_v22, 16  ;;  %v1221_v22 = vld [vmem:[%s6335_s9] sm:$0xe] }
  0x54   : > { %v5052_v4 = vcombine.low %v606_v18, %v616_v3  ;;  %v433_v20 = vrot.slane %v432_v54, 4  ;;  %v443_v59 = vrot.slane %v442_v56, 4  ;;  %v629_v50 = vrot.slane %v627_v28, 5  ;;  %v6641_v54 = vld [vmem:[%s6335_s9 + $0xb4] sm:$0xf] }
  0x55   : > { %v624_v42 = vor.u32 %v623_v26, %v620_v39  ;;  %v633_v52 = vrot.slane %v631_v37, 4  ;;  %v639_v13 = vrot.slane %v637_v32, 5  ;;  %v450_v57 = vshrl.u32 %v6620_v62, 16  ;;  %9056 = vst [vmem:[#allocation16_spill] sm:$0xff] %v6641_v54  ;;  %v6644_v37 = vld [vmem:[%s6335_s9 + $0xb8] sm:$0xf] }
  0x56   : > { %5761 = vmatmul.mubr.msk.bf16.gmra.mxu1 %vm715_vm3, %v5052_v4  ;;  %v438_v27 = vsel %vm6379_vm4, %v433_v20, %v437_v0  ;;  %v448_v18 = vsel %vm6379_vm4, %v443_v59, %v447_v61  ;;  %v453_v56 = vshll.u32 %v6620_v62, 16  ;;  %v459_v45 = vshll.u32 %v6627_v55, 16  ;;  %v6649_v61 = vld [vmem:[%s6335_s9 + $0xbc] sm:$0x1] }
  0x57   : > { %v5045_v26 = vcombine.low %v438_v27, %v448_v18  ;;  %v625_v39 = vrot.slane %v624_v42, 4  ;;  %v634_v28 = vor.u32 %v633_v52, %v629_v50  ;;  %v452_v3 = vrot.slane %v450_v57, 4 }
  0x58   : > { %v455_v32 = vrot.slane %v453_v56, 5  ;;  %v461_v4 = vrot.slane %v459_v45, 5  ;;  %v463_v0 = vshrl.u32 %v6627_v55, 16  ;;  %v469_v20 = vshll.u32 %v6630_v49, 16 }
  0x59   : > { %5748 = vmatprep.mubr.msk.bf16.mxu0 %vm715_vm3, %v5045_v26  ;;  %v630_v59 = vsel %vm6379_vm4, %v625_v39, %v629_v50  ;;  %v635_v27 = vrot.slane %v634_v28, 4  ;;  %v642_v52 = vshrl.u32 %v6641_v54, 16  ;;  %v645_v42 = vshll.u32 %v6641_v54, 16 }
  0x5a   : > { %v456_v57 = vor.u32 %v455_v32, %v452_v3  ;;  %v465_v18 = vrot.slane %v463_v0, 4  ;;  %v471_v56 = vrot.slane %v469_v20, 5  ;;  %v651_v45 = vshll.u32 %v6644_v37, 16 }
  0x5b   : > { %v640_v44 = vsel %vm6379_vm4, %v635_v27, %v639_v13  ;;  %v644_v16 = vrot.slane %v642_v52, 4  ;;  %v647_v26 = vrot.slane %v645_v42, 5  ;;  %v655_v38 = vshrl.u32 %v6644_v37, 16 }
  0x5c   : > { %v5053_v50 = vcombine.low %v630_v59, %v640_v44  ;;  %v457_v39 = vrot.slane %v456_v57, 4  ;;  %v466_v28 = vor.u32 %v465_v18, %v461_v4  ;;  %v653_v47 = vrot.slane %v651_v45, 5  ;;  %v1223_v57 = vld [vmem:[%s6335_s9 + $0x18] sm:$0xe] }
  0x5d   : > { %v648_v54 = vor.u32 %v647_v26, %v644_v16  ;;  %v657_v3 = vrot.slane %v655_v38, 4  ;;  %v661_v32 = vshll.u32 %v6649_v61, 16  ;;  %v5103_v13 = vrot.slane %v1221_v22, 9 }
  0x5e   : > { %5764 = vmatprep.mubr.msk.bf16.mxu1 %vm715_vm3, %v5053_v50  ;;  %v462_v44 = vsel %vm6379_vm4, %v457_v39, %v461_v4  ;;  %v467_v20 = vrot.slane %v466_v28, 4  ;;  %v1274_v59 = vrot.slane %v6344_v6, 5  ;;  %v5072_v38 = vcombine.low %v6372_v29, %v6375_v30 }
  0x5f   : > { %v649_v16 = vrot.slane %v648_v54, 4  ;;  %v658_v27 = vor.u32 %v657_v3, %v653_v47  ;;  %v663_v52 = vrot.slane %v661_v32, 5  ;;  %v5104_v42 = vrot.slane %v1222_v51, 9 }
  0x60   : > { %v472_v18 = vsel %vm6379_vm4, %v467_v20, %v471_v56  ;;  %v1275_v22 = vsel %vm6665_vm7, %v5103_v13, %v1274_v59  ;;  %v1276_v45 = vrot.slane %v1274_v59, 4  ;;  %v9059_v4 = vrot.slane %v6375_v30, 5 }
  0x61   : > { %v5046_v50 = vcombine.low %v462_v44, %v472_v18  ;;  %v654_v54 = vsel %vm6379_vm4, %v649_v16, %v653_v47  ;;  %v659_v39 = vrot.slane %v658_v27, 4  ;;  %v5071_v51 = vcombine.low %v6341_v5, %v6344_v6  ;;  %v1224_v27 = vld [vmem:[%s6335_s9 + $0x24] sm:$0xe] }
  0x62   : > { %v1283_v26 = vrot.slane %v9059_v4, 4  ;;  %v9060_v28 = vrot.slane %v6347_v7, 5  ;;  %v9061_v3 = vmov %v9059_v4  ;;  %v5073_v13 = vcombine.low %v6414_v8, %v6421_v21  ;;  %v1226_v4 = vld [vmem:[%s6335_s9 + $0x3c] sm:$0xe] }
  0x63   : > { %v1282_v32 = vsel %vm6665_vm7, %v5104_v42, %v9061_v3  ;;  %v5105_v44 = vrot.slane %v1223_v57, 9  ;;  %5749 = vmatmul.mubr.msk.bf16.gmra.mxu0 %vm715_vm3, %v5046_v50  ;;  %v664_v47 = vsel %vm6379_vm4, %v659_v39, %v663_v52  ;;  %v9062_v6 = vrot.slane %v6385_v41, 5  ;;  %v1225_v42 = vld [vmem:[%s6335_s9 + $0x30] sm:$0xe]  ;;  %v1227_v39 = vld [vmem:[%s6335_s9 + $0x48] sm:$0xe] }
  0x64   : > { %v1278_v56 = vsel %vm6665_vm7, %v1276_v45, %v9060_v28  ;;  %v1288_v20 = vrot.slane %v6421_v21, 5  ;;  %v5054_v59 = vcombine.low %v654_v54, %v664_v47  ;;  %v1291_v16 = vrot.slane %v6427_v25, 5  ;;  %v1228_v47 = vld [vmem:[%s6335_s9 + $0x54] sm:$0xe]  ;;  %v6960_v21 = vld [vmem:[%s6335_s9 + $0x2c] sm:$0x1] }
  0x65   : > { %v5120_v5 = vcombine.low %v1275_v22, %v1278_v56  ;;  %v1285_v7 = vsel %vm6665_vm7, %v1283_v26, %v9062_v6  ;;  %v1845_v52 = vsel %vm764_vm0, %v6472_v19, 0  ;;  %v1295_v18 = vrot.slane %v6466_v10, 5 }
  0x66   : > { %v1289_v41 = vsel %vm6665_vm7, %v5105_v44, %v1288_v20  ;;  %v1290_v57 = vrot.slane %v1288_v20, 4  ;;  %5765 = vmatmul.mubr.msk.bf16.gmra.mxu1 %vm715_vm3, %v5054_v59  ;;  %v5121_v22 = vcombine.low %v1282_v32, %v1285_v7  ;;  %v2571_v25 = vsel %vm764_vm0, %v6440_v40, 0 }
  0x67   : > { %5804 = vmatprep.mubr.msk.bf16.mxu0 %vm715_vm3, %v5120_v5  ;;  %v1302_v45 = vrot.slane %v6512_v9, 5  ;;  %5770 = vmatprep.mubr.msk.bf16.mxu1 %vm715_vm3, %v5071_v51  ;;  %v5106_v26 = vrot.slane %v1224_v27, 9  ;;  %v1298_v50 = vrot.slane %v6477_v24, 5  ;;  %v5107_v54 = vrot.slane %v1225_v42, 9  ;;  %v6732_v24 = vld [vmem:[%s9005_s1 + $0xc] sm:$0x3] }
  0x68   : > { %v1292_v19 = vsel %vm6665_vm7, %v1290_v57, %v1291_v16  ;;  %v1297_v56 = vrot.slane %v1295_v18, 4  ;;  %v1305_v32 = vrot.slane %v6520_v33, 5  ;;  %v5108_v44 = vrot.slane %v1226_v4, 9 }
  0x69   : > { %v5122_v28 = vcombine.low %v1289_v41, %v1292_v19  ;;  %v1304_v3 = vrot.slane %v1302_v45, 4  ;;  %v1309_v40 = vrot.slane %v6549_v23, 5  ;;  %v1333_v5 = vrot.slane %v6361_v15, 5 }
  0x6a   : > { %v1312_v51 = vrot.slane %v6558_v48, 5  ;;  %v5109_v6 = vrot.slane %v1227_v39, 9  ;;  %v1316_v7 = vrot.slane %v6586_v17, 5  ;;  %v5074_v33 = vcombine.low %v6458_v1, %v6466_v10  ;;  %v1229_v1 = vld [vmem:[%s6335_s9 + $0x60] sm:$0xe] }
  0x6b   : > { %5805 = vmatmul.mubr.msk.bf16.vlgmr.msra.gmra.mxu0 %vm715_vm3, %v5121_v22  ;;  %v1296_v20 = vsel %vm6665_vm7, %v5106_v26, %v1295_v18  ;;  %v1311_v59 = vrot.slane %v1309_v40, 4  ;;  %v1319_v16 = vrot.slane %v6592_v2, 5  ;;  %v1299_v48 = vsel %vm6665_vm7, %v1297_v56, %v1298_v50  ;;  %v6760_v22 = vld [vmem:[%s9005_s1 + $0xa] sm:$0x3]  ;;  %v6785_v50 = vld [vmem:[%s6335_s9 + $0x6c] sm:$0xe] }
  0x6c   : > { %5871 = vmatpush3.bf16.msra.mxu0 %v2571_v25  ;;  %5808 = vmatprep.mubr.msk.bf16.mxu0 %vm715_vm3, %v5122_v28  ;;  %v1303_v27 = vsel %vm6665_vm7, %v5107_v54, %v1302_v45  ;;  %v1306_v42 = vsel %vm6665_vm7, %v1304_v3, %v1305_v32  ;;  %v1318_v41 = vrot.slane %v1316_v7, 4  ;;  %v6750_v10 = vsel %vm6665_vm7, %v5108_v44, %v1309_v40  ;;  %v1232_v39 = vld [vmem:[%s6335_s9 + $0x84] sm:$0xe]  ;;  %v6814_v44 = vld [vmem:[%s6335_s9 + $0x78] sm:$0xe] }
  0x6d   : > { %v6754_v2 = vsel %vm6665_vm7, %v5109_v6, %v1316_v7  ;;  %v5110_v57 = vrot.slane %v1228_v47, 9  ;;  %v1323_v18 = vrot.slane %v6627_v55, 5  ;;  %6049 = vmatprep.subr.msk.bf16.mxu0 %vm764_vm0, %v6732_v24  ;;  %v6770_v25 = vsel %vm6665_vm7, %v1311_v59, %v1312_v51  ;;  %v1233_v40 = vld [vmem:[%s6335_s9 + $0x90] sm:$0xe] }
  0x6e   : > { %5771 = vmatmul.mubr.msk.bf16.vlgmr.msra.gmra.mxu1 %vm715_vm3, %v5072_v38  ;;  %v6774_v45 = vsel %vm6665_vm7, %v1318_v41, %v1319_v16  ;;  %v1326_v4 = vrot.slane %v6630_v49, 5  ;;  %v1330_v19 = vrot.slane %v6358_v14, 5  ;;  %v5123_v29 = vcombine.low %v1296_v20, %v1299_v48  ;;  %v9063_v48 = vld [vmem:[#allocation6_spill] sm:$0xff] }
  0x6f   : > { %5837 = vmatpush3.bf16.msra.mxu1 %v1845_v52  ;;  %5774 = vmatprep.mubr.msk.bf16.mxu1 %vm715_vm3, %v5073_v13  ;;  %v5075_v30 = vcombine.low %v6507_v60, %v6512_v9  ;;  %v1325_v38 = vrot.slane %v1323_v18, 4  ;;  %v5111_v26 = vrot.slane %v1229_v1, 9  ;;  %v5124_v49 = vcombine.low %v1303_v27, %v1306_v42  ;;  %v1234_v42 = vld [vmem:[%s6335_s9 + $0x9c] sm:$0xe] }
  0x70   : > { %v5076_v52 = vcombine.low %v6544_v11, %v6549_v23  ;;  %v5077_v8 = vcombine.low %v6577_v34, %v6586_v17  ;;  %6048 = vmatprep.subr.msk.bf16.mxu1 %vm764_vm0, %v6760_v22  ;;  %v5125_v60 = vcombine.low %v6750_v10, %v6770_v25  ;;  %v5126_v9 = vcombine.low %v6754_v2, %v6774_v45  ;;  %v9064_v10 = vld [vmem:[#allocation8_spill] sm:$0xff]  ;;  %v9065_v2 = vld [vmem:[#allocation7_spill] sm:$0xff] }
  0x71   : > { %v1332_v54 = vrot.slane %v1330_v19, 4  ;;  %v6804_v28 = vsel %vm6665_vm7, %v5110_v57, %v1323_v18  ;;  %v6808_v56 = vsel %vm6665_vm7, %v1325_v38, %v1326_v4  ;;  %v5112_v32 = vrot.slane %v6785_v50, 9  ;;  %v1235_v18 = vld [vmem:[%s6335_s9 + $0xa8] sm:$0xe]  ;;  %v9067_v38 = vld [vmem:[#allocation11_spill] sm:$0xff] }
  0x72   : > { %v6820_v47 = vsel %vm6665_vm7, %v5111_v26, %v1330_v19  ;;  %v1337_v51 = vrot.slane %v6400_v58, 5  ;;  %v1340_v6 = vrot.slane %v6408_v63, 5  ;;  %v5114_v59 = vrot.slane %v1232_v39, 9  ;;  %v9066_v19 = vld [vmem:[#allocation9_spill] sm:$0xff]  ;;  %v9068_v26 = vld [vmem:[#allocation10_spill] sm:$0xff] }
  0x73   : > { %5809 = vmatmul.mubr.msk.bf16.gmra.mxu0 %vm715_vm3, %v5123_v29  ;;  %v1351_v16 = vrot.slane %v6491_v43, 5  ;;  %v1354_v27 = vrot.slane %v9063_v48, 5  ;;  %v5127_v41 = vcombine.low %v6804_v28, %v6808_v56  ;;  %v6838_v63 = vsel %vm6665_vm7, %v1332_v54, %v1333_v5  ;;  %v9070_v48 = vld [vmem:[#allocation14_spill] sm:$0xff] }
  0x74   : > { %5812 = vmatprep.mubr.msk.bf16.mxu0 %vm715_vm3, %v5124_v49  ;;  %v5113_v1 = vrot.slane %v6814_v44, 9  ;;  %v5115_v4 = vrot.slane %v1233_v40, 9  ;;  %v1358_v15 = vrot.slane %v9064_v10, 5  ;;  %v1339_v5 = vrot.slane %v1337_v51, 4  ;;  %v5217_v57 = vld [vmem:[%s6335_s9 + $0xc] sm:$0xf] }
  0x75   : > { %v6847_v25 = vsel %vm6665_vm7, %v5114_v59, %v1351_v16  ;;  %v1353_v45 = vrot.slane %v1351_v16, 4  ;;  %v1361_v29 = vrot.slane %v9066_v19, 5  ;;  %v5116_v49 = vrot.slane %v1234_v42, 9  ;;  %v9069_v59 = vld [vmem:[#allocation12_spill] sm:$0xff]  ;;  %v9071_v42 = vld [vmem:[#allocation13_spill] sm:$0xff] }
  0x76   : > { %5775 = vmatmul.mubr.msk.bf16.gmra.mxu1 %vm715_vm3, %v5074_v33  ;;  %v1344_v33 = vrot.slane %v6445_v46, 5  ;;  %v6861_v39 = vsel %vm6665_vm7, %v5115_v4, %v1358_v15  ;;  %v1360_v44 = vrot.slane %v1358_v15, 4  ;;  %v1365_v40 = vrot.slane %v9067_v38, 5  ;;  %v9072_v15 = vld [vmem:[#allocation15_spill] sm:$0xff] }
  0x77   : > { %5778 = vmatprep.mubr.msk.bf16.mxu1 %vm715_vm3, %v5075_v30  ;;  %v6857_v54 = vsel %vm6665_vm7, %v1353_v45, %v1354_v27  ;;  %v1368_v16 = vrot.slane %v9069_v59, 5  ;;  %v5117_v45 = vrot.slane %v1235_v18, 9  ;;  %v1372_v4 = vrot.slane %v9070_v48, 5 }
  0x78   : > { %v6871_v27 = vsel %vm6665_vm7, %v1360_v44, %v1361_v29  ;;  %v1375_v50 = vrot.slane %v9072_v15, 5  ;;  %v6881_v19 = vsel %vm6665_vm7, %v5116_v49, %v1365_v40  ;;  %v1367_v7 = vrot.slane %v1365_v40, 4  ;;  %v9073_v29 = vld [vmem:[#allocation16_spill] sm:$0xff]  ;;  %v9074_v15 = vld [vmem:[#allocation5_spill] sm:$0xff]  ;;  %v6896_v49 = vld [vmem:[%s6335_s9 + $0x10] sm:$0xf] }
  0x79   : > { %v6888_v18 = vsel %vm6665_vm7, %v5112_v32, %v1337_v51  ;;  %v6893_v59 = vsel %vm6665_vm7, %v5117_v45, %v1372_v4  ;;  %v1374_v30 = vrot.slane %v1372_v4, 4  ;;  %v5220_v40 = vld [vmem:[%s6335_s9 + $0x18] sm:$0xf]  ;;  %v1346_v20 = vrot.slane %v1344_v33, 4 }
  0x7a   : > { %v2089_v44 = vshrl.u32 %v5217_v57, 16  ;;  %v2092_v32 = vshll.u32 %v5217_v57, 16  ;;  %v5128_v51 = vcombine.low %v6820_v47, %v6838_v63  ;;  %v6911_v45 = vsel %vm6665_vm7, %v1339_v5, %v1340_v6  ;;  %v1236_v57 = vld [vmem:[%s6335_s9 + $0xb4] sm:$0xe]  ;;  %v6932_v47 = vld [vmem:[%s6335_s9 + $0x14] sm:$0x1] }
  0x7b   : > { %5813 = vmatmul.mubr.msk.bf16.gmra.mxu0 %vm715_vm3, %v5125_v60  ;;  %v1347_v60 = vrot.slane %v9074_v15, 5  ;;  %v6926_v11 = vsel %vm6665_vm7, %v5113_v1, %v1344_v33  ;;  %v2098_v6 = vshll.u32 %v6896_v49, 16  ;;  %v5221_v63 = vld [vmem:[%s6335_s9 + $0x1c] sm:$0xf]  ;;  %v2102_v17 = vshrl.u32 %v6896_v49, 16 }
  0x7c   : > { %5816 = vmatprep.mubr.msk.bf16.mxu0 %vm715_vm3, %v5126_v9  ;;  %v6901_v9 = vsel %vm6665_vm7, %v1367_v7, %v1368_v16  ;;  %v6917_v7 = vsel %vm6665_vm7, %v1374_v30, %v1375_v50  ;;  %v2091_v5 = vrot.slane %v2089_v44, 4  ;;  %v2094_v34 = vrot.slane %v2092_v32, 5  ;;  %v5223_v15 = vld [vmem:[%s6335_s9 + $0x24] sm:$0xf]  ;;  %v6945_v44 = vld [vmem:[%s6335_s9 + $0x28] sm:$0xf] }
  0x7d   : > { %v2113_v50 = vshrl.u32 %v5220_v40, 16  ;;  %v1348_v1 = vsel %vm6665_vm7, %v1346_v20, %v1347_v60  ;;  %v5118_v33 = vrot.slane %v1236_v57, 9  ;;  %v6940_v30 = vrot.slane %v2098_v6, 5 }
  0x7e   : > { %5779 = vmatmul.mubr.msk.bf16.gmra.mxu1 %vm715_vm3, %v5076_v52  ;;  %v1379_v52 = vrot.slane %v6644_v37, 5  ;;  %v2116_v16 = vshll.u32 %v5220_v40, 16  ;;  %v1382_v23 = vrot.slane %v6649_v61, 5  ;;  %v2104_v4 = vrot.slane %v2102_v17, 4 }
  0x7f   : > { %5782 = vmatprep.mubr.msk.bf16.mxu1 %vm715_vm3, %v5077_v8  ;;  %v5222_v8 = vld [vmem:[%s6335_s9 + $0x20] sm:$0x1]  ;;  %v2115_v3 = vrot.slane %v2113_v50, 4  ;;  %v2122_v13 = vshll.u32 %v5221_v63, 16  ;;  %v2108_v20 = vshll.u32 %v6932_v47, 16  ;;  %v2126_v57 = vshrl.u32 %v5221_v63, 16 }
  0x80   : > { %v1381_v32 = vrot.slane %v1379_v52, 4  ;;  %v2118_v60 = vrot.slane %v2116_v16, 5  ;;  %v5129_v61 = vcombine.low %v6888_v18, %v6911_v45  ;;  %v5130_v40 = vcombine.low %v6926_v11, %v1348_v1 }
  0x81   : > { %v2095_v6 = vor.u32 %v2094_v34, %v2091_v5  ;;  %v6956_v17 = vrot.slane %v2122_v13, 5  ;;  %v2105_v28 = vor.u32 %v2104_v4, %v6940_v30  ;;  %v2132_v50 = vshll.u32 %v5222_v8, 16  ;;  %v6983_v5 = vld [vmem:[%s6335_s9 + $0x34] sm:$0xf] }
  0x82   : > { %v2119_v56 = vor.u32 %v2118_v60, %v2115_v3  ;;  %v6968_v18 = vsel %vm6665_vm7, %v5118_v33, %v1379_v52  ;;  %v2137_v13 = vshrl.u32 %v5223_v15, 16  ;;  %v2140_v45 = vshll.u32 %v5223_v15, 16  ;;  %v5226_v52 = vld [vmem:[%s6335_s9 + $0x30] sm:$0xf] }
  0x83   : > { %5817 = vmatmul.mubr.msk.bf16.gmra.mxu0 %vm715_vm3, %v5127_v41  ;;  %v2128_v41 = vrot.slane %v2126_v57, 4  ;;  %v2146_v11 = vshll.u32 %v6945_v44, 16  ;;  %v9076_v3 = vcombine.low %v6354_v12, %v6358_v14  ;;  %v6977_v4 = vsel %vm6665_vm7, %v1381_v32, %v1382_v23 }
  0x84   : > { %5820 = vmatprep.mubr.msk.bf16.mxu0 %vm715_vm3, %v5128_v51  ;;  %v9075_v51 = vcombine.low %v6620_v62, %v6627_v55  ;;  %v2110_v62 = vrot.slane %v2108_v20, 5  ;;  %v2150_v63 = vshrl.u32 %v6945_v44, 16  ;;  %v2096_v34 = vrot.slane %v2095_v6, 4 }
  0x85   : > { %v2129_v55 = vor.u32 %v2128_v41, %v6956_v17  ;;  %v2139_v8 = vrot.slane %v2137_v13, 4  ;;  %v2142_v1 = vrot.slane %v2140_v45, 5  ;;  %v6985_v33 = vrot.slane %v2146_v11, 5  ;;  %v6991_v41 = vld [vmem:[%s6335_s9 + $0x38] sm:$0x1] }
  0x86   : > { %5783 = vmatmul.mubr.msk.bf16.gmra.mxu1 %vm715_vm3, %v9075_v51  ;;  %v2106_v12 = vrot.slane %v2105_v28, 4  ;;  %v2120_v14 = vrot.slane %v2119_v56, 4  ;;  %v2134_v16 = vrot.slane %v2132_v50, 5  ;;  %v2152_v23 = vrot.slane %v2150_v63, 4  ;;  %v5229_v13 = vld [vmem:[%s6335_s9 + $0x3c] sm:$0xf] }
  0x87   : > { %5786 = vmatprep.mubr.msk.bf16.mxu1 %vm715_vm3, %v9076_v3  ;;  %v2130_v15 = vrot.slane %v2129_v55, 4  ;;  %v2156_v32 = vshll.u32 %v6960_v21, 16  ;;  %v2161_v20 = vshrl.u32 %v5226_v52, 16  ;;  %v2164_v60 = vshll.u32 %v5226_v52, 16 }
  0x88   : > { %v2143_v57 = vor.u32 %v2142_v1, %v2139_v8  ;;  %v2153_v6 = vor.u32 %v2152_v23, %v6985_v33  ;;  %v2170_v28 = vshll.u32 %v6983_v5, 16  ;;  %v2174_v56 = vshrl.u32 %v6983_v5, 16  ;;  %v5232_v8 = vld [vmem:[%s6335_s9 + $0x48] sm:$0xf]  ;;  %v7018_v1 = vld [vmem:[%s6335_s9 + $0x4c] sm:$0xf] }
  0x89   : > { %v2163_v50 = vrot.slane %v2161_v20, 4  ;;  %v2166_v51 = vrot.slane %v2164_v60, 5  ;;  %v9077_v3 = vcombine.low %v6396_v53, %v6400_v58  ;;  %v5135_v55 = vcombine.low %v6968_v18, %v6977_v4 }
  0x8a   : > { %v6997_v45 = vrot.slane %v2170_v28, 5  ;;  %v2176_v11 = vrot.slane %v2174_v56, 4  ;;  %v2111_v63 = vsel %vm6379_vm4, %v2106_v12, %v2110_v62  ;;  %v2125_v52 = vsel %vm6379_vm4, %v2120_v14, %v6956_v17 }
  0x8b   : > { %5821 = vmatmul.mubr.msk.bf16.gmra.mxu0 %vm715_vm3, %v5129_v61  ;;  %v7000_v61 = vld [vmem:[%s6335_s9 + $0x40] sm:$0xf]  ;;  %v9078_v53 = vcombine.low %v6434_v35, %v6445_v46  ;;  %v2135_v58 = vsel %vm6379_vm4, %v2130_v15, %v2134_v16  ;;  %v2144_v23 = vrot.slane %v2143_v57, 4  ;;  %v2167_v20 = vor.u32 %v2166_v51, %v2163_v50  ;;  %v7052_v50 = vld [vmem:[%s6335_s9 + $0x44] sm:$0x1] }
  0x8c   : > { %5824 = vmatprep.mubr.msk.bf16.mxu0 %vm715_vm3, %v5130_v40  ;;  %v2101_v40 = vsel %vm6379_vm4, %v2096_v34, %v6940_v30  ;;  %v2154_v30 = vrot.slane %v2153_v6, 4  ;;  %v2158_v34 = vrot.slane %v2156_v32, 5  ;;  %v2180_v62 = vshll.u32 %v6991_v41, 16  ;;  %v5235_v51 = vld [vmem:[%s6335_s9 + $0x54] sm:$0xf] }
  0x8d   : > { %v2185_v12 = vshrl.u32 %v5229_v13, 16  ;;  %v2188_v17 = vshll.u32 %v5229_v13, 16  ;;  %v7029_v14 = vsel %vm764_vm0, %v6760_v22, 0  ;;  %v2177_v35 = vor.u32 %v2176_v11, %v6997_v45 }
  0x8e   : > { %5787 = vmatmul.mubr.msk.bf16.gmra.mxu1 %vm715_vm3, %v9077_v3  ;;  %v2194_v46 = vshll.u32 %v7000_v61, 16  ;;  %v2198_v16 = vshrl.u32 %v7000_v61, 16  ;;  %v7034_v15 = vcombine.low %v2101_v40, %v2111_v63  ;;  %v7038_v32 = vsel %vm764_vm0, %v6732_v24, 0  ;;  %v7061_v40 = vld [vmem:[%s6335_s9 + $0x58] sm:$0xf] }
  0x8f   : > { %5790 = vmatprep.mubr.msk.bf16.mxu1 %vm715_vm3, %v9078_v53  ;;  %v2209_v60 = vshrl.u32 %v5232_v8, 16  ;;  %v2212_v57 = vshll.u32 %v5232_v8, 16  ;;  %v9079_v6 = vcombine.low %v6847_v25, %v6857_v54  ;;  %v7044_v22 = vcombine.low %v2125_v52, %v2135_v58  ;;  %v7066_v8 = vld [vmem:[%s6335_s9 + $0x50] sm:$0x1] }
  0x90   : > { %v2149_v28 = vsel %vm6379_vm4, %v2144_v23, %v6985_v33  ;;  %v2159_v56 = vsel %vm6379_vm4, %v2154_v30, %v2158_v34  ;;  %v2218_v24 = vshll.u32 %v7018_v1, 16  ;;  %v9080_v25 = vcombine.low %v6861_v39, %v6871_v27  ;;  %v5238_v34 = vld [vmem:[%s6335_s9 + $0x60] sm:$0xf] }
  0x91   : > { %v2168_v54 = vrot.slane %v2167_v20, 4  ;;  %v2182_v13 = vrot.slane %v2180_v62, 5  ;;  %v2187_v11 = vrot.slane %v2185_v12, 4  ;;  %v2190_v3 = vrot.slane %v2188_v17, 5 }
  0x92   : > { %v2178_v33 = vrot.slane %v2177_v35, 4  ;;  %v7063_v63 = vrot.slane %v2194_v46, 5  ;;  %v2200_v52 = vrot.slane %v2198_v16, 4  ;;  %v2222_v53 = vshrl.u32 %v7018_v1, 16  ;;  %v7083_v35 = vld [vmem:[%s6335_s9 + $0x5c] sm:$0x1] }
  0x93   : > { %5825 = vmatmul.mubr.msk.bf16.gmra.mxu0 %vm715_vm3, %v9079_v6  ;;  %v9081_v39 = vcombine.low %v6484_v36, %v6491_v43  ;;  %v2211_v27 = vrot.slane %v2209_v60, 4  ;;  %v2214_v58 = vrot.slane %v2212_v57, 5  ;;  %v2233_v23 = vshrl.u32 %v5235_v51, 16 }
  0x94   : > { %5828 = vmatprep.mubr.msk.bf16.mxu0 %vm715_vm3, %v9080_v25  ;;  %v2236_v30 = vshll.u32 %v5235_v51, 16  ;;  %v9082_v20 = vcombine.low %v9065_v2, %v9064_v10  ;;  %v7078_v62 = vcombine.low %v2149_v28, %v2159_v56  ;;  %v7080_v12 = vrot.slane %v2218_v24, 5  ;;  %v7096_v28 = vld [vmem:[%s6335_s9 + $0x64] sm:$0xf] }
  0x95   : > { %v2224_v17 = vrot.slane %v2222_v53, 4  ;;  %v2242_v36 = vshll.u32 %v7061_v40, 16  ;;  %v2204_v43 = vshll.u32 %v7052_v50, 16  ;;  %v2235_v46 = vrot.slane %v2233_v23, 4 }
  0x96   : > { %5791 = vmatmul.mubr.msk.bf16.gmra.mxu1 %vm715_vm3, %v9081_v39  ;;  %v2238_v16 = vrot.slane %v2236_v30, 5  ;;  %v2246_v60 = vshrl.u32 %v7061_v40, 16  ;;  %v2173_v10 = vsel %vm6379_vm4, %v2168_v54, %v6997_v45  ;;  %v2183_v2 = vsel %vm6379_vm4, %v2178_v33, %v2182_v13  ;;  %v7118_v30 = vld [vmem:[%s6335_s9 + $0x68] sm:$0x1] }
  0x97   : > { %5794 = vmatprep.mubr.msk.bf16.mxu1 %vm715_vm3, %v9082_v20  ;;  %v2191_v57 = vor.u32 %v2190_v3, %v2187_v11  ;;  %v7093_v6 = vrot.slane %v2242_v36, 5  ;;  %v2201_v56 = vor.u32 %v2200_v52, %v7063_v63  ;;  %v2215_v24 = vor.u32 %v2214_v58, %v2211_v27  ;;  %v5241_v3 = vld [vmem:[%s6335_s9 + $0x6c] sm:$0xf]  ;;  %v7115_v27 = vld [vmem:[%s6335_s9 + $0x70] sm:$0xf] }
  0x98   : > { %v2228_v51 = vshll.u32 %v7066_v8, 16  ;;  %v2248_v25 = vrot.slane %v2246_v60, 4  ;;  %v9083_v53 = vcombine.low %v6881_v19, %v6901_v9  ;;  %v2225_v45 = vor.u32 %v2224_v17, %v7080_v12 }
  0x99   : > { %v2239_v54 = vor.u32 %v2238_v16, %v2235_v46  ;;  %v2257_v13 = vshrl.u32 %v5238_v34, 16  ;;  %v2260_v11 = vshll.u32 %v5238_v34, 16  ;;  %v9084_v33 = vcombine.low %v6893_v59, %v6917_v7  ;;  %v5244_v16 = vld [vmem:[%s6335_s9 + $0x78] sm:$0xf] }
  0x9a   : > { %v2249_v52 = vor.u32 %v2248_v25, %v7093_v6  ;;  %v2252_v39 = vshll.u32 %v7083_v35, 16  ;;  %v2266_v19 = vshll.u32 %v7096_v28, 16  ;;  %v2270_v9 = vshrl.u32 %v7096_v28, 16 }
  0x9b   : > { %5829 = vmatmul.mubr.msk.bf16.gmra.mxu0 %vm715_vm3, %v9083_v53  ;;  %v2192_v58 = vrot.slane %v2191_v57, 4  ;;  %v2206_v23 = vrot.slane %v2204_v43, 5  ;;  %v2259_v34 = vrot.slane %v2257_v13, 4  ;;  %v2262_v20 = vrot.slane %v2260_v11, 5 }
  0x9c   : > { %5832 = vmatprep.mubr.msk.bf16.mxu0 %vm715_vm3, %v9084_v33  ;;  %v9085_v59 = vcombine.low %v9068_v26, %v9067_v38  ;;  %v7124_v7 = vcombine.low %v2173_v10, %v2183_v2  ;;  %v2202_v17 = vrot.slane %v2201_v56, 4  ;;  %v2216_v36 = vrot.slane %v2215_v24, 4  ;;  %v7134_v2 = vld [vmem:[%s6335_s9 + $0x7c] sm:$0xf] }
  0x9d   : > { %v7126_v46 = vrot.slane %v2266_v19, 5  ;;  %v9086_v43 = vcombine.low %v9071_v42, %v9070_v48  ;;  %v2226_v60 = vrot.slane %v2225_v45, 4  ;;  %v2230_v57 = vrot.slane %v2228_v51, 5  ;;  %9087 = vst [vmem:[#allocation6_spill] sm:$0xff] %v7134_v2  ;;  %v5247_v19 = vld [vmem:[%s6335_s9 + $0x84] sm:$0xf] }
  0x9e   : > { %5795 = vmatmul.mubr.msk.bf16.gmra.mxu1 %vm715_vm3, %v9085_v59  ;;  %v2240_v25 = vrot.slane %v2239_v54, 4  ;;  %v2272_v38 = vrot.slane %v2270_v9, 4  ;;  %v2250_v26 = vrot.slane %v2249_v52, 4  ;;  %v2254_v53 = vrot.slane %v2252_v39, 5 }
  0x9f   : > { %5798 = vmatprep.mubr.msk.bf16.mxu1 %vm715_vm3, %v9086_v43  ;;  %v2263_v13 = vor.u32 %v2262_v20, %v2259_v34  ;;  %v2281_v10 = vshrl.u32 %v5241_v3, 16  ;;  %v2197_v56 = vsel %vm6379_vm4, %v2192_v58, %v7063_v63  ;;  %v2284_v24 = vshll.u32 %v5241_v3, 16  ;;  %v6126_v63 = vld [vmem:[%s6335_s9 + $0xc] sm:$0xff]   ;;  %v7168_v34 = vld [vmem:[%s6335_s9 + $0x88] sm:$0xf] }
  0xa0   : > { %v2290_v48 = vshll.u32 %v7115_v27, 16  ;;  %v2294_v42 = vshrl.u32 %v7115_v27, 16  ;;  %v2207_v51 = vsel %vm6379_vm4, %v2202_v17, %v2206_v23  ;;  %v2221_v45 = vsel %vm6379_vm4, %v2216_v36, %v7080_v12  ;;  %9088 = vst [vmem:[#allocation8_spill] sm:$0xff] %v7168_v34  ;;  %v7177_v36 = vld [vmem:[%s6335_s9 + $0x74] sm:$0x1] }
  0xa1   : > { %v2273_v54 = vor.u32 %v2272_v38, %v7126_v46  ;;  %v2276_v11 = vshll.u32 %v7118_v30, 16  ;;  %v2231_v3 = vsel %vm6379_vm4, %v2226_v60, %v2230_v57  ;;  %v2245_v33 = vsel %vm6379_vm4, %v2240_v25, %v7093_v6  ;;  %9090 = vst [vmem:[#allocation7_spill] sm:$0xff] %v7177_v36  ;;  %v7187_v38 = vld [vmem:[%s6335_s9 + $0x80] sm:$0x1] }
  0xa2   : > { %v2305_v52 = vshrl.u32 %v5244_v16, 16  ;;  %v2308_v12 = vshll.u32 %v5244_v16, 16  ;;  %v2255_v18 = vsel %vm6379_vm4, %v2250_v26, %v2254_v53  ;;  %v2264_v4 = vrot.slane %v2263_v13, 4  ;;  %9091 = vst [vmem:[#allocation9_spill] sm:$0xff] %v7187_v38  ;;  %v7190_v26 = vld [vmem:[%s6335_s9 + $0x8c] sm:$0x1] }
  0xa3   : > { %5833 = vmatmul.mubr.msk.bf16.gmra.mxu0 %vm715_vm3, %v5135_v55  ;;  %v2283_v55 = vrot.slane %v2281_v10, 4  ;;  %v2314_v39 = vshll.u32 %v7134_v2, 16  ;;  %v2286_v9 = vrot.slane %v2284_v24, 5  ;;  %v7164_v58 = vrot.slane %v2290_v48, 5  ;;  %9092 = vst [vmem:[#allocation11_spill] sm:$0xff] %v7190_v26  ;;  %v6127_v10 = vld [vmem:[%s6335_s9 + $0x18] sm:$0xff]  }
  0xa4   : > { %5872 = vmatprep.mubr.msk.bf16.mxu0 %vm715_vm3, %v7034_v15  ;;  %v2296_v23 = vrot.slane %v2294_v42, 4  ;;  %v2318_v6 = vshrl.u32 %v7134_v2, 16  ;;  %v9089_v15 = vcombine.low %v9073_v29, %v6644_v37  ;;  %v7174_v20 = vcombine.low %v2197_v56, %v2207_v51  ;;  %v5250_v51 = vld [vmem:[%s6335_s9 + $0x90] sm:$0xf] }
  0xa5   : > { %v2274_v59 = vrot.slane %v2273_v54, 4  ;;  %v2278_v17 = vrot.slane %v2276_v11, 5  ;;  %v2307_v16 = vrot.slane %v2305_v52, 4  ;;  %v2310_v43 = vrot.slane %v2308_v12, 5 }
  0xa6   : > { %5799 = vmatmul.mubr.msk.bf16.gmra.mxu1 %vm715_vm3, %v9089_v15  ;;  %v7180_v60 = vrot.slane %v2314_v39, 5  ;;  %v2320_v57 = vrot.slane %v2318_v6, 4  ;;  %v2329_v25 = vshrl.u32 %v5247_v19, 16  ;;  %v7182_v37 = vcombine.low %v2221_v45, %v2231_v3  ;;  %v7201_v45 = vld [vmem:[%s6335_s9 + $0x94] sm:$0xf] }
  0xa7   : > { %5838 = vmatprep.mubr.msk.bf16.mxu1 %vm715_vm3, %v6126_v63  ;;  %v7184_v29 = vcombine.low %v2245_v33, %v2255_v18  ;;  %v2332_v53 = vshll.u32 %v5247_v19, 16  ;;  %v2338_v13 = vshll.u32 %v7168_v34, 16  ;;  %v2269_v56 = vsel %vm6379_vm4, %v2264_v4, %v7126_v46  ;;  %9093 = vst [vmem:[#allocation10_spill] sm:$0xff] %v7201_v45  ;;  %v7209_v33 = vld [vmem:[%s9005_s1 + $0x10] sm:$0x3]  ;;  %v6128_v46 = vld [vmem:[%s6335_s9 + $0x24] sm:$0xff]  }
  0xa8   : > { %v2287_v24 = vor.u32 %v2286_v9, %v2283_v55  ;;  %v2297_v48 = vor.u32 %v2296_v23, %v7164_v58  ;;  %v2300_v42 = vshll.u32 %v7177_v36, 16  ;;  %v2331_v54 = vrot.slane %v2329_v25, 4  ;;  %9094 = vst [vmem:[#allocation12_spill] sm:$0xff] %v7209_v33 }
  0xa9   : > { %v2334_v11 = vrot.slane %v2332_v53, 5  ;;  %v7203_v63 = vrot.slane %v2338_v13, 5  ;;  %v2342_v3 = vshrl.u32 %v7168_v34, 16  ;;  %v2279_v52 = vsel %vm6379_vm4, %v2274_v59, %v2278_v17 }
  0xaa   : > { %v2311_v12 = vor.u32 %v2310_v43, %v2307_v16  ;;  %v2321_v18 = vor.u32 %v2320_v57, %v7180_v60  ;;  %v2324_v4 = vshll.u32 %v7187_v38, 16  ;;  %v2353_v19 = vshrl.u32 %v5250_v51, 16  ;;  %v7243_v57 = vld [vmem:[%s6335_s9 + $0xa0] sm:$0xf] }
  0xab   : > { %5873 = vmatmul.mubr.msk.bf16.vlgmr.msra.gmra.mxu0 %vm715_vm3, %v7044_v22  ;;  %v2335_v55 = vor.u32 %v2334_v11, %v2331_v54  ;;  %v2344_v39 = vrot.slane %v2342_v3, 4  ;;  %v2356_v9 = vshll.u32 %v5250_v51, 16  ;;  %v5253_v22 = vld [vmem:[%s6335_s9 + $0x9c] sm:$0xf]  ;;  %v7222_v23 = vrot.slane %v2287_v24, 4  ;;  %9096 = vst [vmem:[#allocation13_spill] sm:$0xff] %v7243_v57 }
  0xac   : > { %5939 = vmatpush3.bf16.msra.mxu0 %v7038_v32  ;;  %5876 = vmatprep.mubr.msk.bf16.mxu0 %vm715_vm3, %v7078_v62  ;;  %v7224_v6 = vrot.slane %v2300_v42, 5  ;;  %v2348_v15 = vshll.u32 %v7190_v26, 16  ;;  %v2362_v59 = vshll.u32 %v7201_v45, 16  ;;  %v7231_v32 = vld [vmem:[%s9005_s1 + $0xe] sm:$0x3]  ;;  %v7236_v62 = vcombine.low %v2269_v56, %v2279_v52 }
  0xad   : > { %9095 = vst [vmem:[#allocation14_spill] sm:$0xff] %v7231_v32  ;;  %6051 = vmatprep.subr.msk.bf16.mxu0 %vm764_vm0, %v7209_v33  ;;  %v7238_v17 = vrot.slane %v2297_v48, 4  ;;  %v2345_v16 = vor.u32 %v2344_v39, %v7203_v63  ;;  %v2366_v43 = vshrl.u32 %v7201_v45, 16  ;;  %v7247_v25 = vrot.slane %v2311_v12, 4  ;;  %v7256_v56 = vld [vmem:[%s6335_s9 + $0x98] sm:$0x1] }
  0xae   : > { %5839 = vmatmul.mubr.msk.bf16.vlgmr.msra.gmra.mxu1 %vm715_vm3, %v6127_v10  ;;  %v7249_v53 = vrot.slane %v2321_v18, 4  ;;  %v7251_v13 = vrot.slane %v2324_v4, 5  ;;  %v7253_v10 = vrot.slane %v2335_v55, 4  ;;  %9097 = vst [vmem:[#allocation15_spill] sm:$0xff] %v7256_v56  ;;  %v2355_v24 = vrot.slane %v2353_v19, 4  ;;  %v6130_v19 = vld [vmem:[%s6335_s9 + $0x3c] sm:$0xff]  }
  0xaf   : > { %5905 = vmatpush3.bf16.msra.mxu1 %v7029_v14  ;;  %5842 = vmatprep.mubr.msk.bf16.mxu1 %vm715_vm3, %v6128_v46  ;;  %v2358_v48 = vrot.slane %v2356_v9, 5  ;;  %v2377_v42 = vshrl.u32 %v5253_v22, 16  ;;  %v2380_v51 = vshll.u32 %v5253_v22, 16  ;;  %v6129_v14 = vld [vmem:[%s6335_s9 + $0x30] sm:$0xff]   ;;  %v7265_v11 = vrot.slane %v2348_v15, 5 }
  0xb0   : > { %6050 = vmatprep.subr.msk.bf16.mxu1 %vm764_vm0, %v7231_v32  ;;  %v7267_v3 = vrot.slane %v2362_v59, 5  ;;  %v2386_v46 = vshll.u32 %v7243_v57, 16  ;;  %v5256_v52 = vld [vmem:[%s6335_s9 + $0xa8] sm:$0xf]  ;;  %v7271_v12 = vrot.slane %v2345_v16, 4  ;;  %v2368_v18 = vrot.slane %v2366_v43, 4 }
  0xb1   : > { %v2372_v4 = vshll.u32 %v7256_v56, 16  ;;  %v2390_v55 = vshrl.u32 %v7243_v57, 16  ;;  %v7276_v39 = vld [vmem:[%s6335_s9 + $0xac] sm:$0xf]  ;;  %v2359_v59 = vor.u32 %v2358_v48, %v2355_v24  ;;  %v7300_v16 = vld [vmem:[%s6335_s9 + $0xa4] sm:$0x1] }
  0xb2   : > { %9098 = vst [vmem:[#allocation16_spill] sm:$0xff] %v7276_v39  ;;  %9099 = vst [vmem:[#allocation5_spill] sm:$0xff] %v7300_v16  ;;  %v2379_v43 = vrot.slane %v2377_v42, 4  ;;  %v2382_v22 = vrot.slane %v2380_v51, 5  ;;  %v2401_v54 = vshrl.u32 %v5256_v52, 16  ;;  %v7302_v9 = vrot.slane %v2386_v46, 5 }
  0xb3   : > { %5877 = vmatmul.mubr.msk.bf16.gmra.mxu0 %vm715_vm3, %v7124_v7  ;;  %v2392_v32 = vrot.slane %v2390_v55, 4  ;;  %v2404_v15 = vshll.u32 %v5256_v52, 16  ;;  %v2410_v33 = vshll.u32 %v7276_v39, 16  ;;  %v5259_v57 = vld [vmem:[%s6335_s9 + $0xb4] sm:$0xf]  ;;  %v2369_v24 = vor.u32 %v2368_v18, %v7267_v3 }
  0xb4   : > { %5880 = vmatprep.mubr.msk.bf16.mxu0 %vm715_vm3, %v7174_v20  ;;  %v2351_v20 = vsel %vm6379_vm4, %v7271_v12, %v7265_v11  ;;  %v7312_v48 = vrot.slane %v2372_v4, 5  ;;  %v7315_v42 = vld [vmem:[%s6335_s9 + $0xb0] sm:$0x1]  ;;  %v2403_v51 = vrot.slane %v2401_v54, 4  ;;  %v7318_v46 = vld [vmem:[%s6335_s9 + $0xb8] sm:$0xf]  ;;  %v2383_v18 = vor.u32 %v2382_v22, %v2379_v43 }
  0xb5   : > { %9100 = vst [vmem:[#allocation17_spill] sm:$0xff] %v7315_v42  ;;  %9101 = vst [vmem:[#allocation18_spill] sm:$0xff] %v7318_v46  ;;  %v2406_v52 = vrot.slane %v2404_v15, 5  ;;  %v7322_v55 = vrot.slane %v2410_v33, 5  ;;  %v2414_v11 = vshrl.u32 %v7276_v39, 16  ;;  %v7325_v12 = vrot.slane %v2359_v59, 4 }
  0xb6   : > { %5843 = vmatmul.mubr.msk.bf16.gmra.mxu1 %vm715_vm3, %v6129_v14  ;;  %v2396_v14 = vshll.u32 %v7300_v16, 16  ;;  %v7328_v4 = vld [vmem:[%s6335_s9 + $0xbc] sm:$0x1]  ;;  %v2425_v54 = vshrl.u32 %v5259_v57, 16  ;;  %v2428_v7 = vshll.u32 %v5259_v57, 16  ;;  %v2393_v56 = vor.u32 %v2392_v32, %v7302_v9  ;;  %v6131_v16 = vld [vmem:[%s6335_s9 + $0x48] sm:$0xff]  }
  0xb7   : > { %5846 = vmatprep.mubr.msk.bf16.mxu1 %vm715_vm3, %v6130_v19  ;;  %v2416_v45 = vrot.slane %v2414_v11, 4  ;;  %v2420_v19 = vshll.u32 %v7315_v42, 16  ;;  %v2434_v15 = vshll.u32 %v7318_v46, 16  ;;  %v5262_v33 = vld [vmem:[%s6335_s9 + $0xc0] sm:$0xf]  ;;  %v2407_v26 = vor.u32 %v2406_v52, %v2403_v51  ;;  %v6132_v57 = vld [vmem:[%s6335_s9 + $0x54] sm:$0xff]  }
  0xb8   : > { %v2427_v39 = vrot.slane %v2425_v54, 4  ;;  %v2430_v34 = vrot.slane %v2428_v7, 5  ;;  %v2438_v59 = vshrl.u32 %v7318_v46, 16  ;;  %v7337_v22 = vld [vmem:[%s6335_s9 + $0xc4] sm:$0xf]  ;;  %v2370_v43 = vrot.slane %v2369_v24, 4 }
  0xb9   : > { %v2398_v32 = vrot.slane %v2396_v14, 5  ;;  %v2417_v11 = vor.u32 %v2416_v45, %v7322_v55  ;;  %v2436_v42 = vrot.slane %v2434_v15, 5  ;;  %v2444_v7 = vshll.u32 %v7328_v4, 16  ;;  %v7349_v45 = vld [vmem:[%s6335_s9 + $0xc8] sm:$0x1] }
  0xba   : > { %v2431_v51 = vor.u32 %v2430_v34, %v2427_v39  ;;  %v2440_v52 = vrot.slane %v2438_v59, 4  ;;  %v2449_v54 = vshrl.u32 %v5262_v33, 16  ;;  %v2384_v46 = vrot.slane %v2383_v18, 4 }
  0xbb   : > { %5881 = vmatmul.mubr.msk.bf16.gmra.mxu0 %vm715_vm3, %v7182_v37  ;;  %v2394_v38 = vrot.slane %v2393_v56, 4  ;;  %v2452_v2 = vshll.u32 %v5262_v33, 16  ;;  %v2458_v37 = vshll.u32 %v7337_v22, 16  ;;  %v2408_v24 = vrot.slane %v2407_v26, 4 }
  0xbc   : > { %5884 = vmatprep.mubr.msk.bf16.mxu0 %vm715_vm3, %v7184_v29  ;;  %v2422_v14 = vrot.slane %v2420_v19, 5  ;;  %v2441_v36 = vor.u32 %v2440_v52, %v2436_v42  ;;  %v2451_v15 = vrot.slane %v2449_v54, 4  ;;  %v2418_v34 = vrot.slane %v2417_v11, 4 }
  0xbd   : > { %v2454_v29 = vrot.slane %v2452_v2, 5  ;;  %v7352_v39 = vrot.slane %v2458_v37, 5  ;;  %v2462_v56 = vshrl.u32 %v7337_v22, 16  ;;  %v9102_v26 = vsel %vm6379_vm4, %v7238_v17, %v7224_v6 }
  0xbe   : > { %5847 = vmatmul.mubr.msk.bf16.gmra.mxu1 %vm715_vm3, %v6131_v16  ;;  %v9103_v16 = vsel %vm6379_vm4, %v7222_v23, %v7164_v58  ;;  %v2432_v19 = vrot.slane %v2431_v51, 4  ;;  %v2442_v33 = vrot.slane %v2441_v36, 4  ;;  %v2446_v2 = vrot.slane %v2444_v7, 5  ;;  %v6133_v23 = vld [vmem:[%s6335_s9 + $0x60] sm:$0xff]  }
  0xbf   : > { %5850 = vmatprep.mubr.msk.bf16.mxu1 %vm715_vm3, %v6132_v57  ;;  %v5274_v18 = vcombine.low %v9103_v16, %v9102_v26  ;;  %v9104_v59 = vsel %vm6379_vm4, %v7249_v53, %v7251_v13  ;;  %v9105_v6 = vsel %vm6379_vm4, %v7247_v25, %v7180_v60  ;;  %v2455_v57 = vor.u32 %v2454_v29, %v2451_v15  ;;  %v5300_v13 = vld [vmem:[%s6335_s9 + $0x24] sm:$0xe]  ;;  %v5303_v26 = vld [vmem:[%s6335_s9 + $0x48] sm:$0xe] }
  0xc0   : > { %v5275_v17 = vcombine.low %v9105_v6, %v9104_v59  ;;  %v2464_v11 = vrot.slane %v2462_v56, 4  ;;  %v2468_v58 = vshll.u32 %v7349_v45, 16  ;;  %v9106_v36 = vsel %vm6379_vm4, %v7253_v10, %v7203_v63  ;;  %v6134_v63 = vld [vmem:[%s6335_s9 + $0x6c] sm:$0xff]   ;;  %v5304_v6 = vld [vmem:[%s6335_s9 + $0x54] sm:$0xe] }
  0xc1   : > { %v5276_v51 = vcombine.low %v9106_v36, %v2351_v20  ;;  %v2365_v53 = vsel %vm6379_vm4, %v7325_v12, %v7267_v3  ;;  %v2375_v60 = vsel %vm6379_vm4, %v2370_v43, %v7312_v48  ;;  %v2389_v25 = vsel %vm6379_vm4, %v2384_v46, %v7302_v9  ;;  %v7405_v12 = vld [vmem:[%s6335_s9 + $0xc] sm:$0xe] }
  0xc2   : > { %v2399_v10 = vsel %vm6379_vm4, %v2394_v38, %v2398_v32  ;;  %v2413_v3 = vsel %vm6379_vm4, %v2408_v24, %v7322_v55  ;;  %v2423_v20 = vsel %vm6379_vm4, %v2418_v34, %v2422_v14  ;;  %v2465_v48 = vor.u32 %v2464_v11, %v7352_v39  ;;  %v5301_v55 = vld [vmem:[%s6335_s9 + $0x30] sm:$0xe]  ;;  %v5302_v14 = vld [vmem:[%s6335_s9 + $0x3c] sm:$0xe] }
  0xc3   : > { %5885 = vmatmul.mubr.msk.bf16.gmra.mxu0 %vm715_vm3, %v7236_v62  ;;  %v2437_v62 = vsel %vm6379_vm4, %v2432_v19, %v2436_v42  ;;  %v2447_v38 = vsel %vm6379_vm4, %v2442_v33, %v2446_v2  ;;  %v7412_v9 = vrot.slane %v2455_v57, 4  ;;  %v2832_v46 = vrot.slane %v6896_v49, 5  ;;  %v6135_v57 = vld [vmem:[%s6335_s9 + $0x78] sm:$0xff]  }
  0xc4   : > { %5888 = vmatprep.mubr.msk.bf16.mxu0 %vm715_vm3, %v5274_v18  ;;  %v7416_v43 = vcombine.low %v2365_v53, %v2375_v60  ;;  %v7418_v32 = vrot.slane %v2465_v48, 4  ;;  %v7420_v52 = vrot.slane %v2468_v58, 5  ;;  %v5316_v7 = vrot.slane %v5300_v13, 9  ;;  %v6136_v53 = vld [vmem:[%s6335_s9 + $0x84] sm:$0xff]   ;;  %v5305_v13 = vld [vmem:[%s6335_s9 + $0x60] sm:$0xe] }
  0xc5   : > { %v7423_v54 = vcombine.low %v2389_v25, %v2399_v10  ;;  %v7425_v42 = vcombine.low %v2413_v3, %v2423_v20  ;;  %v5314_v37 = vrot.slane %v7405_v12, 9  ;;  %v2846_v24 = vrot.slane %v6945_v44, 5  ;;  %v6142_v49 = vld [vmem:[%s6335_s9 + $0x18] sm:$0xff]  }
  0xc6   : > { %5851 = vmatmul.mubr.msk.bf16.gmra.mxu1 %vm715_vm3, %v6133_v23  ;;  %v7431_v15 = vcombine.low %v2437_v62, %v2447_v38  ;;  %v2835_v34 = vrot.slane %v6932_v47, 5  ;;  %v2849_v29 = vrot.slane %v6960_v21, 5  ;;  %v5317_v56 = vrot.slane %v5301_v55, 9  ;;  %v5307_v55 = vld [vmem:[%s6335_s9 + $0x78] sm:$0xe] }
  0xc7   : > { %5854 = vmatprep.mubr.msk.bf16.mxu1 %vm715_vm3, %v6134_v63  ;;  %v2461_v16 = vsel %vm6379_vm4, %v7412_v9, %v7352_v39  ;;  %v7442_v44 = vrot.slane %v2832_v46, 4  ;;  %v7446_v18 = vsel %vm6665_vm7, %v5316_v7, %v2846_v24  ;;  %v2848_v19 = vrot.slane %v2846_v24, 4 }
  0xc8   : > { %v2471_v21 = vsel %vm6379_vm4, %v7418_v32, %v7420_v52  ;;  %v2853_v33 = vrot.slane %v6983_v5, 5  ;;  %v2856_v2 = vrot.slane %v6991_v41, 5  ;;  %v5318_v59 = vrot.slane %v5302_v14, 9  ;;  %v6141_v52 = vld [vmem:[%s6335_s9 + $0xc0] sm:$0xff]  }
  0xc9   : > { %v7458_v11 = vsel %vm6665_vm7, %v2848_v19, %v2849_v29  ;;  %v2860_v58 = vrot.slane %v7000_v61, 5  ;;  %v2863_v23 = vrot.slane %v7052_v50, 5  ;;  %v5319_v36 = vrot.slane %v5303_v26, 9  ;;  %v5308_v19 = vld [vmem:[%s6335_s9 + $0x84] sm:$0xe] }
  0xca   : > { %v5333_v5 = vcombine.low %v7446_v18, %v7458_v11  ;;  %v7468_v41 = vsel %vm6665_vm7, %v5317_v56, %v2853_v33  ;;  %v2855_v60 = vrot.slane %v2853_v33, 4  ;;  %v2867_v25 = vrot.slane %v7018_v1, 5 }
  0xcb   : > { %5889 = vmatmul.mubr.msk.bf16.gmra.mxu0 %vm715_vm3, %v5275_v17  ;;  %v7475_v61 = vsel %vm6665_vm7, %v5318_v59, %v2860_v58  ;;  %v2862_v50 = vrot.slane %v2860_v58, 4  ;;  %v2870_v17 = vrot.slane %v7066_v8, 5  ;;  %v5320_v63 = vrot.slane %v5304_v6, 9  ;;  %v9107_v59 = vld [vmem:[#allocation7_spill] sm:$0xff] }
  0xcc   : > { %5892 = vmatprep.mubr.msk.bf16.mxu0 %vm715_vm3, %v5276_v51  ;;  %v7480_v10 = vsel %vm6665_vm7, %v2855_v60, %v2856_v2  ;;  %v7484_v3 = vsel %vm6665_vm7, %v5319_v36, %v2867_v25  ;;  %v2869_v1 = vrot.slane %v2867_v25, 4  ;;  %v2874_v20 = vrot.slane %v7061_v40, 5  ;;  %v5306_v51 = vld [vmem:[%s6335_s9 + $0x6c] sm:$0xe]  ;;  %v6137_v58 = vld [vmem:[%s6335_s9 + $0x90] sm:$0xff]  }
  0xcd   : > { %v5334_v48 = vcombine.low %v7468_v41, %v7480_v10  ;;  %v7493_v8 = vsel %vm6665_vm7, %v2862_v50, %v2863_v23  ;;  %v2877_v62 = vrot.slane %v7083_v35, 5  ;;  %v5321_v38 = vrot.slane %v5305_v13, 9  ;;  %v9108_v36 = vld [vmem:[#allocation6_spill] sm:$0xff]  ;;  %v5309_v60 = vld [vmem:[%s6335_s9 + $0x90] sm:$0xe]  ;;  %v9109_v50 = vld [vmem:[#allocation9_spill] sm:$0xff] }
  0xce   : > { %5855 = vmatmul.mubr.msk.bf16.gmra.mxu1 %vm715_vm3, %v6135_v57  ;;  %v5335_v40 = vcombine.low %v7475_v61, %v7493_v8  ;;  %v7502_v7 = vsel %vm6665_vm7, %v2869_v1, %v2870_v17  ;;  %v7506_v24 = vsel %vm6665_vm7, %v5320_v63, %v2874_v20  ;;  %v2876_v14 = vrot.slane %v2874_v20, 4 }
  0xcf   : > { %5858 = vmatprep.mubr.msk.bf16.mxu1 %vm715_vm3, %v6136_v53  ;;  %v5336_v35 = vcombine.low %v7484_v3, %v7502_v7  ;;  %v2881_v29 = vrot.slane %v7096_v28, 5  ;;  %v2884_v56 = vrot.slane %v7118_v30, 5  ;;  %v5322_v26 = vrot.slane %v5306_v51, 9  ;;  %v9110_v51 = vld [vmem:[#allocation8_spill] sm:$0xff]  ;;  %v5440_v3 = vld [vmem:[%s6335_s9 + $0x48] sm:$0xf] }
  0xd0   : > { %v7515_v33 = vsel %vm6665_vm7, %v2876_v14, %v2877_v62  ;;  %v2888_v2 = vrot.slane %v7115_v27, 5  ;;  %v2891_v6 = vrot.slane %v9107_v59, 5  ;;  %v5323_v57 = vrot.slane %v5307_v55, 9  ;;  %v6138_v27 = vld [vmem:[%s6335_s9 + $0x9c] sm:$0xff]   ;;  %v9118_v55 = vld [vmem:[#allocation18_spill] sm:$0xff] }
  0xd1   : > { %v5337_v23 = vcombine.low %v7506_v24, %v7515_v33  ;;  %v7524_v28 = vsel %vm6665_vm7, %v5321_v38, %v2881_v29  ;;  %v2883_v30 = vrot.slane %v2881_v29, 4  ;;  %v2895_v53 = vrot.slane %v9108_v36, 5  ;;  %v5310_v38 = vld [vmem:[%s6335_s9 + $0x9c] sm:$0xe]  ;;  %v9113_v36 = vld [vmem:[#allocation15_spill] sm:$0xff] }
  0xd2   : > { %v7533_v25 = vsel %vm6665_vm7, %v5322_v26, %v2888_v2  ;;  %v2890_v13 = vrot.slane %v2888_v2, 4  ;;  %v2898_v17 = vrot.slane %v9109_v50, 5  ;;  %v5324_v63 = vrot.slane %v5308_v19, 9  ;;  %v5311_v26 = vld [vmem:[%s6335_s9 + $0xa8] sm:$0xe] }
  0xd3   : > { %5893 = vmatmul.mubr.msk.bf16.gmra.mxu0 %vm715_vm3, %v7416_v43  ;;  %v7540_v1 = vsel %vm6665_vm7, %v2883_v30, %v2884_v56  ;;  %v7544_v43 = vsel %vm6665_vm7, %v5323_v57, %v2895_v53  ;;  %v2897_v20 = vrot.slane %v2895_v53, 4  ;;  %v2902_v62 = vrot.slane %v9110_v51, 5  ;;  %v5313_v57 = vld [vmem:[%s6335_s9 + $0xc0] sm:$0xe]  ;;  %v6139_v19 = vld [vmem:[%s6335_s9 + $0xa8] sm:$0xff]  }
  0xd4   : > { %5896 = vmatprep.mubr.msk.bf16.mxu0 %vm715_vm3, %v7423_v54  ;;  %v7552_v14 = vsel %vm6665_vm7, %v2890_v13, %v2891_v6  ;;  %v9111_v54 = vld [vmem:[#allocation11_spill] sm:$0xff]  ;;  %v5325_v56 = vrot.slane %v5309_v60, 9  ;;  %v2912_v53 = vrot.slane %v9113_v36, 5  ;;  %v5326_v60 = vrot.slane %v5310_v38, 9  ;;  %v9116_v38 = vld [vmem:[#allocation16_spill] sm:$0xff] }
  0xd5   : > { %v2905_v29 = vrot.slane %v9111_v54, 5  ;;  %v7561_v2 = vsel %vm6665_vm7, %v2897_v20, %v2898_v17  ;;  %v7565_v59 = vsel %vm6665_vm7, %v5324_v63, %v2902_v62  ;;  %v2904_v6 = vrot.slane %v2902_v62, 4  ;;  %v5312_v13 = vld [vmem:[%s6335_s9 + $0xb4] sm:$0xe]  ;;  %v9114_v17 = vld [vmem:[#allocation13_spill] sm:$0xff] }
  0xd6   : > { %5859 = vmatmul.mubr.msk.bf16.gmra.mxu1 %vm715_vm3, %v6137_v58  ;;  %v9112_v58 = vld [vmem:[#allocation10_spill] sm:$0xff]  ;;  %v2916_v63 = vrot.slane %v9114_v17, 5  ;;  %v9115_v20 = vld [vmem:[#allocation5_spill] sm:$0xff]  ;;  %v5327_v62 = vrot.slane %v5311_v26, 9  ;;  %v2923_v36 = vrot.slane %v9116_v38, 5  ;;  %v5328_v26 = vrot.slane %v5312_v13, 9 }
  0xd7   : > { %5862 = vmatprep.mubr.msk.bf16.mxu1 %vm715_vm3, %v6138_v27  ;;  %v2909_v30 = vrot.slane %v9112_v58, 5  ;;  %v7575_v50 = vsel %vm6665_vm7, %v2904_v6, %v2905_v29  ;;  %v2919_v51 = vrot.slane %v9115_v20, 5  ;;  %v9117_v17 = vld [vmem:[#allocation17_spill] sm:$0xff]  ;;  %v6140_v27 = vld [vmem:[%s6335_s9 + $0xb4] sm:$0xff]   ;;  %v2836_v39 = vsel %vm6665_vm7, %v7442_v44, %v2835_v34  ;;  %v7792_v7 = vld [vmem:[%s6335_s9 + $0x4c] sm:$0xf] }
  0xd8   : > { %v7590_v29 = vsel %vm6665_vm7, %v5326_v60, %v2916_v63  ;;  %v2918_v6 = vrot.slane %v2916_v63, 4  ;;  %v2926_v20 = vrot.slane %v9117_v17, 5  ;;  %v2925_v38 = vrot.slane %v2923_v36, 4  ;;  %v6159_v44 = vld [vmem:[%s6335_s9 + $0x20] sm:$0x1] }
  0xd9   : > { %v7583_v54 = vsel %vm6665_vm7, %v5325_v56, %v2909_v30  ;;  %v2911_v58 = vrot.slane %v2909_v30, 4  ;;  %v7602_v30 = vsel %vm6665_vm7, %v5327_v62, %v2923_v36  ;;  %v2930_v60 = vrot.slane %v9118_v55, 5 }
  0xda   : > { %v5329_v63 = vrot.slane %v5313_v57, 9  ;;  %v7618_v55 = vsel %vm6665_vm7, %v2925_v38, %v2926_v20  ;;  %v2937_v57 = vrot.slane %v7337_v22, 5  ;;  %v2833_v22 = vsel %vm6665_vm7, %v5314_v37, %v2832_v46  ;;  %v6144_v38 = vld [vmem:[%s6335_s9 + $0x30] sm:$0xff]  }
  0xdb   : > { %5897 = vmatmul.mubr.msk.bf16.gmra.mxu0 %vm715_vm3, %v7425_v42  ;;  %v7598_v56 = vsel %vm6665_vm7, %v2911_v58, %v2912_v53  ;;  %v7611_v42 = vsel %vm6665_vm7, %v2918_v6, %v2919_v51  ;;  %v2933_v53 = vrot.slane %v7328_v4, 5  ;;  %v2932_v58 = vrot.slane %v2930_v60, 4 }
  0xdc   : > { %5900 = vmatprep.mubr.msk.bf16.mxu0 %vm715_vm3, %v7431_v15  ;;  %v7622_v15 = vsel %vm6665_vm7, %v5328_v26, %v2930_v60  ;;  %v2940_v51 = vrot.slane %v7349_v45, 5  ;;  %v5299_v45 = vld [vmem:[%s6335_s9 + $0x18] sm:$0xe]  ;;  %v7662_v9 = vsel %vm6665_vm7, %v5329_v63, %v2937_v57  ;;  %v2939_v46 = vrot.slane %v2937_v57, 4  ;;  %v6143_v26 = vld [vmem:[%s6335_s9 + $0x24] sm:$0xff]  }
  0xdd   : > { %v7650_v32 = vsel %vm6665_vm7, %v2932_v58, %v2933_v53  ;;  %v5315_v37 = vrot.slane %v5299_v45, 9  ;;  %v5331_v34 = vcombine.low %v2833_v22, %v2836_v39  ;;  %v9119_v60 = vld [vmem:[#allocation12_spill] sm:$0xff] }
  0xde   : > { %5863 = vmatmul.mubr.msk.bf16.gmra.mxu1 %vm715_vm3, %v6139_v19  ;;  %v5281_v19 = vcombine.low %v2461_v16, %v2471_v21  ;;  %v7667_v47 = vsel %vm6665_vm7, %v2939_v46, %v2940_v51  ;;  %v2842_v21 = vrot.slane %v6159_v44, 5  ;;  %v4599_v53 = vsel %vm764_vm0, %v9119_v60, 0  ;;  %v5428_v63 = vld [vmem:[%s6335_s9 + $0x18] sm:$0xf]  ;;  %v5429_v57 = vld [vmem:[%s6335_s9 + $0x1c] sm:$0xf] }
  0xdf   : > { %5866 = vmatprep.mubr.msk.bf16.mxu1 %vm715_vm3, %v6140_v27  ;;  %v6158_v27 = vld [vmem:[%s6335_s9 + $0x1c] sm:$0xf]  ;;  %v5431_v51 = vld [vmem:[%s6335_s9 + $0x24] sm:$0xf]  ;;  %v3647_v45 = vshrl.u32 %v5428_v63, 16  ;;  %v3656_v39 = vshll.u32 %v5429_v57, 16 }
  0xe0   : > { %v2839_v36 = vrot.slane %v6158_v27, 5  ;;  %v3650_v27 = vshll.u32 %v5428_v63, 16  ;;  %v3671_v46 = vshrl.u32 %v5431_v51, 16  ;;  %v6146_v44 = vld [vmem:[%s6335_s9 + $0x48] sm:$0xff]   ;;  %v5509_v60 = vld [vmem:[%s6335_s9 + $0x18] sm:$0xe] }
  0xe1   : > { %v7708_v63 = vld [vmem:[%s6335_s9 + $0x2c] sm:$0x1] }
  0xe2   : > { %v2841_v16 = vrot.slane %v2839_v36, 4  ;;  %v2840_v17 = vsel %vm6665_vm7, %v5315_v37, %v2839_v36  ;;  %v7692_v36 = vld [vmem:[%s6335_s9 + $0x28] sm:$0xf]  ;;  %v6145_v37 = vld [vmem:[%s6335_s9 + $0x3c] sm:$0xff]   ;;  %v3673_v18 = vrot.slane %v3671_v46, 4 }
  0xe3   : > { %5901 = vmatmul.mubr.msk.bf16.gmra.mxu0 %vm715_vm3, %v5281_v19  ;;  %v9120_v19 = vld [vmem:[#allocation14_spill] sm:$0xff] }
  0xe4   : > { %5940 = vmatprep.mubr.msk.bf16.mxu0 %vm715_vm3, %v6142_v49  ;;  %v2843_v20 = vsel %vm6665_vm7, %v2841_v16, %v2842_v21  ;;  %v4129_v22 = vsel %vm764_vm0, %v9120_v19, 0  ;;  %v3660_v49 = vshrl.u32 %v5429_v57, 16  ;;  %v3684_v16 = vshrl.u32 %v7692_v36, 16  ;;  %v5430_v21 = vld [vmem:[%s6335_s9 + $0x20] sm:$0x1] }
  0xe5   : > { %v5332_v58 = vcombine.low %v2840_v17, %v2843_v20  ;;  %v3649_v17 = vrot.slane %v3647_v45, 4  ;;  %v3652_v20 = vrot.slane %v3650_v27, 5  ;;  %v5434_v19 = vld [vmem:[%s6335_s9 + $0x30] sm:$0xf]  ;;  %v3666_v45 = vshll.u32 %v5430_v21, 16 }
  0xe6   : > { %5867 = vmatmul.mubr.msk.bf16.gmra.mxu1 %vm715_vm3, %v6141_v52  ;;  %v3674_v52 = vshll.u32 %v5431_v51, 16  ;;  %v3686_v51 = vrot.slane %v3684_v16, 4  ;;  %v5525_v27 = vrot.slane %v5509_v60, 9  ;;  %v4393_v46 = vrot.slane %v5430_v21, 5  ;;  %v5510_v16 = vld [vmem:[%s6335_s9 + $0x24] sm:$0xe] }
  0xe7   : > { %5906 = vmatprep.mubr.msk.bf16.mxu1 %vm715_vm3, %v5331_v34  ;;  %v3680_v34 = vshll.u32 %v7692_v36, 16  ;;  %v6147_v21 = vld [vmem:[%s6335_s9 + $0x54] sm:$0xff]   ;;  %v3698_v10 = vshll.u32 %v5434_v19, 16  ;;  %v6148_v60 = vld [vmem:[%s6335_s9 + $0x60] sm:$0xff]  }
  0xe8   : > { %v3676_v11 = vrot.slane %v3674_v52, 5  ;;  %v3690_v52 = vshll.u32 %v7708_v63, 16 }
  0xeb   : > { %5941 = vmatmul.mubr.msk.bf16.vlgmr.msra.gmra.mxu0 %vm715_vm3, %v6143_v26  ;;  %v7704_v26 = vrot.slane %v3656_v39, 5 }
  0xec   : > { %6007 = vmatpush3.bf16.msra.mxu0 %v4599_v53  ;;  %5944 = vmatprep.mubr.msk.bf16.mxu0 %vm715_vm3, %v6144_v38  ;;  %v3662_v38 = vrot.slane %v3660_v49, 4  ;;  %v4390_v53 = vrot.slane %v5429_v57, 5  ;;  %v7718_v57 = vld [vmem:[%s6335_s9 + $0x34] sm:$0xf] }
  0xee   : > { %5907 = vmatmul.mubr.msk.bf16.vlgmr.msra.gmra.mxu1 %vm715_vm3, %v5332_v58  ;;  %v7713_v58 = vrot.slane %v3680_v34, 5  ;;  %v3663_v39 = vor.u32 %v3662_v38, %v7704_v26  ;;  %v4392_v49 = vrot.slane %v4390_v53, 4  ;;  %v3677_v34 = vor.u32 %v3676_v11, %v3673_v18 }
  0xef   : > { %5973 = vmatpush3.bf16.msra.mxu1 %v4129_v22  ;;  %5910 = vmatprep.mubr.msk.bf16.mxu1 %vm715_vm3, %v5333_v5  ;;  %v7711_v5 = vpop.f32.mrf.mxu0  ;;  %v3653_v22 = vor.u32 %v3652_v20, %v3649_v17  ;;  %v3695_v17 = vshrl.u32 %v5434_v19, 16  ;;  %v3708_v38 = vshrl.u32 %v7718_v57, 16  ;;  %v7743_v61 = vsel %vm6665_vm7, %v5525_v27, %v4390_v53  ;;  %v5437_v19 = vld [vmem:[%s6335_s9 + $0x3c] sm:$0xf] }
  0xf0   : > { %v3687_v41 = vor.u32 %v3686_v51, %v7713_v58  ;;  %v3664_v8 = vrot.slane %v3663_v39, 4  ;;  %v3692_v11 = vrot.slane %v3690_v52, 5  ;;  %v5526_v51 = vrot.slane %v5510_v16, 9  ;;  %v7757_v39 = vld [vmem:[%s6335_s9 + $0x38] sm:$0x1] }
  0xf1   : > { %v7735_v20 = vpop.f32.mrf.mxu0  ;;  %v3654_v18 = vrot.slane %v3653_v22, 4  ;;  %v3678_v12 = vrot.slane %v3677_v34, 4  ;;  %v4400_v22 = vrot.slane %v7708_v63, 5  ;;  %v3710_v52 = vrot.slane %v3708_v38, 4 }
  0xf2   : > { %v3688_v27 = vrot.slane %v3687_v41, 4  ;;  %v3719_v34 = vshrl.u32 %v5437_v19, 16  ;;  %v3722_v16 = vshll.u32 %v5437_v19, 16  ;;  %v7770_v41 = vld [vmem:[%s6335_s9 + $0x40] sm:$0xf] }
  0xf3   : > { %5945 = vmatmul.mubr.msk.bf16.gmra.mxu0 %vm715_vm3, %v6145_v37  ;;  %v7754_v53 = vpop.f32.mrf.mxu0  ;;  %v3659_v63 = vsel %vm6379_vm4, %v3654_v18, %v7704_v26  ;;  %v3683_v26 = vsel %vm6379_vm4, %v3678_v12, %v7713_v58  ;;  %v5511_v18 = vld [vmem:[%s6335_s9 + $0x30] sm:$0xe]  ;;  %v3728_v24 = vshll.u32 %v7770_v41, 16  ;;  %v3732_v33 = vshrl.u32 %v7770_v41, 16 }
  0xf4   : > { %5948 = vmatprep.mubr.msk.bf16.mxu0 %vm715_vm3, %v6146_v44  ;;  %v7726_v37 = vpop.f32.mrf.mxu1  ;;  %v4397_v44 = vrot.slane %v7692_v36, 5  ;;  %v3668_v36 = vrot.slane %v3666_v45, 5  ;;  %v3697_v45 = vrot.slane %v3695_v17, 4  ;;  %v3693_v58 = vsel %vm6379_vm4, %v3688_v27, %v3692_v11 }
  0xf5   : > { %9121 = vst [vmem:[#allocation7_spill] sm:$0xff] %v7726_v37  ;;  %v7799_v12 = vpop.f32.mrf.mxu0  ;;  %v3724_v19 = vrot.slane %v3722_v16, 5  ;;  %v3756_v11 = vshrl.u32 %v7792_v7, 16 }
  0xf6   : > { %5911 = vmatmul.mubr.msk.bf16.gmra.mxu1 %vm715_vm3, %v5334_v48  ;;  %v3704_v48 = vshll.u32 %v7718_v57, 16  ;;  %v7750_v6 = vpop.f32.mrf.mxu1  ;;  %v4399_v4 = vrot.slane %v4397_v44, 4  ;;  %v3669_v17 = vsel %vm6379_vm4, %v3664_v8, %v3668_v36  ;;  %v4404_v36 = vrot.slane %v7718_v57, 5  ;;  %v6150_v8 = vld [vmem:[%s6335_s9 + $0x78] sm:$0xff]  }
  0xf7   : > { %5914 = vmatprep.mubr.msk.bf16.mxu1 %vm715_vm3, %v5335_v40  ;;  %v7747_v40 = vsel %vm6665_vm7, %v4392_v49, %v4393_v46  ;;  %9122 = vst [vmem:[#allocation6_spill] sm:$0xff] %v7750_v6  ;;  %v3700_v49 = vrot.slane %v3698_v10, 5  ;;  %v7813_v27 = vcombine.low %v3659_v63, %v3669_v17  ;;  %v7815_v57 = vcombine.low %v3683_v26, %v3693_v58  ;;  %v7829_v17 = vld [vmem:[%s6335_s9 + $0x58] sm:$0xf]  ;;  %v7835_v58 = vld [vmem:[%s6335_s9 + $0x44] sm:$0x1] }
  0xf8   : > { %v7759_v46 = vrot.slane %v3704_v48, 5  ;;  %v7776_v10 = vpop.f32.mrf.mxu1  ;;  %v7783_v48 = vsel %vm6665_vm7, %v5526_v51, %v4397_v44  ;;  %v7787_v38 = vsel %vm6665_vm7, %v4399_v4, %v4400_v22  ;;  %v3721_v51 = vrot.slane %v3719_v34, 4  ;;  %v5443_v34 = vld [vmem:[%s6335_s9 + $0x54] sm:$0xf] }
  0xf9   : > { %9123 = vst [vmem:[#allocation9_spill] sm:$0xff] %v7776_v10  ;;  %v3701_v44 = vor.u32 %v3700_v49, %v3697_v45  ;;  %v3746_v22 = vshll.u32 %v5440_v3, 16  ;;  %v4406_v13 = vrot.slane %v4404_v36, 4  ;;  %v4407_v63 = vrot.slane %v7757_v39, 5  ;;  %v5512_v49 = vld [vmem:[%s6335_s9 + $0x3c] sm:$0xe] }
  0xfa   : > { %v3711_v4 = vor.u32 %v3710_v52, %v7759_v46  ;;  %v7811_v45 = vpop.f32.mrf.mxu1  ;;  %v5527_v52 = vrot.slane %v5511_v18, 9  ;;  %v3725_v18 = vor.u32 %v3724_v19, %v3721_v51  ;;  %v9126_v6 = vcombine.low %v7524_v28, %v7540_v1 }
  0xfb   : > { %5949 = vmatmul.mubr.msk.bf16.gmra.mxu0 %vm715_vm3, %v6147_v21  ;;  %v3752_v21 = vshll.u32 %v7792_v7, 16  ;;  %9124 = vst [vmem:[#allocation8_spill] sm:$0xff] %v7811_v45  ;;  %v3748_v45 = vrot.slane %v3746_v22, 5  ;;  %v3767_v51 = vshrl.u32 %v5443_v34, 16  ;;  %v3770_v19 = vshll.u32 %v5443_v34, 16 }
  0xfc   : > { %5952 = vmatprep.mubr.msk.bf16.mxu0 %vm715_vm3, %v6148_v60  ;;  %v3714_v60 = vshll.u32 %v7757_v39, 16  ;;  %v7832_v26 = vrot.slane %v3711_v4, 4  ;;  %v3758_v39 = vrot.slane %v3756_v11, 4  ;;  %v7870_v22 = vsel %vm6665_vm7, %v4406_v13, %v4407_v63 }
  0xfd   : > { %v7840_v10 = vrot.slane %v3752_v21, 5  ;;  %v9128_v21 = vcombine.low %v7533_v25, %v7552_v14  ;;  %v4411_v25 = vrot.slane %v7770_v41, 5  ;;  %v6152_v14 = vld [vmem:[%s6335_s9 + $0x90] sm:$0xff]   ;;  %v5528_v1 = vrot.slane %v5512_v49, 9  ;;  %v5446_v41 = vld [vmem:[%s6335_s9 + $0x60] sm:$0xf] }
  0xfe   : > { %5915 = vmatmul.mubr.msk.bf16.gmra.mxu1 %vm715_vm3, %v5336_v35  ;;  %v6149_v35 = vld [vmem:[%s6335_s9 + $0x6c] sm:$0xff]   ;;  %v7825_v62 = vrot.slane %v3714_v60, 5  ;;  %v3769_v37 = vrot.slane %v3767_v51, 4 }
  0xff   : > { %5918 = vmatprep.mubr.msk.bf16.mxu1 %vm715_vm3, %v5337_v23  ;;  %v3743_v23 = vshrl.u32 %v5440_v3, 16  ;;  %v7823_v3 = vrot.slane %v3701_v44, 4  ;;  %v3734_v44 = vrot.slane %v3732_v33, 4  ;;  %v3780_v33 = vshrl.u32 %v7829_v17, 16 }
 0x100   : > { %v7821_v16 = vpop.f32.mrf.mxu0  ;;  %v3759_v13 = vor.u32 %v3758_v39, %v7840_v10  ;;  %v4418_v39 = vrot.slane %v7792_v7, 5  ;;  %v9132_v7 = vcombine.low %v7544_v43, %v7561_v2  ;;  %v9134_v43 = vcombine.low %v7565_v59, %v7575_v50  ;;  %v6153_v2 = vld [vmem:[%s6335_s9 + $0x9c] sm:$0xff]  }
 0x101   : > { %9125 = vst [vmem:[#allocation11_spill] sm:$0xff] %v7821_v16  ;;  %v3745_v60 = vrot.slane %v3743_v23, 4  ;;  %v6151_v23 = vld [vmem:[%s6335_s9 + $0x84] sm:$0xff]   ;;  %v7897_v16 = vld [vmem:[%s6335_s9 + $0x5c] sm:$0x1]  ;;  %v4425_v59 = vrot.slane %v7829_v17, 5 }
 0x102   : > { %v7858_v28 = vpop.f32.mrf.mxu0 }
 0x103   : > { %5953 = vmatmul.mubr.msk.bf16.gmra.mxu0 %vm715_vm3, %v6149_v35  ;;  %v7837_v35 = vrot.slane %v3728_v24, 5  ;;  %v3776_v24 = vshll.u32 %v7829_v17, 16  ;;  %9129 = vst [vmem:[#allocation15_spill] sm:$0xff] %v7858_v28  ;;  %v3772_v28 = vrot.slane %v3770_v19, 5 }
 0x104   : > { %5956 = vmatprep.mubr.msk.bf16.mxu0 %vm715_vm3, %v6150_v8  ;;  %v7846_v4 = vpop.f32.mrf.mxu1  ;;  %v7849_v8 = vld [vmem:[%s6335_s9 + $0x50] sm:$0x1]  ;;  %v7890_v49 = vpop.f32.mrf.mxu0 }
 0x105   : > { %9127 = vst [vmem:[#allocation10_spill] sm:$0xff] %v7846_v4  ;;  %v3735_v34 = vor.u32 %v3734_v44, %v7837_v35  ;;  %v7880_v4 = vrot.slane %v3725_v18, 4  ;;  %v7887_v11 = vrot.slane %v3776_v24, 5  ;;  %v3782_v44 = vrot.slane %v3780_v33, 4  ;;  %9131 = vst [vmem:[#allocation5_spill] sm:$0xff] %v7890_v49 }
 0x106   : > { %5919 = vmatmul.mubr.msk.bf16.gmra.mxu1 %vm715_vm3, %v9126_v6  ;;  %v7866_v6 = vsel %vm6665_vm7, %v5527_v52, %v4404_v36  ;;  %v3749_v36 = vor.u32 %v3748_v45, %v3745_v60  ;;  %v3762_v52 = vshll.u32 %v7849_v8, 16  ;;  %v7885_v63 = vpop.f32.mrf.mxu1  ;;  %v4413_v18 = vrot.slane %v4411_v25, 4  ;;  %v5513_v24 = vld [vmem:[%s6335_s9 + $0x48] sm:$0xe] }
 0x107   : > { %5922 = vmatprep.mubr.msk.bf16.mxu1 %vm715_vm3, %v9128_v21  ;;  %v3738_v21 = vshll.u32 %v7835_v58, 16  ;;  %9130 = vst [vmem:[#allocation13_spill] sm:$0xff] %v7885_v63  ;;  %v4414_v60 = vrot.slane %v7835_v58, 5  ;;  %v3736_v51 = vrot.slane %v3735_v34, 4  ;;  %v3791_v33 = vshrl.u32 %v5446_v41, 16 }
 0x108   : > { %v7903_v63 = vsel %vm6665_vm7, %v5528_v1, %v4411_v25  ;;  %v3750_v45 = vrot.slane %v3749_v36, 4  ;;  %v3760_v49 = vrot.slane %v3759_v13, 4  ;;  %v3764_v58 = vrot.slane %v3762_v52, 5  ;;  %v7918_v36 = vld [vmem:[%s6335_s9 + $0x64] sm:$0xf]  ;;  %v7925_v13 = vpop.f32.mrf.mxu0 }
 0x109   : > { %v3740_v19 = vrot.slane %v3738_v21, 5  ;;  %v3731_v34 = vsel %vm6379_vm4, %v7880_v4, %v7837_v35  ;;  %v3773_v21 = vor.u32 %v3772_v28, %v3769_v37  ;;  %v3783_v1 = vor.u32 %v3782_v44, %v7887_v11  ;;  %9135 = vst [vmem:[#allocation17_spill] sm:$0xff] %v7925_v13  ;;  %v5514_v28 = vld [vmem:[%s6335_s9 + $0x54] sm:$0xe]  ;;  %v6157_v13 = vld [vmem:[%s6335_s9 + $0xcc] sm:$0xff]  }
 0x10a   : > { %v3786_v25 = vshll.u32 %v7897_v16, 16  ;;  %v7929_v52 = vsel %vm6665_vm7, %v4413_v18, %v4414_v60  ;;  %v5529_v35 = vrot.slane %v5513_v24, 9  ;;  %v4420_v37 = vrot.slane %v4418_v39, 4 }
 0x10b   : > { %5957 = vmatmul.mubr.msk.bf16.gmra.mxu0 %vm715_vm3, %v6151_v23  ;;  %v3794_v23 = vshll.u32 %v5446_v41, 16  ;;  %v4421_v4 = vrot.slane %v7849_v8, 5  ;;  %v6154_v41 = vld [vmem:[%s6335_s9 + $0xa8] sm:$0xff]   ;;  %v3741_v44 = vsel %vm6379_vm4, %v3736_v51, %v3740_v19  ;;  %v3793_v50 = vrot.slane %v3791_v33, 4 }
 0x10c   : > { %5960 = vmatprep.mubr.msk.bf16.mxu0 %vm715_vm3, %v6152_v14  ;;  %v7909_v14 = vpop.f32.mrf.mxu1  ;;  %v3765_v18 = vsel %vm6379_vm4, %v3760_v49, %v3764_v58  ;;  %v3800_v60 = vshll.u32 %v7918_v36, 16  ;;  %v3804_v8 = vshrl.u32 %v7918_v36, 16  ;;  %v3784_v51 = vrot.slane %v3783_v1, 4  ;;  %v7947_v33 = vld [vmem:[%s6335_s9 + $0x68] sm:$0x1] }
 0x10d   : > { %9133 = vst [vmem:[#allocation16_spill] sm:$0xff] %v7909_v14  ;;  %v3774_v14 = vrot.slane %v3773_v21, 4  ;;  %v3788_v17 = vrot.slane %v3786_v25, 5  ;;  %v5530_v19 = vrot.slane %v5514_v28, 9  ;;  %v9138_v49 = vsel %vm6379_vm4, %v7832_v26, %v7825_v62  ;;  %v5449_v25 = vld [vmem:[%s6335_s9 + $0x6c] sm:$0xf] }
 0x10e   : > { %5923 = vmatmul.mubr.msk.bf16.gmra.mxu1 %vm715_vm3, %v9132_v7  ;;  %v3796_v7 = vrot.slane %v3794_v23, 5  ;;  %v7944_v24 = vpop.f32.mrf.mxu1  ;;  %v7968_v21 = vsel %vm6665_vm7, %v5529_v35, %v4418_v39  ;;  %v7972_v1 = vsel %vm6665_vm7, %v4420_v37, %v4421_v4  ;;  %v7975_v62 = vcombine.low %v3731_v34, %v3741_v44  ;;  %v5515_v4 = vld [vmem:[%s6335_s9 + $0x60] sm:$0xe]  ;;  %v5455_v44 = vld [vmem:[%s6335_s9 + $0x84] sm:$0xf] }
 0x10f   : > { %5926 = vmatprep.mubr.msk.bf16.mxu1 %vm715_vm3, %v9134_v43  ;;  %v3755_v43 = vsel %vm6379_vm4, %v3750_v45, %v7840_v10  ;;  %9136 = vst [vmem:[#allocation18_spill] sm:$0xff] %v7944_v24  ;;  %v9139_v45 = vsel %vm6379_vm4, %v7823_v3, %v7759_v46  ;;  %v4427_v46 = vrot.slane %v4425_v59, 4  ;;  %v4428_v3 = vrot.slane %v7897_v16, 5 }
 0x110   : > { %v7962_v23 = vcombine.low %v9139_v45, %v9138_v49  ;;  %9140 = vst [vmem:[#allocation14_spill] sm:$0xff] %v7975_v62  ;;  %v3797_v26 = vor.u32 %v3796_v7, %v3793_v50  ;;  %v7982_v28 = vcombine.low %v3755_v43, %v3765_v18  ;;  %v7984_v39 = vrot.slane %v3800_v60, 5 }
 0x111   : > { %v7950_v10 = vpop.f32.mrf.mxu0  ;;  %v7986_v35 = vrot.slane %v3804_v8, 4  ;;  %v3810_v37 = vshll.u32 %v7947_v33, 16  ;;  %v9142_v34 = vcombine.low %v7583_v54, %v7598_v56  ;;  %v3779_v50 = vsel %vm6379_vm4, %v3774_v14, %v7887_v11  ;;  %v5452_v54 = vld [vmem:[%s6335_s9 + $0x78] sm:$0xf] }
 0x112   : > { %9137 = vst [vmem:[#allocation12_spill] sm:$0xff] %v7950_v10  ;;  %9141 = vst [vmem:[#allocation19_spill] sm:$0xff] %v7982_v28  ;;  %v3789_v7 = vsel %vm6379_vm4, %v3784_v51, %v3788_v17  ;;  %v8006_v43 = vsel %vm6665_vm7, %v5530_v19, %v4425_v59  ;;  %v9144_v56 = vcombine.low %v7590_v29, %v7611_v42  ;;  %v3815_v60 = vshrl.u32 %v5449_v25, 16  ;;  %v8018_v51 = vld [vmem:[%s6335_s9 + $0x7c] sm:$0xf]  ;;  %v6156_v59 = vld [vmem:[%s6335_s9 + $0xc0] sm:$0xff]  }
 0x113   : > { %5961 = vmatmul.mubr.msk.bf16.gmra.mxu0 %vm715_vm3, %v6153_v2  ;;  %v7980_v2 = vld [vmem:[%s6335_s9 + $0x70] sm:$0xf]  ;;  %v8013_v18 = vpop.f32.mrf.mxu0  ;;  %v3818_v8 = vshll.u32 %v5449_v25, 16  ;;  %v8023_v17 = vsel %vm6665_vm7, %v4427_v46, %v4428_v3  ;;  %v8025_v29 = vrot.slane %v3797_v26, 4  ;;  %v5531_v42 = vrot.slane %v5515_v4, 9 }
 0x114   : > { %5964 = vmatprep.mubr.msk.bf16.mxu0 %vm715_vm3, %v6154_v41  ;;  %v6155_v41 = vld [vmem:[%s6335_s9 + $0xb4] sm:$0xff]   ;;  %9145 = vst [vmem:[#allocation21_spill] sm:$0xff] %v8013_v18  ;;  %v3824_v11 = vshll.u32 %v7980_v2, 16  ;;  %v3828_v14 = vshrl.u32 %v7980_v2, 16  ;;  %v4432_v19 = vrot.slane %v7918_v36, 5  ;;  %v8028_v49 = vcombine.low %v3779_v50, %v3789_v7 }
 0x115   : > { %v3807_v45 = vor.u32 %v7986_v35, %v7984_v39  ;;  %v8032_v25 = vrot.slane %v3810_v37, 5  ;;  %v3839_v46 = vshrl.u32 %v5452_v54, 16  ;;  %v3842_v3 = vshll.u32 %v5452_v54, 16  ;;  %v8044_v4 = vld [vmem:[%s6335_s9 + $0x88] sm:$0xf]  ;;  %v8047_v35 = vpop.f32.mrf.mxu0 }
 0x116   : > { %5927 = vmatmul.mubr.msk.bf16.gmra.mxu1 %vm715_vm3, %v9142_v34  ;;  %v7994_v16 = vpop.f32.mrf.mxu1  ;;  %9146 = vst [vmem:[#allocation22_spill] sm:$0xff] %v8028_v49  ;;  %v4435_v34 = vrot.slane %v7947_v33, 5  ;;  %v3848_v36 = vshll.u32 %v8018_v51, 16  ;;  %v3852_v26 = vshrl.u32 %v8018_v51, 16  ;;  %9148 = vst [vmem:[#allocation24_spill] sm:$0xff] %v8047_v35  ;;  %v3817_v33 = vrot.slane %v3815_v60, 4 }
 0x117   : > { %9143 = vst [vmem:[#allocation20_spill] sm:$0xff] %v7994_v16  ;;  %5930 = vmatprep.mubr.msk.bf16.mxu1 %vm715_vm3, %v9144_v56  ;;  %v8036_v56 = vld [vmem:[%s6335_s9 + $0x74] sm:$0x1]  ;;  %v3820_v37 = vrot.slane %v3818_v8, 5  ;;  %v8049_v50 = vrot.slane %v3824_v11, 5  ;;  %v3830_v7 = vrot.slane %v3828_v14, 4  ;;  %v9149_v54 = vcombine.low %v7602_v30, %v7618_v55  ;;  %v8077_v49 = vpop.f32.mrf.mxu0 }
 0x118   : > { %v8039_v58 = vpop.f32.mrf.mxu1  ;;  %v4434_v16 = vrot.slane %v4432_v19, 4  ;;  %v8062_v60 = vld [vmem:[%s6335_s9 + $0x80] sm:$0x1]  ;;  %v8065_v8 = vld [vmem:[%s6335_s9 + $0x6c] sm:$0xe]  ;;  %v3863_v11 = vshrl.u32 %v5455_v44, 16 }
 0x119   : > { %9147 = vst [vmem:[#allocation23_spill] sm:$0xff] %v8039_v58  ;;  %v8058_v58 = vsel %vm6665_vm7, %v5531_v42, %v4432_v19  ;;  %v3866_v14 = vshll.u32 %v5455_v44, 16  ;;  %v3876_v24 = vshrl.u32 %v8044_v4, 16  ;;  %v3841_v19 = vrot.slane %v3839_v46, 4  ;;  %9151 = vst [vmem:[#allocation26_spill] sm:$0xff] %v8077_v49 }
 0x11a   : > { %v8073_v42 = vpop.f32.mrf.mxu1  ;;  %v3844_v35 = vrot.slane %v3842_v3, 5  ;;  %v8075_v18 = vrot.slane %v3848_v36, 5  ;;  %v3854_v10 = vrot.slane %v3852_v26, 4  ;;  %v9152_v44 = vcombine.low %v7622_v15, %v7650_v32  ;;  %v8096_v32 = vld [vmem:[%s6335_s9 + $0x8c] sm:$0x1] }
 0x11b   : > { %5965 = vmatmul.mubr.msk.bf16.gmra.mxu0 %vm715_vm3, %v6155_v41  ;;  %v3834_v41 = vshll.u32 %v8036_v56, 16  ;;  %9150 = vst [vmem:[#allocation25_spill] sm:$0xff] %v8073_v42  ;;  %v3821_v30 = vor.u32 %v3820_v37, %v3817_v33  ;;  %v3831_v55 = vor.u32 %v3830_v7, %v8049_v50  ;;  %v3858_v46 = vshll.u32 %v8062_v60, 16  ;;  %v5517_v33 = vld [vmem:[%s6335_s9 + $0x78] sm:$0xe] }
 0x11c   : > { %5968 = vmatprep.mubr.msk.bf16.mxu0 %vm715_vm3, %v6156_v59  ;;  %v3872_v59 = vshll.u32 %v8044_v4, 16  ;;  %v8087_v3 = vrot.slane %v3807_v45, 4  ;;  %v8091_v36 = vsel %vm6665_vm7, %v4434_v16, %v4435_v34  ;;  %v5532_v26 = vrot.slane %v8065_v8, 9  ;;  %v8101_v42 = vpop.f32.mrf.mxu1  ;;  %v5458_v8 = vld [vmem:[%s6335_s9 + $0x90] sm:$0xf] }
 0x11d   : > { %v4446_v15 = vrot.slane %v8018_v51, 5  ;;  %v3865_v37 = vrot.slane %v3863_v11, 4  ;;  %v3868_v7 = vrot.slane %v3866_v14, 5  ;;  %9153 = vst [vmem:[#allocation27_spill] sm:$0xff] %v8101_v42  ;;  %v3836_v45 = vrot.slane %v3834_v41, 5 }
 0x11e   : > { %5931 = vmatmul.mubr.msk.bf16.gmra.mxu1 %vm715_vm3, %v9149_v54  ;;  %v4439_v54 = vrot.slane %v7980_v2, 5  ;;  %v8099_v2 = vrot.slane %v3872_v59, 5  ;;  %v4442_v49 = vrot.slane %v8036_v56, 5  ;;  %v3845_v16 = vor.u32 %v3844_v35, %v3841_v19  ;;  %v8110_v59 = vld [vmem:[%s6335_s9 + $0x94] sm:$0xf] }
 0x11f   : > { %5934 = vmatprep.mubr.msk.bf16.mxu1 %vm715_vm3, %v9152_v44  ;;  %v3878_v44 = vrot.slane %v3876_v24, 4  ;;  %v3855_v34 = vor.u32 %v3854_v10, %v8075_v18  ;;  %v3822_v51 = vrot.slane %v3821_v30, 4  ;;  %v3832_v11 = vrot.slane %v3831_v55, 4 }
 0x120   : > { %v4441_v62 = vrot.slane %v4439_v54, 4  ;;  %v3860_v14 = vrot.slane %v3858_v46, 5  ;;  %v9154_v24 = vcombine.low %v7743_v61, %v7747_v40  ;;  %v5533_v56 = vrot.slane %v5517_v33, 9 }
 0x121   : > { %v4448_v35 = vrot.slane %v4446_v15, 4  ;;  %v4449_v10 = vrot.slane %v8062_v60, 5  ;;  %v3882_v41 = vshll.u32 %v8096_v32, 16  ;;  %v3879_v30 = vor.u32 %v3878_v44, %v8099_v2 }
 0x122   : > { %v3887_v55 = vshrl.u32 %v5458_v8, 16  ;;  %v3890_v46 = vshll.u32 %v5458_v8, 16  ;;  %v9156_v61 = vcombine.low %v7662_v9, %v7667_v47  ;;  %v3846_v40 = vrot.slane %v3845_v16, 4 }
 0x123   : > { %v8106_v28 = vpop.f32.mrf.mxu0  ;;  %5969 = vmatmul.mubr.msk.bf16.gmra.mxu0 %vm715_vm3, %v6157_v13  ;;  %v3869_v13 = vor.u32 %v3868_v7, %v3865_v37  ;;  %v3856_v33 = vrot.slane %v3855_v34, 4  ;;  %v3896_v60 = vshll.u32 %v8110_v59, 16  ;;  %v3813_v37 = vsel %vm6379_vm4, %v8087_v3, %v8032_v25 }
 0x124   : > { %6008 = vmatprep.mubr.msk.bf16.mxu0 %vm715_vm3, %v9154_v24  ;;  %v3900_v24 = vshrl.u32 %v8110_v59, 16  ;;  %v3827_v9 = vsel %vm6379_vm4, %v3822_v51, %v8049_v50  ;;  %v8142_v47 = vsel %vm6665_vm7, %v5532_v26, %v4439_v54  ;;  %v8146_v7 = vsel %vm6665_vm7, %v4441_v62, %v4442_v49  ;;  %v5518_v54 = vld [vmem:[%s6335_s9 + $0x84] sm:$0xe]  ;;  %v9195_v31 = vld [vmem:[#allocation27_spill] sm:$0xff] }
 0x125   : > { %v8118_v19 = vpop.f32.mrf.mxu0  ;;  %v8154_v25 = vsel %vm6665_vm7, %v5533_v56, %v4446_v15  ;;  %v8158_v50 = vsel %vm6665_vm7, %v4448_v35, %v4449_v10  ;;  %v3884_v3 = vrot.slane %v3882_v41, 5  ;;  %v3870_v62 = vrot.slane %v3869_v13, 4  ;;  %v8182_v13 = vld [vmem:[%s6335_s9 + $0x98] sm:$0x1] }
 0x126   : > { %9155 = vst [vmem:[#allocation28_spill] sm:$0xff] %v8118_v19  ;;  %v8121_v42 = vpop.f32.mrf.mxu1  ;;  %5935 = vmatmul.mubr.msk.bf16.gmra.mxu1 %vm715_vm3, %v9156_v61  ;;  %v3880_v49 = vrot.slane %v3879_v30, 4  ;;  %v3889_v16 = vrot.slane %v3887_v55, 4  ;;  %v3892_v34 = vrot.slane %v3890_v46, 5  ;;  %v3851_v15 = vsel %vm6379_vm4, %v3846_v40, %v8075_v18  ;;  %v5461_v30 = vld [vmem:[%s6335_s9 + $0x9c] sm:$0xf] }
 0x127   : > { %v8129_v19 = vpop.f32.mrf.mxu0  ;;  %5974 = vmatprep.mubr.msk.bf16.mxu1 %vm715_vm3, %v7813_v27  ;;  %v3837_v27 = vsel %vm6379_vm4, %v3832_v11, %v3836_v45  ;;  %v3861_v45 = vsel %vm6379_vm4, %v3856_v33, %v3860_v14  ;;  %v8170_v51 = vrot.slane %v3896_v60, 5  ;;  %v3902_v11 = vrot.slane %v3900_v24, 4  ;;  %v8213_v24 = vld [vmem:[%s6335_s9 + $0xa0] sm:$0xf] }
 0x128   : > { %v8148_v44 = vpop.f32.mrf.mxu1  ;;  %v9157_v35 = vcombine.low %v7783_v48, %v7787_v38  ;;  %v5547_v10 = vcombine.low %v8006_v43, %v8023_v17  ;;  %v5548_v41 = vcombine.low %v8058_v58, %v8091_v36  ;;  %v5534_v18 = vrot.slane %v5518_v54, 9 }
 0x129   : > { %v8161_v26 = vpop.f32.mrf.mxu0  ;;  %v4453_v14 = vrot.slane %v8044_v4, 5  ;;  %v9158_v48 = vcombine.low %v7866_v6, %v7870_v22  ;;  %v9159_v38 = vsel %vm6379_vm4, %v8025_v29, %v7984_v39  ;;  %v8198_v61 = vcombine.low %v3827_v9, %v3837_v27  ;;  %v5519_v29 = vld [vmem:[%s6335_s9 + $0x90] sm:$0xe]  ;;  %v9166_v4 = vld [vmem:[#allocation5_spill] sm:$0xff] }
 0x12a   : > { %v8163_v8 = vpop.f32.mrf.mxu1  ;;  %v8196_v46 = vcombine.low %v9159_v38, %v3813_v37  ;;  %v8204_v60 = vcombine.low %v3851_v15, %v3861_v45  ;;  %v3875_v6 = vsel %vm6379_vm4, %v3870_v62, %v8099_v2  ;;  %v3885_v22 = vsel %vm6379_vm4, %v3880_v49, %v3884_v3 }
 0x12b   : > { %v5806_v56 = vpop.f32.mrf.mxu0  ;;  %6009 = vmatmul.mubr.msk.bf16.vlgmr.msra.gmra.mxu0 %vm715_vm3, %v9157_v35  ;;  %v3893_v39 = vor.u32 %v3892_v34, %v3889_v16  ;;  %v3903_v9 = vor.u32 %v3902_v11, %v8170_v51  ;;  %v3906_v27 = vshll.u32 %v8182_v13, 16  ;;  %v3911_v54 = vshrl.u32 %v5461_v30, 16 }
 0x12c   : > { %v8185_v55 = vpop.f32.mrf.mxu1  ;;  %6012 = vmatprep.mubr.msk.bf16.mxu0 %vm715_vm3, %v9158_v48  ;;  %v3914_v15 = vshll.u32 %v5461_v30, 16  ;;  %v8224_v3 = vsel %vm6665_vm7, %v5534_v18, %v4453_v14  ;;  %v4455_v62 = vrot.slane %v4453_v14, 4  ;;  %v4456_v49 = vrot.slane %v8096_v32, 5 }
 0x12d   : > { %v1519_v33 = vpop.f32.mrf.mxu0  ;;  %v5535_v16 = vrot.slane %v5519_v29, 9  ;;  %v4460_v34 = vrot.slane %v8110_v59, 5  ;;  %v3920_v11 = vshll.u32 %v8213_v24, 16  ;;  %v3924_v35 = vshrl.u32 %v8213_v24, 16 }
 0x12e   : > { %v5772_v37 = vpop.f32.mrf.mxu1  ;;  %5975 = vmatmul.mubr.msk.bf16.vlgmr.msra.gmra.mxu1 %vm715_vm3, %v7815_v57  ;;  %v8233_v48 = vcombine.low %v3875_v6, %v3885_v22  ;;  %v8235_v18 = vrot.slane %v3893_v39, 4  ;;  %v3904_v32 = vrot.slane %v3903_v9, 4  ;;  %v3908_v38 = vrot.slane %v3906_v27, 5  ;;  %v5464_v22 = vld [vmem:[%s6335_s9 + $0xa8] sm:$0xf] }
 0x12f   : > { %v1103_v45 = vadd.f32 %v5772_v37, %v7711_v5  ;;  %v5807_v2 = vpop.f32.mrf.mxu0  ;;  %5978 = vmatprep.mubr.msk.bf16.mxu1 %vm715_vm3, %v7962_v23  ;;  %v3913_v29 = vrot.slane %v3911_v54, 4  ;;  %v3916_v59 = vrot.slane %v3914_v15, 5  ;;  %v4463_v6 = vrot.slane %v8182_v13, 5  ;;  %v8261_v27 = vld [vmem:[%s6335_s9 + $0xac] sm:$0xf] }
 0x130   : > { %v1094_v57 = vpop.f32.mrf.mxu1  ;;  %v3926_v9 = vrot.slane %v3924_v35, 4  ;;  %v9163_v35 = vld [vmem:[#allocation11_spill] sm:$0xff] }
 0x131   : > { %v8230_v5 = vadd.f32 %v5806_v56, %v1103_v45  ;;  %v1095_v23 = vadd.f32 %v1094_v57, %v7735_v20  ;;  %v1522_v30 = vpop.f32.mrf.mxu0  ;;  %v9160_v45 = vcombine.low %v7903_v63, %v7929_v52  ;;  %v8246_v20 = vsel %vm6665_vm7, %v4455_v62, %v4456_v49  ;;  %v5520_v62 = vld [vmem:[%s6335_s9 + $0x9c] sm:$0xe] }
 0x132   : > { %v5773_v14 = vpop.f32.mrf.mxu1  ;;  %v4462_v63 = vrot.slane %v4460_v34, 4  ;;  %v8258_v52 = vrot.slane %v3920_v11, 5  ;;  %v4467_v49 = vrot.slane %v8213_v24, 5  ;;  %v3944_v24 = vshll.u32 %v8261_v27, 16 }
 0x133   : > { %v8237_v37 = vadd.f32 %v1519_v33, %v1095_v23  ;;  %v1106_v40 = vadd.f32 %v5773_v14, %v7754_v53  ;;  %v5810_v56 = vpop.f32.mrf.mxu0  ;;  %6013 = vmatmul.mubr.msk.bf16.gmra.mxu0 %vm715_vm3, %v9160_v45  ;;  %v9161_v33 = vcombine.low %v7968_v21, %v7972_v1  ;;  %v8256_v53 = vsel %vm6665_vm7, %v5535_v16, %v4460_v34  ;;  %v5463_v1 = vld [vmem:[%s6335_s9 + $0xa4] sm:$0x1]  ;;  %v9162_v16 = vld [vmem:[#allocation14_spill] sm:$0xff] }
 0x134   : > { %v1097_v39 = vpop.f32.mrf.mxu1  ;;  %v3899_v21 = vsel %vm6379_vm4, %v8235_v18, %v8170_v51  ;;  %v3935_v34 = vshrl.u32 %v5464_v22, 16  ;;  %v9164_v51 = vld [vmem:[#allocation19_spill] sm:$0xff]  ;;  %v3948_v18 = vshrl.u32 %v8261_v27, 16 }
 0x135   : > { %6016 = vmatprep.mubr.msk.bf16.mxu0 %vm715_vm3, %v9161_v33  ;;  %v8263_v54 = vadd.f32 %v5807_v2, %v1106_v40  ;;  %v1098_v13 = vadd.f32 %v1097_v39, %v7799_v12  ;;  %v1535_v15 = vpop.f32.mrf.mxu0  ;;  %v3909_v40 = vsel %vm6379_vm4, %v3904_v32, %v3908_v38  ;;  %v3917_v2 = vor.u32 %v3916_v59, %v3913_v29  ;;  %v9165_v59 = vld [vmem:[#allocation15_spill] sm:$0xff] }
 0x136   : > { %v5776_v57 = vpop.f32.mrf.mxu1  ;;  %5979 = vmatmul.mubr.msk.bf16.gmra.mxu1 %vm715_vm3, %v9162_v16  ;;  %v3938_v12 = vshll.u32 %v5464_v22, 16  ;;  %v8286_v39 = vsel %vm6665_vm7, %v4462_v63, %v4463_v6  ;;  %v3927_v32 = vor.u32 %v3926_v9, %v8258_v52  ;;  %v3930_v38 = vshll.u32 %v5463_v1, 16 }
 0x137   : > { %v8277_v11 = vadd.f32 %v1522_v30, %v1098_v13  ;;  %v1119_v23 = vadd.f32 %v5776_v57, %v9163_v35  ;;  %v5811_v14 = vpop.f32.mrf.mxu0  ;;  %5982 = vmatprep.mubr.msk.bf16.mxu1 %vm715_vm3, %v9164_v51  ;;  %v5536_v30 = vrot.slane %v5520_v62, 9  ;;  %v4469_v13 = vrot.slane %v4467_v49, 4 }
 0x138   : > { %v1110_v45 = vpop.f32.mrf.mxu1  ;;  %v4470_v57 = vrot.slane %v5463_v1, 5  ;;  %v8294_v51 = vrot.slane %v3917_v2, 4  ;;  %v3937_v6 = vrot.slane %v3935_v34, 4  ;;  %v3940_v63 = vrot.slane %v3938_v12, 5  ;;  %v8304_v1 = vld [vmem:[%s6335_s9 + $0xb0] sm:$0x1] }
 0x139   : > { %v8289_v29 = vadd.f32 %v5810_v56, %v1119_v23  ;;  %v1111_v22 = vadd.f32 %v1110_v45, %v9165_v59  ;;  %v1538_v33 = vpop.f32.mrf.mxu0  ;;  %v8306_v23 = vrot.slane %v3944_v24, 5  ;;  %v3950_v2 = vrot.slane %v3948_v18, 4  ;;  %v9167_v12 = vld [vmem:[#allocation17_spill] sm:$0xff] }
 0x13a   : > { %v5777_v16 = vpop.f32.mrf.mxu1  ;;  %v8316_v43 = vrot.slane %v3927_v32, 4  ;;  %v8318_v17 = vrot.slane %v3930_v38, 5  ;;  %v8326_v58 = vsel %vm6665_vm7, %v5536_v30, %v4467_v49  ;;  %v8330_v36 = vsel %vm6665_vm7, %v4469_v13, %v4470_v57  ;;  %v8342_v30 = vld [vmem:[%s6335_s9 + $0xb8] sm:$0xf] }
 0x13b   : > { %v8296_v9 = vadd.f32 %v1535_v15, %v1111_v22  ;;  %v1122_v62 = vadd.f32 %v5777_v16, %v9166_v4  ;;  %v5814_v56 = vpop.f32.mrf.mxu0  ;;  %6017 = vmatmul.mubr.msk.bf16.gmra.mxu0 %vm715_vm3, %v5547_v10  ;;  %v8312_v15 = vcombine.low %v3899_v21, %v3909_v40  ;;  %v5521_v10 = vld [vmem:[%s6335_s9 + $0xa8] sm:$0xe]  ;;  %v3941_v32 = vor.u32 %v3940_v63, %v3937_v6  ;;  %v9169_v22 = vld [vmem:[#allocation12_spill] sm:$0xff] }
 0x13c   : > { %v1113_v45 = vpop.f32.mrf.mxu1  ;;  %6020 = vmatprep.mubr.msk.bf16.mxu0 %vm715_vm3, %v5548_v41  ;;  %v5467_v41 = vld [vmem:[%s6335_s9 + $0xb4] sm:$0xf]  ;;  %v9168_v40 = vld [vmem:[#allocation22_spill] sm:$0xff]  ;;  %v3954_v38 = vshll.u32 %v8304_v1, 16  ;;  %v4474_v49 = vrot.slane %v8261_v27, 5  ;;  %v3951_v16 = vor.u32 %v3950_v2, %v8306_v23  ;;  %v3933_v27 = vsel %vm6379_vm4, %v8316_v43, %v8318_v17 }
 0x13d   : > { %v8321_v34 = vadd.f32 %v5811_v14, %v1122_v62  ;;  %v1114_v24 = vadd.f32 %v1113_v45, %v9167_v12  ;;  %v1551_v18 = vpop.f32.mrf.mxu0  ;;  %v5537_v62 = vrot.slane %v5521_v10, 9  ;;  %v3959_v6 = vshrl.u32 %v5467_v41, 16 }
 0x13e   : > { %v5780_v21 = vpop.f32.mrf.mxu1  ;;  %5983 = vmatmul.mubr.msk.bf16.gmra.mxu1 %vm715_vm3, %v9168_v40  ;;  %v3962_v63 = vshll.u32 %v5467_v41, 16  ;;  %v3968_v2 = vshll.u32 %v8342_v30, 16  ;;  %v3972_v10 = vshrl.u32 %v8342_v30, 16  ;;  %v5470_v40 = vld [vmem:[%s6335_s9 + $0xc0] sm:$0xf]  ;;  %v3942_v4 = vrot.slane %v3941_v32, 4 }
 0x13f   : > { %v8344_v59 = vadd.f32 %v1538_v33, %v1114_v24  ;;  %v1135_v13 = vadd.f32 %v5780_v21, %v9169_v22  ;;  %v5815_v57 = vpop.f32.mrf.mxu0  ;;  %5986 = vmatprep.mubr.msk.bf16.mxu1 %vm715_vm3, %v8196_v46  ;;  %v9171_v24 = vld [vmem:[#allocation21_spill] sm:$0xff]  ;;  %v3956_v43 = vrot.slane %v3954_v38, 5  ;;  %v4476_v17 = vrot.slane %v4474_v49, 4 }
 0x140   : > { %v1126_v45 = vpop.f32.mrf.mxu1  ;;  %v4477_v33 = vrot.slane %v8304_v1, 5  ;;  %v8372_v14 = vsel %vm6665_vm7, %v5537_v62, %v4474_v49  ;;  %v8375_v32 = vld [vmem:[%s6335_s9 + $0xc4] sm:$0xf]  ;;  %v9175_v1 = vcombine.low %v8154_v25, %v8158_v50  ;;  %v8387_v62 = vrot.slane %v3968_v2, 5 }
 0x141   : > { %v8356_v12 = vadd.f32 %v5814_v56, %v1135_v13  ;;  %v1127_v21 = vadd.f32 %v1126_v45, %v9171_v24  ;;  %v1554_v46 = vpop.f32.mrf.mxu0  ;;  %v9173_v56 = vld [vmem:[#allocation24_spill] sm:$0xff]  ;;  %v9174_v45 = vcombine.low %v8142_v47, %v8146_v7  ;;  %v3952_v24 = vrot.slane %v3951_v16, 4  ;;  %v9176_v16 = vld [vmem:[#allocation26_spill] sm:$0xff] }
 0x142   : > { %v5781_v22 = vpop.f32.mrf.mxu1  ;;  %v3983_v47 = vshrl.u32 %v5470_v40, 16  ;;  %v3986_v7 = vshll.u32 %v5470_v40, 16  ;;  %v3947_v25 = vsel %vm6379_vm4, %v3942_v4, %v8306_v23  ;;  %v8396_v50 = vsel %vm6665_vm7, %v4476_v17, %v4477_v33  ;;  %v5522_v40 = vld [vmem:[%s6335_s9 + $0xb4] sm:$0xe] }
 0x143   : > { %9170 = vst [vmem:[#allocation14_spill] sm:$0xff] %v8356_v12  ;;  %v8363_v35 = vadd.f32 %v1551_v18, %v1127_v21  ;;  %v1138_v41 = vadd.f32 %v5781_v22, %v9173_v56  ;;  %v5818_v13 = vpop.f32.mrf.mxu0  ;;  %6021 = vmatmul.mubr.msk.bf16.gmra.mxu0 %vm715_vm3, %v9174_v45  ;;  %v8382_v18 = vld [vmem:[%s6335_s9 + $0xbc] sm:$0x1]  ;;  %v3961_v21 = vrot.slane %v3959_v6, 4  ;;  %v3964_v22 = vrot.slane %v3962_v63, 5 }
 0x144   : > { %v1129_v38 = vpop.f32.mrf.mxu1  ;;  %6024 = vmatprep.mubr.msk.bf16.mxu0 %vm715_vm3, %v9175_v1  ;;  %v3996_v6 = vshrl.u32 %v8375_v32, 16  ;;  %v3978_v23 = vshll.u32 %v8382_v18, 16  ;;  %v4481_v17 = vrot.slane %v8342_v30, 5  ;;  %v9177_v1 = vld [vmem:[#allocation28_spill] sm:$0xff] }
 0x145   : > { %9172 = vst [vmem:[#allocation11_spill] sm:$0xff] %v8363_v35  ;;  %v8384_v56 = vadd.f32 %v5815_v57, %v1138_v41  ;;  %v1130_v45 = vadd.f32 %v1129_v38, %v9176_v16  ;;  %v1567_v49 = vpop.f32.mrf.mxu0  ;;  %v3974_v35 = vrot.slane %v3972_v10, 4  ;;  %v3992_v57 = vshll.u32 %v8375_v32, 16 }
 0x146   : > { %v5784_v12 = vpop.f32.mrf.mxu1  ;;  %5987 = vmatmul.mubr.msk.bf16.gmra.mxu1 %vm715_vm3, %v8198_v61  ;;  %v3957_v61 = vsel %vm6379_vm4, %v3952_v24, %v3956_v43  ;;  %v3965_v33 = vor.u32 %v3964_v22, %v3961_v21  ;;  %v3985_v41 = vrot.slane %v3983_v47, 4  ;;  %v3988_v38 = vrot.slane %v3986_v7, 5 }
 0x147   : > { %v8400_v63 = vadd.f32 %v1554_v46, %v1130_v45  ;;  %v1151_v2 = vadd.f32 %v5784_v12, %v8106_v28  ;;  %v5819_v10 = vpop.f32.mrf.mxu0  ;;  %5990 = vmatprep.mubr.msk.bf16.mxu1 %vm715_vm3, %v8204_v60  ;;  %v9178_v60 = vsel %vm6379_vm4, %v8294_v51, %v8258_v52  ;;  %v3975_v24 = vor.u32 %v3974_v35, %v8387_v62 }
 0x148   : > { %v1142_v4 = vpop.f32.mrf.mxu1  ;;  %v8418_v43 = vcombine.low %v9178_v60, %v3933_v27  ;;  %v8421_v30 = vcombine.low %v3947_v25, %v3957_v61  ;;  %v8425_v22 = vrot.slane %v3992_v57, 5  ;;  %v3998_v47 = vrot.slane %v3996_v6, 4  ;;  %v5472_v27 = vld [vmem:[%s6335_s9 + $0xc8] sm:$0x1] }
 0x149   : > { %v8410_v46 = vadd.f32 %v5818_v13, %v1151_v2  ;;  %v1143_v28 = vadd.f32 %v1142_v4, %v9177_v1  ;;  %v1570_v12 = vpop.f32.mrf.mxu0  ;;  %v5554_v13 = vcombine.low %v8372_v14, %v8396_v50  ;;  %v9179_v52 = vcombine.low %v8224_v3, %v8246_v20  ;;  %v5473_v14 = vld [vmem:[%s6335_s9 + $0xcc] sm:$0xf]  ;;  %v8446_v20 = vld [vmem:[%s6335_s9 + $0xd0] sm:$0xf]  ;;  %v5523_v4 = vld [vmem:[%s6335_s9 + $0xc0] sm:$0xe] }
 0x14a   : > { %v5785_v21 = vpop.f32.mrf.mxu1  ;;  %v8434_v35 = vrot.slane %v3978_v23, 5  ;;  %v5538_v51 = vrot.slane %v5522_v40, 9  ;;  %v9180_v50 = vcombine.low %v8256_v53, %v8286_v39  ;;  %v4484_v57 = vrot.slane %v8382_v18, 5 }
 0x14b   : > { %v8427_v7 = vadd.f32 %v1567_v49, %v1143_v28  ;;  %v1154_v16 = vadd.f32 %v5785_v21, %v8129_v19  ;;  %v5822_v45 = vpop.f32.mrf.mxu0  ;;  %6025 = vmatmul.mubr.msk.bf16.gmra.mxu0 %vm715_vm3, %v9179_v52  ;;  %v8442_v49 = vrot.slane %v3965_v33, 4  ;;  %v4483_v19 = vrot.slane %v4481_v17, 4 }
 0x14c   : > { %v1145_v25 = vpop.f32.mrf.mxu1  ;;  %6028 = vmatprep.mubr.msk.bf16.mxu0 %vm715_vm3, %v9180_v50  ;;  %v3989_v3 = vor.u32 %v3988_v38, %v3985_v41  ;;  %v8451_v23 = vrot.slane %v3975_v24, 4  ;;  %v4488_v53 = vrot.slane %v8375_v32, 5  ;;  %v3999_v33 = vor.u32 %v3998_v47, %v8425_v22 }
 0x14d   : > { %v8448_v6 = vadd.f32 %v5819_v10, %v1154_v16  ;;  %v1146_v2 = vadd.f32 %v1145_v25, %v8161_v26  ;;  %v1583_v61 = vpop.f32.mrf.mxu0  ;;  %v4002_v18 = vshll.u32 %v5472_v27, 16  ;;  %v4007_v40 = vshrl.u32 %v5473_v14, 16  ;;  %v9183_v10 = vld [vmem:[#allocation7_spill] sm:$0xff]  ;;  %v9184_v16 = vld [vmem:[#allocation6_spill] sm:$0xff] }
 0x14e   : > { %v5788_v39 = vpop.f32.mrf.mxu1  ;;  %5991 = vmatmul.mubr.msk.bf16.gmra.mxu1 %vm715_vm3, %v8233_v48  ;;  %v4010_v41 = vshll.u32 %v5473_v14, 16  ;;  %v4016_v28 = vshll.u32 %v8446_v20, 16  ;;  %v4020_v32 = vshrl.u32 %v8446_v20, 16  ;;  %v4482_v48 = vsel %vm6665_vm7, %v5538_v51, %v4481_v17  ;;  %v9185_v17 = vld [vmem:[#allocation9_spill] sm:$0xff] }
 0x14f   : > { %9181 = vst [vmem:[#allocation19_spill] sm:$0xff] %v8448_v6  ;;  %v8458_v38 = vadd.f32 %v1570_v12, %v1146_v2  ;;  %v1167_v1 = vadd.f32 %v5788_v39, %v9183_v10  ;;  %v5823_v26 = vpop.f32.mrf.mxu0  ;;  %5994 = vmatprep.mubr.msk.bf16.mxu1 %vm715_vm3, %v8312_v15  ;;  %v4485_v24 = vsel %vm6665_vm7, %v4483_v19, %v4484_v57  ;;  %v3990_v21 = vrot.slane %v3989_v3, 4 }
 0x150   : > { %v1158_v60 = vpop.f32.mrf.mxu1  ;;  %v5539_v12 = vrot.slane %v5523_v4, 9  ;;  %v4490_v25 = vrot.slane %v4488_v53, 4  ;;  %v4491_v15 = vrot.slane %v5472_v27, 5  ;;  %v4000_v2 = vrot.slane %v3999_v33, 4  ;;  %v5475_v33 = vld [vmem:[%s6335_s9 + $0xd4] sm:$0x1] }
 0x151   : > { %9182 = vst [vmem:[#allocation15_spill] sm:$0xff] %v8458_v38  ;;  %v8469_v47 = vadd.f32 %v5822_v45, %v1167_v1  ;;  %v1159_v52 = vadd.f32 %v1158_v60, %v9184_v16  ;;  %v1586_v14 = vpop.f32.mrf.mxu0  ;;  %v4004_v39 = vrot.slane %v4002_v18, 5  ;;  %v4009_v10 = vrot.slane %v4007_v40, 4  ;;  %v9187_v18 = vld [vmem:[#allocation8_spill] sm:$0xff] }
 0x152   : > { %v5789_v50 = vpop.f32.mrf.mxu1  ;;  %v4012_v38 = vrot.slane %v4010_v41, 5  ;;  %v9186_v45 = vcombine.low %v8326_v58, %v8330_v36  ;;  %v8479_v57 = vrot.slane %v4016_v28, 5  ;;  %v4022_v27 = vrot.slane %v4020_v32, 4 }
 0x153   : > { %v8472_v6 = vadd.f32 %v1583_v61, %v1159_v52  ;;  %v1170_v51 = vadd.f32 %v5789_v50, %v9185_v17  ;;  %v5826_v19 = vpop.f32.mrf.mxu0  ;;  %v3971_v61 = vsel %vm6379_vm4, %v8442_v49, %v8387_v62  ;;  %v3981_v4 = vsel %vm6379_vm4, %v8451_v23, %v8434_v35  ;;  %v5524_v62 = vld [vmem:[%s6335_s9 + $0xcc] sm:$0xe]  ;;  %s8810_s9 = scalar_lea.vmem [#allocation2], %s5036_s8 }
 0x154   : > { %6029 = vmatmul.mubr.msk.bf16.gmra.mxu0 %vm715_vm3, %v9186_v45  ;;  %v1161_v3 = vpop.f32.mrf.mxu1  ;;  %v4495_v58 = vrot.slane %v8446_v20, 5  ;;  %v4492_v1 = vsel %vm6665_vm7, %v4490_v25, %v4491_v15  ;;  %v5555_v35 = vcombine.low %v4482_v48, %v4485_v24  ;;  %v3995_v20 = vsel %vm6379_vm4, %v3990_v21, %v8425_v22  ;;  %v9189_v25 = vld [vmem:[#allocation13_spill] sm:$0xff]  ;;  %s4915_s11 = sshll.u32 %s8810_s9, 4  ;;  %s8953_s11 = int_to_ptr.vmem [resolvable:$true] %s4915_s11 }
 0x155   : > { %6032 = vmatprep.mubr.msk.bf16.mxu0 %vm715_vm3, %v5554_v13  ;;  %v8492_v36 = vadd.f32 %v5823_v26, %v1170_v51  ;;  %v1162_v40 = vadd.f32 %v1161_v3, %v9187_v18  ;;  %v1599_v41 = vpop.f32.mrf.mxu0  ;;  %v4489_v13 = vsel %vm6665_vm7, %v5539_v12, %v4488_v53  ;;  %v4005_v23 = vsel %vm6379_vm4, %v4000_v2, %v4004_v39  ;;  %v9188_v53 = vld [vmem:[#allocation10_spill] sm:$0xff]  ;;  %s6160_s23 = scalar_lea.vmem %s8953_s11, 4096  ;;  %p6167_p1 = scmp.lt.s32.totalorder %s8953_s11, %s6165_s27 }
 0x156   : > { %v5792_v49 = vpop.f32.mrf.mxu1  ;;  %5995 = vmatmul.mubr.msk.bf16.gmra.mxu1 %vm715_vm3, %v8418_v43  ;;  %v4013_v26 = vor.u32 %v4012_v38, %v4009_v10  ;;  %v4023_v12 = vor.u32 %v4022_v27, %v8479_v57  ;;  %v4026_v43 = vshll.u32 %v5475_v33, 16  ;;  %v5556_v24 = vcombine.low %v4489_v13, %v4492_v1  ;;  %p6161_p12 = scmp.ne.s32.totalorder %s8953_s11, %s6160_s23  ;;  %p6168_p2 = scmp.lt.s32.totalorder %s6166_s28, %s6160_s23 }
 0x157   : > { %v8507_v28 = vadd.f32 %v1586_v14, %v1162_v40  ;;  %v1183_v32 = vadd.f32 %v5792_v49, %v9188_v53  ;;  %v5827_v60 = vpop.f32.mrf.mxu0  ;;  %5998 = vmatprep.mubr.msk.bf16.mxu1 %vm715_vm3, %v8421_v30  ;;  %v5540_v16 = vrot.slane %v5524_v62, 9  ;;  %v4497_v52 = vrot.slane %v4495_v58, 4  ;;  %v9190_v30 = vld [vmem:[#allocation16_spill] sm:$0xff] }
 0x158   : > { %v1174_v48 = vpop.f32.mrf.mxu1  ;;  %v4498_v22 = vrot.slane %v5475_v33, 5  ;;  %v5490_v50 = vcombine.low %v3971_v61, %v3981_v4  ;;  %v5491_v2 = vcombine.low %v3995_v20, %v4005_v23  ;;  %v4014_v39 = vrot.slane %v4013_v26, 4  ;;  %v9191_v33 = vld [vmem:[#allocation18_spill] sm:$0xff]  ;;  %v9192_v62 = vld [vmem:[#allocation20_spill] sm:$0xff]  ;;  %v9193_v26 = vld [vmem:[#allocation23_spill] sm:$0xff]  ;;  %p6162_p13 = pnand %p6161_p12, %p6301_p4  ;;  %p6169_p3 = por %p6168_p2, %p6167_p1 }
 0x159   : > { %v8513_v21 = vadd.f32 %v5826_v19, %v1183_v32  ;;  %v1175_v38 = vadd.f32 %v1174_v48, %v9189_v25  ;;  %v1602_v14 = vpop.f32.mrf.mxu0  ;;  %v4024_v45 = vrot.slane %v4023_v12, 4  ;;  %v4028_v27 = vrot.slane %v4026_v43, 5  ;;  %v9194_v43 = vld [vmem:[#allocation25_spill] sm:$0xff] }
 0x15a   : > { %v5793_v15 = vpop.f32.mrf.mxu1  ;;  %v4496_v19 = vsel %vm6665_vm7, %v5540_v16, %v4495_v58  ;;  %v4499_v61 = vsel %vm6665_vm7, %v4497_v52, %v4498_v22  ;;  %v4019_v13 = vsel %vm6379_vm4, %v4014_v39, %v8479_v57  ;;  %p6163_p0 = pneg %p6162_p13 }
 0x15b   : > { %v8516_v10 = vadd.f32 %v1599_v41, %v1175_v38  ;;  %v1186_v17 = vadd.f32 %v5793_v15, %v9190_v30  ;;  %v5830_v51 = vpop.f32.mrf.mxu0  ;;  %v4029_v0 = vsel %vm6379_vm4, %v4024_v45, %v4028_v27 }
 0x15c   : > { %6033 = vmatmul.mubr.msk.bf16.gmra.mxu0 %vm715_vm3, %v5555_v35  ;;  %v1177_v3 = vpop.f32.mrf.mxu1  ;;  %v5557_v35 = vcombine.low %v4496_v19, %v4499_v61  ;;  %v5492_v12 = vcombine.low %v4019_v13, %v4029_v0  ;;  %p6170_p5 = pnand %p6169_p3, %p6163_p0 }
 0x15d   : > { %6036 = vmatprep.mubr.msk.bf16.mxu0 %vm715_vm3, %v5556_v24  ;;  %v8525_v4 = vadd.f32 %v5827_v60, %v1186_v17  ;;  %v1178_v18 = vadd.f32 %v1177_v3, %v9191_v33  ;;  %v1615_v40 = vpop.f32.mrf.mxu0 }
 0x15e   : > { %v5796_v41 = vpop.f32.mrf.mxu1  ;;  %5999 = vmatmul.mubr.msk.bf16.gmra.mxu1 %vm715_vm3, %v5490_v50 }
 0x15f   : > { %v8532_v1 = vadd.f32 %v1602_v14, %v1178_v18  ;;  %v1199_v49 = vadd.f32 %v5796_v41, %v9192_v62  ;;  %v5831_v58 = vpop.f32.mrf.mxu0  ;;  %6002 = vmatprep.mubr.msk.bf16.mxu1 %vm715_vm3, %v5491_v2 }
 0x160   : > { %v1190_v20 = vpop.f32.mrf.mxu1 }
 0x161   : > { %v8538_v23 = vadd.f32 %v5830_v51, %v1199_v49  ;;  %v1191_v53 = vadd.f32 %v1190_v20, %v9193_v26  ;;  %v1618_v32 = vpop.f32.mrf.mxu0 }
 0x162   : > { %v5797_v60 = vpop.f32.mrf.mxu1 }
 0x163   : > { %v8541_v57 = vadd.f32 %v1615_v40, %v1191_v53  ;;  %v1202_v48 = vadd.f32 %v5797_v60, %v9194_v43  ;;  %v5834_v24 = vpop.f32.mrf.mxu0 }
 0x164   : > { %6037 = vmatmul.mubr.msk.bf16.gmra.mxu0 %vm715_vm3, %v5557_v35  ;;  %v1193_v16 = vpop.f32.mrf.mxu1 }
 0x165   : > { %v8545_v52 = vadd.f32 %v5831_v58, %v1202_v48  ;;  %v1194_v22 = vadd.f32 %v1193_v16, %v9195_v31  ;;  %v1631_v25 = vpop.f32.mrf.mxu0 }
 0x166   : > { %v5800_v38 = vpop.f32.mrf.mxu1  ;;  %6003 = vmatmul.mubr.msk.bf16.gmra.mxu1 %vm715_vm3, %v5492_v12 }
 0x167   : > { %v8549_v14 = vadd.f32 %v1618_v32, %v1194_v22  ;;  %v1215_v15 = vadd.f32 %v5800_v38, %v8121_v42  ;;  %v5835_v50 = vpop.f32.mrf.mxu0 }
 0x168   : > { %v1206_v2 = vpop.f32.mrf.mxu1 }
 0x169   : > { %v8552_v39 = vadd.f32 %v5834_v24, %v1215_v15  ;;  %v1207_v30 = vadd.f32 %v1206_v2, %v8148_v44  ;;  %v1634_v17 = vpop.f32.mrf.mxu0 }
 0x16a   : > { %v5801_v51 = vpop.f32.mrf.mxu1 }
 0x16b   : > { %v8555_v45 = vadd.f32 %v1631_v25, %v1207_v30  ;;  %v1218_v27 = vadd.f32 %v5801_v51, %v8163_v8  ;;  %v5874_v3 = vpop.f32.mrf.mxu0  ;;  %v9196_v30 = vld [vmem:[#allocation14_spill] sm:$0xff] }
 0x16c   : > { %v1209_v19 = vpop.f32.mrf.mxu1 }
 0x16d   : > { %v8558_v61 = vadd.f32 %v5835_v50, %v1218_v27  ;;  %v1210_v33 = vadd.f32 %v1209_v19, %v8185_v55  ;;  %v2607_v18 = vpop.f32.mrf.mxu0 }
 0x16e   : > { %v5840_v42 = vpop.f32.mrf.mxu1 }
 0x16f   : > { %v8561_v40 = vadd.f32 %v1634_v17, %v1210_v33  ;;  %v2010_v41 = vadd.f32 %v5840_v42, %v8230_v5  ;;  %v5875_v13 = vpop.f32.mrf.mxu0 }
 0x170   : > { %v1881_v44 = vpop.f32.mrf.mxu1 }
 0x171   : > { %v8564_v62 = vadd.f32 %v5874_v3, %v2010_v41  ;;  %v2008_v49 = vadd.f32 %v1881_v44, %v8237_v37  ;;  %v2610_v58 = vpop.f32.mrf.mxu0  ;;  %v9197_v3 = vld [vmem:[#allocation11_spill] sm:$0xff] }
 0x172   : > { %v5841_v8 = vpop.f32.mrf.mxu1 }
 0x173   : > { %v8567_v0 = vadd.f32 %v2607_v18, %v2008_v49  ;;  %v2011_v35 = vadd.f32 %v5841_v8, %v8263_v54  ;;  %v5878_v20 = vpop.f32.mrf.mxu0 }
 0x174   : > { %v1884_v55 = vpop.f32.mrf.mxu1 }
 0x175   : > { %v8570_v26 = vadd.f32 %v5875_v13, %v2011_v35  ;;  %v2009_v53 = vadd.f32 %v1884_v55, %v8277_v11  ;;  %v2623_v32 = vpop.f32.mrf.mxu0 }
 0x176   : > { %v5844_v5 = vpop.f32.mrf.mxu1 }
 0x177   : > { %v8573_v60 = vadd.f32 %v2610_v58, %v2009_v53  ;;  %v2014_v12 = vadd.f32 %v5844_v5, %v8289_v29  ;;  %v5879_v43 = vpop.f32.mrf.mxu0 }
 0x178   : > { %v1897_v37 = vpop.f32.mrf.mxu1 }
 0x179   : > { %v8576_v48 = vadd.f32 %v5878_v20, %v2014_v12  ;;  %v2012_v24 = vadd.f32 %v1897_v37, %v8296_v9  ;;  %v2626_v16 = vpop.f32.mrf.mxu0 }
 0x17a   : > { %v5845_v54 = vpop.f32.mrf.mxu1 }
 0x17b   : > { %v8579_v31 = vadd.f32 %v2623_v32, %v2012_v24  ;;  %v2015_v22 = vadd.f32 %v5845_v54, %v8321_v34  ;;  %v5882_v25 = vpop.f32.mrf.mxu0  ;;  %v9199_v54 = vld [vmem:[#allocation15_spill] sm:$0xff] }
 0x17c   : > { %v1900_v11 = vpop.f32.mrf.mxu1 }
 0x17d   : > { %v8582_v38 = vadd.f32 %v5879_v43, %v2015_v22  ;;  %v2013_v15 = vadd.f32 %v1900_v11, %v8344_v59  ;;  %v2639_v50 = vpop.f32.mrf.mxu0  ;;  %v9198_v43 = vld [vmem:[#allocation19_spill] sm:$0xff] }
 0x17e   : > { %v5848_v29 = vpop.f32.mrf.mxu1 }
 0x17f   : > { %v8585_v2 = vadd.f32 %v2626_v16, %v2013_v15  ;;  %v2018_v17 = vadd.f32 %v5848_v29, %v9196_v30  ;;  %v5883_v51 = vpop.f32.mrf.mxu0 }
 0x180   : > { %v1913_v9 = vpop.f32.mrf.mxu1 }
 0x181   : > { %v8588_v27 = vadd.f32 %v5882_v25, %v2018_v17  ;;  %v2016_v19 = vadd.f32 %v1913_v9, %v9197_v3  ;;  %v2642_v33 = vpop.f32.mrf.mxu0 }
 0x182   : > { %v5849_v34 = vpop.f32.mrf.mxu1 }
 0x183   : > { %v8591_v18 = vadd.f32 %v2639_v50, %v2016_v19  ;;  %v2019_v42 = vadd.f32 %v5849_v34, %v8384_v56  ;;  %v5886_v41 = vpop.f32.mrf.mxu0 }
 0x184   : > { %v1916_v59 = vpop.f32.mrf.mxu1 }
 0x185   : > { %v8594_v13 = vadd.f32 %v5883_v51, %v2019_v42  ;;  %v2017_v44 = vadd.f32 %v1916_v59, %v8400_v63  ;;  %v2655_v49 = vpop.f32.mrf.mxu0 }
 0x186   : > { %v5852_v58 = vpop.f32.mrf.mxu1 }
 0x187   : > { %v8597_v8 = vadd.f32 %v2642_v33, %v2017_v44  ;;  %v2022_v35 = vadd.f32 %v5852_v58, %v8410_v46  ;;  %v5887_v20 = vpop.f32.mrf.mxu0 }
 0x188   : > { %v1929_v55 = vpop.f32.mrf.mxu1 }
 0x189   : > { %v8600_v53 = vadd.f32 %v5886_v41, %v2022_v35  ;;  %v2020_v32 = vadd.f32 %v1929_v55, %v8427_v7  ;;  %v2658_v5 = vpop.f32.mrf.mxu0 }
 0x18a   : > { %v5853_v56 = vpop.f32.mrf.mxu1 }
 0x18b   : > { %v8603_v12 = vadd.f32 %v2655_v49, %v2020_v32  ;;  %v2023_v37 = vadd.f32 %v5853_v56, %v9198_v43  ;;  %v5890_v24 = vpop.f32.mrf.mxu0 }
 0x18c   : > { %v1932_v63 = vpop.f32.mrf.mxu1 }
 0x18d   : > { %v8606_v16 = vadd.f32 %v5887_v20, %v2023_v37  ;;  %v2021_v22 = vadd.f32 %v1932_v63, %v9199_v54  ;;  %v2671_v25 = vpop.f32.mrf.mxu0 }
 0x18e   : > { %v5856_v46 = vpop.f32.mrf.mxu1 }
 0x18f   : > { %v8609_v11 = vadd.f32 %v2658_v5, %v2021_v22  ;;  %v2026_v15 = vadd.f32 %v5856_v46, %v8469_v47  ;;  %v5891_v50 = vpop.f32.mrf.mxu0 }
 0x190   : > { %v1945_v7 = vpop.f32.mrf.mxu1 }
 0x191   : > { %v8612_v29 = vadd.f32 %v5890_v24, %v2026_v15  ;;  %v2024_v30 = vadd.f32 %v1945_v7, %v8472_v6  ;;  %v2674_v17 = vpop.f32.mrf.mxu0 }
 0x192   : > { %v5857_v51 = vpop.f32.mrf.mxu1 }
 0x193   : > { %v8615_v9 = vadd.f32 %v2671_v25, %v2024_v30  ;;  %v2027_v3 = vadd.f32 %v5857_v51, %v8492_v36  ;;  %v5894_v19 = vpop.f32.mrf.mxu0 }
 0x194   : > { %v1948_v33 = vpop.f32.mrf.mxu1 }
 0x195   : > { %v8618_v34 = vadd.f32 %v5891_v50, %v2027_v3  ;;  %v2025_v42 = vadd.f32 %v1948_v33, %v8507_v28  ;;  %v2687_v41 = vpop.f32.mrf.mxu0 }
 0x196   : > { %v5860_v47 = vpop.f32.mrf.mxu1 }
 0x197   : > { %9200 = vst [vmem:[#allocation5_spill] sm:$0xff] %v8618_v34  ;;  %v8621_v59 = vadd.f32 %v2674_v17, %v2025_v42  ;;  %v2030_v44 = vadd.f32 %v5860_v47, %v8513_v21  ;;  %v5895_v49 = vpop.f32.mrf.mxu0 }
 0x198   : > { %v1961_v6 = vpop.f32.mrf.mxu1 }
 0x199   : > { %9201 = vst [vmem:[#allocation17_spill] sm:$0xff] %v8621_v59  ;;  %v8624_v58 = vadd.f32 %v5894_v19, %v2030_v44  ;;  %v2028_v35 = vadd.f32 %v1961_v6, %v8516_v10  ;;  %v2690_v20 = vpop.f32.mrf.mxu0 }
 0x19a   : > { %v5861_v36 = vpop.f32.mrf.mxu1 }
 0x19b   : > { %9202 = vst [vmem:[#allocation22_spill] sm:$0xff] %v8624_v58  ;;  %v8627_v55 = vadd.f32 %v2687_v41, %v2028_v35  ;;  %v2031_v32 = vadd.f32 %v5861_v36, %v8525_v4  ;;  %v5898_v5 = vpop.f32.mrf.mxu0 }
 0x19c   : > { %v1964_v28 = vpop.f32.mrf.mxu1 }
 0x19d   : > { %9203 = vst [vmem:[#allocation12_spill] sm:$0xff] %v8627_v55  ;;  %v8630_v56 = vadd.f32 %v5895_v49, %v2031_v32  ;;  %v2029_v43 = vadd.f32 %v1964_v28, %v8532_v1  ;;  %v2703_v37 = vpop.f32.mrf.mxu0 }
 0x19e   : > { %v5864_v21 = vpop.f32.mrf.mxu1 }
 0x19f   : > { %9204 = vst [vmem:[#allocation21_spill] sm:$0xff] %v8630_v56  ;;  %v8633_v24 = vadd.f32 %v2690_v20, %v2029_v43  ;;  %v2034_v63 = vadd.f32 %v5864_v21, %v8538_v23  ;;  %v5899_v54 = vpop.f32.mrf.mxu0 }
 0x1a0   : > { %v1977_v10 = vpop.f32.mrf.mxu1 }
 0x1a1   : > { %9205 = vst [vmem:[#allocation24_spill] sm:$0xff] %v8633_v24  ;;  %v8636_v22 = vadd.f32 %v5898_v5, %v2034_v63  ;;  %v2032_v25 = vadd.f32 %v1977_v10, %v8541_v57  ;;  %v2706_v46 = vpop.f32.mrf.mxu0 }
 0x1a2   : > { %v5865_v4 = vpop.f32.mrf.mxu1 }
 0x1a3   : > { %9206 = vst [vmem:[#allocation26_spill] sm:$0xff] %v8636_v22  ;;  %v8639_v15 = vadd.f32 %v2703_v37, %v2032_v25  ;;  %v2035_v50 = vadd.f32 %v5865_v4, %v8545_v52  ;;  %v5902_v7 = vpop.f32.mrf.mxu0 }
 0x1a4   : > { %v1980_v1 = vpop.f32.mrf.mxu1 }
 0x1a5   : > { %9207 = vst [vmem:[#allocation28_spill] sm:$0xff] %v8639_v15  ;;  %v8642_v30 = vadd.f32 %v5899_v54, %v2035_v50  ;;  %v2033_v17 = vadd.f32 %v1980_v1, %v8549_v14  ;;  %v2719_v51 = vpop.f32.mrf.mxu0 }
 0x1a6   : > { %v5868_v23 = vpop.f32.mrf.mxu1 }
 0x1a7   : > { %9208 = vst [vmem:[#allocation7_spill] sm:$0xff] %v8642_v30  ;;  %v8645_v3 = vadd.f32 %v2706_v46, %v2033_v17  ;;  %v2038_v19 = vadd.f32 %v5868_v23, %v8552_v39  ;;  %v5903_v33 = vpop.f32.mrf.mxu0 }
 0x1a8   : > { %v1993_v57 = vpop.f32.mrf.mxu1 }
 0x1a9   : > { %9209 = vst [vmem:[#allocation6_spill] sm:$0xff] %v8645_v3  ;;  %v8648_v42 = vadd.f32 %v5902_v7, %v2038_v19  ;;  %v2036_v41 = vadd.f32 %v1993_v57, %v8555_v45  ;;  %v2722_v47 = vpop.f32.mrf.mxu0 }
 0x1aa   : > { %v5869_v52 = vpop.f32.mrf.mxu1 }
 0x1ab   : > { %9210 = vst [vmem:[#allocation9_spill] sm:$0xff] %v8648_v42  ;;  %v8651_v44 = vadd.f32 %v2719_v51, %v2036_v41  ;;  %v2039_v49 = vadd.f32 %v5869_v52, %v8558_v61  ;;  %v8654_v6 = vpop.f32.mrf.mxu0 }
 0x1ac   : > { %v1996_v14 = vpop.f32.mrf.mxu1 }
 0x1ad   : > { %9211 = vst [vmem:[#allocation8_spill] sm:$0xff] %v8651_v44  ;;  %v8656_v35 = vadd.f32 %v5903_v33, %v2039_v49  ;;  %v2037_v20 = vadd.f32 %v1996_v14, %v8561_v40  ;;  %v8659_v39 = vpop.f32.mrf.mxu0 }
 0x1ae   : > { %v5908_v36 = vpop.f32.mrf.mxu1 }
 0x1af   : > { %9212 = vst [vmem:[#allocation10_spill] sm:$0xff] %v8656_v35  ;;  %v8661_v32 = vadd.f32 %v2722_v47, %v2037_v20  ;;  %v8663_v5 = vpop.f32.mrf.mxu0 }
 0x1b0   : > { %v3077_v45 = vpop.f32.mrf.mxu1 }
 0x1b1   : > { %9213 = vst [vmem:[#allocation13_spill] sm:$0xff] %v8661_v32  ;;  %v8665_v28 = vpop.f32.mrf.mxu0 }
 0x1b2   : > { %v5909_v43 = vpop.f32.mrf.mxu1 }
 0x1b3   : > { %v8667_v37 = vpop.f32.mrf.mxu0 }
 0x1b4   : > { %v8669_v61 = vpop.f32.mrf.mxu1 }
 0x1b5   : > { %v8671_v21 = vpop.f32.mrf.mxu0 }
 0x1b6   : > { %v8673_v63 = vpop.f32.mrf.mxu1 }
 0x1b7   : > { %v8675_v40 = vpop.f32.mrf.mxu0 }
 0x1b8   : > { %v8677_v54 = vpop.f32.mrf.mxu1 }
 0x1b9   : > { %v8679_v10 = vpop.f32.mrf.mxu0 }
 0x1ba   : > { %v8681_v25 = vpop.f32.mrf.mxu1 }
 0x1bb   : > { %v8683_v46 = vpop.f32.mrf.mxu0 }
 0x1bc   : > { %v8685_v4 = vpop.f32.mrf.mxu1 }
 0x1bd   : > { %v8687_v50 = vpop.f32.mrf.mxu0 }
 0x1be   : > { %v8689_v7 = vpop.f32.mrf.mxu1 }
 0x1bf   : > { %v8691_v1 = vpop.f32.mrf.mxu0 }
 0x1c0   : > { %v8693_v17 = vpop.f32.mrf.mxu1 }
 0x1c1   : > { %v8695_v51 = vpop.f32.mrf.mxu0 }
 0x1c2   : > { %v8697_v23 = vpop.f32.mrf.mxu1 }
 0x1c3   : > { %v8699_v19 = vpop.f32.mrf.mxu0 }
 0x1c4   : > { %v8701_v33 = vpop.f32.mrf.mxu1 }
 0x1c5   : > { %v8703_v57 = vpop.f32.mrf.mxu0 }
 0x1c6   : > { %v8705_v41 = vpop.f32.mrf.mxu1 }
 0x1c7   : > { %v8707_v47 = vpop.f32.mrf.mxu0 }
 0x1c8   : > { %v8709_v52 = vpop.f32.mrf.mxu1 }
 0x1c9   : > { %v8711_v49 = vpop.f32.mrf.mxu0 }
 0x1ca   : > { %v8713_v14 = vpop.f32.mrf.mxu1 }
 0x1cb   : > { %v8715_v20 = vpop.f32.mrf.mxu0 }
 0x1cc   : > { %v8717_v32 = vpop.f32.mrf.mxu1 }
 0x1cd   : > { %v8719_v35 = vpop.f32.mrf.mxu0 }
 0x1ce   : > { %9214 = vst [vmem:[#allocation16_spill] sm:$0xff] %v8719_v35  ;;  %v8721_v44 = vpop.f32.mrf.mxu1 }
 0x1cf   : > { %v8723_v42 = vpop.f32.mrf.mxu0 }
 0x1d0   : > { %9215 = vst [vmem:[#allocation18_spill] sm:$0xff] %v8723_v42  ;;  %v8725_v3 = vpop.f32.mrf.mxu1 }
 0x1d1   : > { %v8727_v30 = vpop.f32.mrf.mxu0 }
 0x1d2   : > { %9216 = vst [vmem:[#allocation20_spill] sm:$0xff] %v8727_v30  ;;  %v8729_v15 = vpop.f32.mrf.mxu1 }
 0x1d3   : > { %9217 = vst [vmem:[#allocation23_spill] sm:$0xff] %v8729_v15  ;;  %v8731_v22 = vpop.f32.mrf.mxu0 }
 0x1d4   : > { %9218 = vst [vmem:[#allocation25_spill] sm:$0xff] %v8731_v22  ;;  %v8733_v24 = vpop.f32.mrf.mxu1 }
 0x1d5   : > { %9219 = vst [vmem:[#allocation27_spill] sm:$0xff] %v8733_v24  ;;  %v8735_v56 = vpop.f32.mrf.mxu0 }
 0x1d6   : > { %9220 = vst [vmem:[#allocation14_spill] sm:$0xff] %v8735_v56  ;;  %v8737_v55 = vpop.f32.mrf.mxu1 }
 0x1d7   : > { %9221 = vst [vmem:[#allocation11_spill] sm:$0xff] %v8737_v55  ;;  %v8739_v58 = vpop.f32.mrf.mxu0 }
 0x1d8   : > { %9222 = vst [vmem:[#allocation19_spill] sm:$0xff] %v8739_v58  ;;  %v8741_v59 = vpop.f32.mrf.mxu1 }
 0x1d9   : > { %9223 = vst [vmem:[#allocation15_spill] sm:$0xff] %v8741_v59  ;;  %v8743_v35 = vpop.f32.mrf.mxu0 }
 0x1da   : > { %9224 = vst [vmem:[#allocation29_spill] sm:$0xff] %v8743_v35  ;;  %v8745_v42 = vpop.f32.mrf.mxu1 }
 0x1db   : > { %9225 = vst [vmem:[#allocation30_spill] sm:$0xff] %v8745_v42  ;;  %v8747_v34 = vpop.f32.mrf.mxu0 }
 0x1dc   : > { %9226 = vst [vmem:[#allocation31_spill] sm:$0xff] %v8747_v34  ;;  %v8749_v30 = vpop.f32.mrf.mxu1 }
 0x1dd   : > { %9227 = vst [vmem:[#allocation32_spill] sm:$0xff] %v8749_v30  ;;  %v8751_v15 = vpop.f32.mrf.mxu0 }
 0x1de   : > { %9228 = vst [vmem:[#allocation33_spill] sm:$0xff] %v8751_v15  ;;  %v8753_v22 = vpop.f32.mrf.mxu1 }
 0x1df   : > { %9229 = vst [vmem:[#allocation34_spill] sm:$0xff] %v8753_v22  ;;  %v8755_v24 = vpop.f32.mrf.mxu0 }
 0x1e0   : > { %9230 = vst [vmem:[#allocation35_spill] sm:$0xff] %v8755_v24  ;;  %v8757_v56 = vpop.f32.mrf.mxu1  ;;  %v3206_v24 = vadd.f32 %v5908_v36, %v8564_v62  ;;  %v3205_v62 = vadd.f32 %v8669_v61, %v8573_v60  ;;  %v3208_v60 = vadd.f32 %v8677_v54, %v8579_v31 }
 0x1e1   : > { %9231 = vst [vmem:[#allocation36_spill] sm:$0xff] %v8757_v56  ;;  %v8759_v55 = vpop.f32.mrf.mxu0 }
 0x1e2   : > { %9232 = vst [vmem:[#allocation37_spill] sm:$0xff] %v8759_v55  ;;  %v8761_v58 = vpop.f32.mrf.mxu1  ;;  %v3570_v54 = vadd.f32 %v8671_v21, %v3208_v60  ;;  %v3214_v21 = vadd.f32 %v8689_v7, %v8588_v27 }
 0x1e3   : > { %9233 = vst [vmem:[#allocation38_spill] sm:$0xff] %v8761_v58  ;;  %v8763_v59 = vpop.f32.mrf.mxu0  ;;  %v3204_v58 = vadd.f32 %v3077_v45, %v8567_v0  ;;  %v3210_v0 = vadd.f32 %v8673_v63, %v8576_v48  ;;  %v8794_v45 = vld [vmem:[%s9006_s2] ss:$0 sm:$0xff] }
 0x1e4   : > { %9234 = vst [vmem:[#allocation39_spill] sm:$0xff] %v8763_v59  ;;  %v8765_v35 = vpop.f32.mrf.mxu1 }
 0x1e5   : > { %9235 = vst [vmem:[#allocation40_spill] sm:$0xff] %v8765_v35  ;;  %v8767_v34 = vpop.f32.mrf.mxu0 }
 0x1e6   : > { %9236 = vst [vmem:[#allocation41_spill] sm:$0xff] %v8767_v34  ;;  %v8769_v30 = vpop.f32.mrf.mxu1  ;;  %v3568_v34 = vadd.f32 %v8654_v6, %v3206_v24 }
 0x1e7   : > { %9237 = vst [vmem:[#allocation42_spill] sm:$0xff] %v8769_v30  ;;  %v8771_v15 = vpop.f32.mrf.mxu0  ;;  %v3207_v30 = vadd.f32 %v5909_v43, %v8570_v26 }
 0x1e8   : > { %9238 = vst [vmem:[#allocation43_spill] sm:$0xff] %v8771_v15  ;;  %v8773_v22 = vpop.f32.mrf.mxu1 }
 0x1e9   : > { %9239 = vst [vmem:[#allocation44_spill] sm:$0xff] %v8773_v22  ;;  %v8776_v56 = vpop.f32.mrf.mxu0  ;;  %v3566_v22 = vadd.f32 %v8659_v39, %v3204_v58  ;;  %v3569_v26 = vadd.f32 %v8663_v5, %v3207_v30  ;;  %v3211_v30 = vadd.f32 %v8681_v25, %v8582_v38 }
 0x1ea   : > { %9240 = vst [vmem:[#allocation45_spill] sm:$0xff] %v8776_v56  ;;  %v8778_v55 = vpop.f32.mrf.mxu1 }
 0x1eb   : > { %v6010_v59 = vpop.f32.mrf.mxu0 }
 0x1ec   : > { %v8781_v42 = vpop.f32.mrf.mxu1 }
 0x1ed   : > { %9241 = vst [vmem:[#allocation46_spill] sm:$0xff] %v8781_v42  ;;  %v4635_v35 = vpop.f32.mrf.mxu0  ;;  %v3572_v42 = vadd.f32 %v8667_v37, %v3210_v0  ;;  %v3573_v0 = vadd.f32 %v8675_v40, %v3211_v30 }
 0x1ee   : > { %v5976_v15 = vpop.f32.mrf.mxu1 }
 0x1ef   : > { %v4294_v36 = vadd.f32 %v5976_v15, %v3568_v34  ;;  %v6011_v56 = vpop.f32.mrf.mxu0  ;;  %v3567_v15 = vadd.f32 %v8665_v28, %v3205_v62  ;;  %v3209_v28 = vadd.f32 %v8685_v4, %v8585_v2 }
 0x1f0   : > { %v4165_v24 = vpop.f32.mrf.mxu1 }
 0x1f1   : > { %v4764_v6 = vadd.f32 %v6010_v59, %v4294_v36  ;;  %v4292_v58 = vadd.f32 %v4165_v24, %v3566_v22  ;;  %v4638_v39 = vpop.f32.mrf.mxu0 }
 0x1f2   : > { %v5977_v34 = vpop.f32.mrf.mxu1 }
 0x1f3   : > { %v4803_v48 = vadd.f32 %v8794_v45, %v4764_v6  ;;  %v4762_v43 = vadd.f32 %v4635_v35, %v4292_v58  ;;  %v4295_v61 = vadd.f32 %v5977_v34, %v3569_v26  ;;  %v6014_v63 = vpop.f32.mrf.mxu0  ;;  %v3571_v34 = vadd.f32 %v8679_v10, %v3209_v28 }
 0x1f4   : > { %v4168_v5 = vpop.f32.mrf.mxu1  ;;  %v3218_v28 = vadd.f32 %v8705_v41, %v8600_v53 }
 0x1f5   : > { %v4835_v59 = vmax.f32 %v4803_v48, 0.0  ;;  %v4801_v22 = vadd.f32 %v8794_v45, %v4762_v43  ;;  %v4765_v36 = vadd.f32 %v6011_v56, %v4295_v61  ;;  %v4293_v24 = vadd.f32 %v4168_v5, %v3567_v15  ;;  %v4651_v31 = vpop.f32.mrf.mxu0 }
 0x1f6   : > { %v5980_v35 = vpop.f32.mrf.mxu1  ;;  %v3576_v43 = vadd.f32 %v8683_v46, %v3214_v21  ;;  %v3215_v61 = vadd.f32 %v8697_v23, %v8594_v13 }
 0x1f7   : > { %4867 = vst [vmem:[%s8810_s9 + $0x10] sm:$0xff] %v4835_v59  ;;  %v4833_v37 = vmax.f32 %v4801_v22, 0.0  ;;  %v4804_v38 = vadd.f32 %v8794_v45, %v4765_v36  ;;  %v4763_v25 = vadd.f32 %v4638_v39, %v4293_v24  ;;  %v4298_v62 = vadd.f32 %v5980_v35, %v3572_v42  ;;  %v6015_v56 = vpop.f32.mrf.mxu0 }
 0x1f8   : > { %v4181_v26 = vpop.f32.mrf.mxu1  ;;  %v3212_v42 = vadd.f32 %v8693_v17, %v8591_v18  ;;  %v3213_v22 = vadd.f32 %v8701_v33, %v8597_v8 }
 0x1f9   : > { %4865 = vst [vmem:[%s8810_s9] sm:$0xff] %v4833_v37  ;;  %v4836_v2 = vmax.f32 %v4804_v38, 0.0  ;;  %v4802_v4 = vadd.f32 %v8794_v45, %v4763_v25  ;;  %v4768_v6 = vadd.f32 %v6014_v63, %v4298_v62  ;;  %v4296_v58 = vadd.f32 %v4181_v26, %v3570_v54  ;;  %v4654_v60 = vpop.f32.mrf.mxu0 }
 0x1fa   : > { %v5981_v39 = vpop.f32.mrf.mxu1  ;;  %v3574_v59 = vadd.f32 %v8687_v50, %v3212_v42  ;;  %v3577_v54 = vadd.f32 %v8691_v1, %v3215_v61  ;;  %v3575_v25 = vadd.f32 %v8695_v51, %v3213_v22  ;;  %v3216_v62 = vadd.f32 %v8709_v52, %v8603_v12 }
 0x1fb   : > { %4868 = vst [vmem:[%s8810_s9 + $0x18] sm:$0xff] %v4836_v2  ;;  %v4834_v40 = vmax.f32 %v4802_v4, 0.0  ;;  %v4807_v15 = vadd.f32 %v8794_v45, %v4768_v6  ;;  %v4766_v27 = vadd.f32 %v4651_v31, %v4296_v58  ;;  %v4299_v7 = vadd.f32 %v5981_v39, %v3573_v0  ;;  %v6018_v48 = vpop.f32.mrf.mxu0 }
 0x1fc   : > { %v4184_v63 = vpop.f32.mrf.mxu1  ;;  %v3580_v26 = vadd.f32 %v8699_v19, %v3218_v28  ;;  %v3219_v2 = vadd.f32 %v8713_v14, %v8606_v16 }
 0x1fd   : > { %4866 = vst [vmem:[%s8810_s9 + $0x8] sm:$0xff] %v4834_v40  ;;  %v4839_v10 = vmax.f32 %v4807_v15, 0.0  ;;  %v4805_v30 = vadd.f32 %v8794_v45, %v4766_v27  ;;  %v4769_v18 = vadd.f32 %v6015_v56, %v4299_v7  ;;  %v4297_v17 = vadd.f32 %v4184_v63, %v3571_v34  ;;  %v4667_v5 = vpop.f32.mrf.mxu0 }
 0x1fe   : > { %v5984_v36 = vpop.f32.mrf.mxu1  ;;  %v3217_v34 = vadd.f32 %v8717_v32, %v8609_v11  ;;  %v3581_v15 = vadd.f32 %v8707_v47, %v3219_v2  ;;  %v3222_v27 = vadd.f32 %v8721_v44, %v8612_v29  ;;  %v3220_v63 = vadd.f32 %v8725_v3, %v8615_v9 }
 0x1ff   : > { %4871 = vst [vmem:[%s8810_s9 + $0x30] sm:$0xff] %v4839_v10  ;;  %v4837_v46 = vmax.f32 %v4805_v30, 0.0  ;;  %v4808_v24 = vadd.f32 %v8794_v45, %v4769_v18  ;;  %v4767_v13 = vadd.f32 %v4654_v60, %v4297_v17  ;;  %v4302_v23 = vadd.f32 %v5984_v36, %v3576_v43  ;;  %v6019_v31 = vpop.f32.mrf.mxu0 }
 0x200   : > { %v4197_v35 = vpop.f32.mrf.mxu1  ;;  %v3578_v60 = vadd.f32 %v8703_v57, %v3216_v62  ;;  %v3579_v61 = vadd.f32 %v8711_v49, %v3217_v34  ;;  %v3584_v17 = vadd.f32 %v8715_v20, %v3222_v27  ;;  %v9248_v62 = vld [vmem:[#allocation22_spill] sm:$0xff] }
 0x201   : > { %4869 = vst [vmem:[%s8810_s9 + $0x20] sm:$0xff] %v4837_v46  ;;  %v4840_v50 = vmax.f32 %v4808_v24, 0.0  ;;  %v4806_v37 = vadd.f32 %v8794_v45, %v4767_v13  ;;  %v4772_v8 = vadd.f32 %v6018_v48, %v4302_v23  ;;  %v4300_v33 = vadd.f32 %v4197_v35, %v3574_v59  ;;  %v4670_v38 = vpop.f32.mrf.mxu0  ;;  %v9243_v59 = vld [vmem:[#allocation23_spill] sm:$0xff]  ;;  %v9244_v13 = vld [vmem:[#allocation16_spill] sm:$0xff] }
 0x202   : > { %v5985_v56 = vpop.f32.mrf.mxu1  ;;  %v3582_v23 = vadd.f32 %v9244_v13, %v3220_v63 }
 0x203   : > { %4872 = vst [vmem:[%s8810_s9 + $0x38] sm:$0xff] %v4840_v50  ;;  %v4838_v1 = vmax.f32 %v4806_v37, 0.0  ;;  %v4811_v0 = vadd.f32 %v8794_v45, %v4772_v8  ;;  %v4770_v53 = vadd.f32 %v4667_v5, %v4300_v33  ;;  %v4303_v41 = vadd.f32 %v5985_v56, %v3577_v54  ;;  %v6022_v21 = vpop.f32.mrf.mxu0  ;;  %v9242_v5 = vld [vmem:[#allocation5_spill] sm:$0xff]  ;;  %v9246_v54 = vld [vmem:[#allocation27_spill] sm:$0xff] }
 0x204   : > { %v4200_v4 = vpop.f32.mrf.mxu1  ;;  %v3223_v22 = vadd.f32 %v9243_v59, %v9242_v5  ;;  %v9249_v56 = vld [vmem:[#allocation11_spill] sm:$0xff] }
 0x205   : > { %4870 = vst [vmem:[%s8810_s9 + $0x28] sm:$0xff] %v4838_v1  ;;  %v4843_v51 = vmax.f32 %v4811_v0, 0.0  ;;  %v4809_v6 = vadd.f32 %v8794_v45, %v4770_v53  ;;  %v4773_v12 = vadd.f32 %v6019_v31, %v4303_v41  ;;  %v4301_v52 = vadd.f32 %v4200_v4, %v3575_v25  ;;  %v4683_v58 = vpop.f32.mrf.mxu0  ;;  %v9245_v31 = vld [vmem:[#allocation17_spill] sm:$0xff]  ;;  %v9250_v4 = vld [vmem:[#allocation20_spill] sm:$0xff] }
 0x206   : > { %v5988_v42 = vpop.f32.mrf.mxu1  ;;  %v3221_v28 = vadd.f32 %v9246_v54, %v9245_v31  ;;  %v3226_v1 = vadd.f32 %v9249_v56, %v9248_v62 }
 0x207   : > { %4875 = vst [vmem:[%s8810_s9 + $0x50] sm:$0xff] %v4843_v51  ;;  %v4841_v19 = vmax.f32 %v4809_v6, 0.0  ;;  %v4812_v39 = vadd.f32 %v8794_v45, %v4773_v12  ;;  %v4771_v16 = vadd.f32 %v4670_v38, %v4301_v52  ;;  %v4306_v14 = vadd.f32 %v5988_v42, %v3580_v26  ;;  %v6023_v40 = vpop.f32.mrf.mxu0  ;;  %v9247_v38 = vld [vmem:[#allocation18_spill] sm:$0xff]  ;;  %v9251_v6 = vld [vmem:[#allocation12_spill] sm:$0xff]  ;;  %v9252_v12 = vld [vmem:[#allocation15_spill] sm:$0xff] }
 0x208   : > { %v4213_v7 = vpop.f32.mrf.mxu1  ;;  %v3585_v25 = vadd.f32 %v9247_v38, %v3223_v22  ;;  %v3583_v51 = vadd.f32 %v9250_v4, %v3221_v28  ;;  %v3224_v52 = vadd.f32 %v9252_v12, %v9251_v6  ;;  %v9259_v22 = vld [vmem:[#allocation19_spill] sm:$0xff]  ;;  %v9262_v28 = vld [vmem:[#allocation29_spill] sm:$0xff] }
 0x209   : > { %4873 = vst [vmem:[%s8810_s9 + $0x40] sm:$0xff] %v4841_v19  ;;  %v4844_v57 = vmax.f32 %v4812_v39, 0.0  ;;  %v4810_v48 = vadd.f32 %v8794_v45, %v4771_v16  ;;  %v4776_v11 = vadd.f32 %v6022_v21, %v4306_v14  ;;  %v4304_v32 = vadd.f32 %v4213_v7, %v3578_v60  ;;  %v4686_v43 = vpop.f32.mrf.mxu0  ;;  %v9253_v16 = vld [vmem:[#allocation25_spill] sm:$0xff] }
 0x20a   : > { %v5989_v10 = vpop.f32.mrf.mxu1  ;;  %v3588_v14 = vadd.f32 %v9253_v16, %v3226_v1  ;;  %v9265_v1 = vld [vmem:[#allocation31_spill] sm:$0xff] }
 0x20b   : > { %4876 = vst [vmem:[%s8810_s9 + $0x58] sm:$0xff] %v4844_v57  ;;  %v4842_v47 = vmax.f32 %v4810_v48, 0.0  ;;  %v4815_v30 = vadd.f32 %v8794_v45, %v4776_v11  ;;  %v4774_v29 = vadd.f32 %v4683_v58, %v4304_v32  ;;  %v4307_v44 = vadd.f32 %v5989_v10, %v3581_v15  ;;  %v6026_v18 = vpop.f32.mrf.mxu0  ;;  %v9255_v15 = vld [vmem:[#allocation30_spill] sm:$0xff]  ;;  %v9257_v10 = vld [vmem:[#allocation24_spill] sm:$0xff] }
 0x20c   : > { %v4216_v36 = vpop.f32.mrf.mxu1 }
 0x20d   : > { %4874 = vst [vmem:[%s8810_s9 + $0x48] sm:$0xff] %v4842_v47  ;;  %v4847_v49 = vmax.f32 %v4815_v30, 0.0  ;;  %v4813_v46 = vadd.f32 %v8794_v45, %v4774_v29  ;;  %v4777_v9 = vadd.f32 %v6023_v40, %v4307_v44  ;;  %v4305_v3 = vadd.f32 %v4216_v36, %v3579_v61  ;;  %v4699_v24 = vpop.f32.mrf.mxu0  ;;  %v9254_v40 = vld [vmem:[#allocation21_spill] sm:$0xff]  ;;  %v9256_v61 = vld [vmem:[#allocation14_spill] sm:$0xff]  ;;  %v9258_v47 = vld [vmem:[#allocation32_spill] sm:$0xff] }
 0x20e   : > { %v5992_v35 = vpop.f32.mrf.mxu1  ;;  %v3227_v27 = vadd.f32 %v9255_v15, %v9254_v40  ;;  %v3586_v63 = vadd.f32 %v9256_v61, %v3224_v52  ;;  %v3225_v30 = vadd.f32 %v9258_v47, %v9257_v10  ;;  %v9268_v52 = vld [vmem:[#allocation33_spill] sm:$0xff] }
 0x20f   : > { %4879 = vst [vmem:[%s8810_s9 + $0x70] sm:$0xff] %v4847_v49  ;;  %v4845_v20 = vmax.f32 %v4813_v46, 0.0  ;;  %v4816_v50 = vadd.f32 %v8794_v45, %v4777_v9  ;;  %v4775_v37 = vadd.f32 %v4686_v43, %v4305_v3  ;;  %v4310_v8 = vadd.f32 %v5992_v35, %v3584_v17  ;;  %v6027_v33 = vpop.f32.mrf.mxu0  ;;  %v9260_v49 = vld [vmem:[#allocation26_spill] sm:$0xff] }
 0x210   : > { %v4229_v0 = vpop.f32.mrf.mxu1  ;;  %v3589_v36 = vadd.f32 %v9259_v22, %v3227_v27  ;;  %v9261_v46 = vld [vmem:[#allocation34_spill] sm:$0xff]  ;;  %v3587_v35 = vadd.f32 %v9262_v28, %v3225_v30  ;;  %v9271_v27 = vld [vmem:[#allocation35_spill] sm:$0xff]  ;;  %v9274_v30 = vld [vmem:[#allocation37_spill] sm:$0xff] }
 0x211   : > { %4877 = vst [vmem:[%s8810_s9 + $0x60] sm:$0xff] %v4845_v20  ;;  %v4848_v53 = vmax.f32 %v4816_v50, 0.0  ;;  %v4814_v41 = vadd.f32 %v8794_v45, %v4775_v37  ;;  %v4780_v21 = vadd.f32 %v6026_v18, %v4310_v8  ;;  %v4308_v26 = vadd.f32 %v4229_v0, %v3582_v23  ;;  %v4702_v2 = vpop.f32.mrf.mxu0  ;;  %v9263_v20 = vld [vmem:[#allocation28_spill] sm:$0xff] }
 0x212   : > { %v5993_v58 = vpop.f32.mrf.mxu1  ;;  %v3230_v9 = vadd.f32 %v9261_v46, %v9260_v49  ;;  %v9264_v50 = vld [vmem:[#allocation36_spill] sm:$0xff] }
 0x213   : > { %4880 = vst [vmem:[%s8810_s9 + $0x78] sm:$0xff] %v4848_v53  ;;  %v4846_v60 = vmax.f32 %v4814_v41, 0.0  ;;  %v4819_v34 = vadd.f32 %v8794_v45, %v4780_v21  ;;  %v4778_v42 = vadd.f32 %v4699_v24, %v4308_v26  ;;  %v4311_v19 = vadd.f32 %v5993_v58, %v3585_v25  ;;  %v9266_v53 = vld [vmem:[#allocation7_spill] sm:$0xff]  ;;  %v9267_v41 = vld [vmem:[#allocation38_spill] sm:$0xff] }
 0x214   : > { %v6030_v39 = vpop.f32.mrf.mxu0  ;;  %v4232_v7 = vpop.f32.mrf.mxu1  ;;  %v3228_v37 = vadd.f32 %v9264_v50, %v9263_v20  ;;  %v3592_v0 = vadd.f32 %v9265_v1, %v3230_v9  ;;  %v3231_v21 = vadd.f32 %v9267_v41, %v9266_v53  ;;  %v9277_v9 = vld [vmem:[#allocation39_spill] sm:$0xff]  ;;  %v9279_v20 = vld [vmem:[#allocation41_spill] sm:$0xff] }
 0x215   : > { %4878 = vst [vmem:[%s8810_s9 + $0x68] sm:$0xff] %v4846_v60  ;;  %v4851_v57 = vmax.f32 %v4819_v34, 0.0  ;;  %v4817_v48 = vadd.f32 %v8794_v45, %v4778_v42  ;;  %v4781_v11 = vadd.f32 %v6027_v33, %v4311_v19  ;;  %v4309_v32 = vadd.f32 %v4232_v7, %v3583_v51  ;;  %v9269_v60 = vld [vmem:[#allocation6_spill] sm:$0xff]  ;;  %v9270_v34 = vld [vmem:[#allocation40_spill] sm:$0xff] }
 0x216   : > { %v4715_v43 = vpop.f32.mrf.mxu0  ;;  %v5996_v29 = vpop.f32.mrf.mxu1  ;;  %v3590_v58 = vadd.f32 %v9268_v52, %v3228_v37  ;;  %v3229_v42 = vadd.f32 %v9270_v34, %v9269_v60  ;;  %v3593_v7 = vadd.f32 %v9271_v27, %v3231_v21  ;;  %v9280_v37 = vld [vmem:[#allocation13_spill] sm:$0xff] }
 0x217   : > { %4883 = vst [vmem:[%s8810_s9 + $0x90] sm:$0xff] %v4851_v57  ;;  %v4849_v44 = vmax.f32 %v4817_v48, 0.0  ;;  %v4820_v18 = vadd.f32 %v8794_v45, %v4781_v11  ;;  %v4779_v17 = vadd.f32 %v4702_v2, %v4309_v32  ;;  %v4314_v5 = vadd.f32 %v5996_v29, %v3588_v14  ;;  %v9272_v57 = vld [vmem:[#allocation9_spill] sm:$0xff]  ;;  %v9273_v48 = vld [vmem:[#allocation42_spill] sm:$0xff] }
 0x218   : > { %v6031_v59 = vpop.f32.mrf.mxu0  ;;  %v4245_v3 = vpop.f32.mrf.mxu1  ;;  %v3234_v11 = vadd.f32 %v9273_v48, %v9272_v57  ;;  %v3591_v29 = vadd.f32 %v9274_v30, %v3229_v42 }
 0x219   : > { %4881 = vst [vmem:[%s8810_s9 + $0x80] sm:$0xff] %v4849_v44  ;;  %v4852_v24 = vmax.f32 %v4820_v18, 0.0  ;;  %v4818_v13 = vadd.f32 %v8794_v45, %v4779_v17  ;;  %v4784_v23 = vadd.f32 %v6030_v39, %v4314_v5  ;;  %v4312_v31 = vadd.f32 %v4245_v3, %v3586_v63  ;;  %v9275_v44 = vld [vmem:[#allocation8_spill] sm:$0xff] }
 0x21a   : > { %v4718_v54 = vpop.f32.mrf.mxu0  ;;  %v5997_v8 = vpop.f32.mrf.mxu1  ;;  %v9276_v18 = vld [vmem:[#allocation44_spill] sm:$0xff]  ;;  %v3596_v3 = vadd.f32 %v9277_v9, %v3234_v11 }
 0x21b   : > { %4884 = vst [vmem:[%s8810_s9 + $0x98] sm:$0xff] %v4852_v24  ;;  %v4850_v33 = vmax.f32 %v4818_v13, 0.0  ;;  %v4823_v38 = vadd.f32 %v8794_v45, %v4784_v23  ;;  %v4782_v25 = vadd.f32 %v4715_v43, %v4312_v31  ;;  %v4315_v62 = vadd.f32 %v5997_v8, %v3589_v36  ;;  %v9278_v24 = vld [vmem:[#allocation10_spill] sm:$0xff] }
 0x21c   : > { %v6034_v56 = vpop.f32.mrf.mxu0  ;;  %v4248_v26 = vpop.f32.mrf.mxu1  ;;  %v3232_v17 = vadd.f32 %v9276_v18, %v9275_v44  ;;  %v3235_v13 = vadd.f32 %v8778_v55, %v9278_v24  ;;  %v9281_v8 = vld [vmem:[#allocation46_spill] sm:$0xff] }
 0x21d   : > { %4882 = vst [vmem:[%s8810_s9 + $0x88] sm:$0xff] %v4850_v33  ;;  %v4855_v2 = vmax.f32 %v4823_v38, 0.0  ;;  %v4821_v4 = vadd.f32 %v8794_v45, %v4782_v25  ;;  %v4785_v51 = vadd.f32 %v6031_v59, %v4315_v62  ;;  %v4313_v6 = vadd.f32 %v4248_v26, %v3587_v35 }
 0x21e   : > { %v4731_v12 = vpop.f32.mrf.mxu0  ;;  %v6000_v19 = vpop.f32.mrf.mxu1  ;;  %v3594_v50 = vadd.f32 %v9279_v20, %v3232_v17  ;;  %v3233_v33 = vadd.f32 %v9281_v8, %v9280_v37 }
 0x21f   : > { %4887 = vst [vmem:[%s8810_s9 + $0xb0] sm:$0xff] %v4855_v2  ;;  %v4853_v39 = vmax.f32 %v4821_v4, 0.0  ;;  %v4824_v16 = vadd.f32 %v8794_v45, %v4785_v51  ;;  %v4783_v14 = vadd.f32 %v4718_v54, %v4313_v6  ;;  %v4318_v40 = vadd.f32 %v6000_v19, %v3592_v0  ;;  %v9282_v0 = vld [vmem:[#allocation43_spill] sm:$0xff]  ;;  %v9283_v51 = vld [vmem:[#allocation45_spill] sm:$0xff] }
 0x220   : > { %v6035_v15 = vpop.f32.mrf.mxu0  ;;  %v4261_v32 = vpop.f32.mrf.mxu1  ;;  %v3597_v53 = vadd.f32 %v9282_v0, %v3235_v13  ;;  %v3595_v6 = vadd.f32 %v9283_v51, %v3233_v33 }
 0x221   : > { %4885 = vst [vmem:[%s8810_s9 + $0xa0] sm:$0xff] %v4853_v39  ;;  %v4856_v43 = vmax.f32 %v4824_v16, 0.0  ;;  %v4822_v61 = vadd.f32 %v8794_v45, %v4783_v14  ;;  %v4788_v63 = vadd.f32 %v6034_v56, %v4318_v40  ;;  %v4316_v10 = vadd.f32 %v4261_v32, %v3590_v58 }
 0x222   : > { %v4734_v47 = vpop.f32.mrf.mxu0  ;;  %v6001_v5 = vpop.f32.mrf.mxu1 }
 0x223   : > { %4888 = vst [vmem:[%s8810_s9 + $0xb8] sm:$0xff] %v4856_v43  ;;  %v4854_v59 = vmax.f32 %v4822_v61, 0.0  ;;  %v4827_v22 = vadd.f32 %v8794_v45, %v4788_v63  ;;  %v4786_v36 = vadd.f32 %v4731_v12, %v4316_v10  ;;  %v4319_v49 = vadd.f32 %v6001_v5, %v3593_v7 }
 0x224   : > { %v6038_v46 = vpop.f32.mrf.mxu0  ;;  %v4264_v23 = vpop.f32.mrf.mxu1 }
 0x225   : > { %4886 = vst [vmem:[%s8810_s9 + $0xa8] sm:$0xff] %v4854_v59  ;;  %v4859_v31 = vmax.f32 %v4827_v22, 0.0  ;;  %v4825_v54 = vadd.f32 %v8794_v45, %v4786_v36  ;;  %v4789_v28 = vadd.f32 %v6035_v15, %v4319_v49  ;;  %v4317_v35 = vadd.f32 %v4264_v23, %v3591_v29 }
 0x226   : > { %v6004_v38 = vpop.f32.mrf.mxu1  ;;  %v4747_v25 = vpop.f32.mrf.mxu0 }
 0x227   : > { %4891 = vst [vmem:[%s8810_s9 + $0xd0] sm:$0xff] %v4859_v31  ;;  %v4857_v62 = vmax.f32 %v4825_v54, 0.0  ;;  %v4828_v55 = vadd.f32 %v8794_v45, %v4789_v28  ;;  %v4787_v56 = vadd.f32 %v4734_v47, %v4317_v35  ;;  %v4322_v1 = vadd.f32 %v6004_v38, %v3596_v3 }
 0x228   : > { %v4277_v41 = vpop.f32.mrf.mxu1  ;;  %v6039_v52 = vpop.f32.mrf.mxu0 }
 0x229   : > { %4889 = vst [vmem:[%s8810_s9 + $0xc0] sm:$0xff] %v4857_v62  ;;  %v4860_v21 = vmax.f32 %v4828_v55, 0.0  ;;  %v4826_v26 = vadd.f32 %v8794_v45, %v4787_v56  ;;  %v4792_v2 = vadd.f32 %v6038_v46, %v4322_v1  ;;  %v4320_v4 = vadd.f32 %v4277_v41, %v3594_v50 }
 0x22a   : > { %v6005_v12 = vpop.f32.mrf.mxu1  ;;  %v4750_v15 = vpop.f32.mrf.mxu0 }
 0x22b   : > { %4892 = vst [vmem:[%s8810_s9 + $0xd8] sm:$0xff] %v4860_v21  ;;  %v4858_v58 = vmax.f32 %v4826_v26, 0.0  ;;  %v4831_v60 = vadd.f32 %v8794_v45, %v4792_v2  ;;  %v4790_v34 = vadd.f32 %v4747_v25, %v4320_v4  ;;  %v4323_v42 = vadd.f32 %v6005_v12, %v3597_v53 }
 0x22c   : > { %v4280_v19 = vpop.f32.mrf.mxu1 }
 0x22d   : > { %4890 = vst [vmem:[%s8810_s9 + $0xc8] sm:$0xff] %v4858_v58  ;;  %v4863_v39 = vmax.f32 %v4831_v60, 0.0  ;;  %v4829_v16 = vadd.f32 %v8794_v45, %v4790_v34  ;;  %v4793_v14 = vadd.f32 %v6039_v52, %v4323_v42  ;;  %v4321_v40 = vadd.f32 %v4280_v19, %v3595_v6 }
 0x22f   : > { %4895 = vst [vmem:[%s8810_s9 + $0xf0] sm:$0xff] %v4863_v39  ;;  %v4861_v27 = vmax.f32 %v4829_v16, 0.0  ;;  %v4832_v7 = vadd.f32 %v8794_v45, %v4793_v14  ;;  %v4791_v57 = vadd.f32 %v4750_v15, %v4321_v40 }
 0x231   : > { %4893 = vst [vmem:[%s8810_s9 + $0xe0] sm:$0xff] %v4861_v27  ;;  %v4864_v48 = vmax.f32 %v4832_v7, 0.0  ;;  %v4830_v11 = vadd.f32 %v8794_v45, %v4791_v57 }
 0x233   : > { %4896 = vst [vmem:[%s8810_s9 + $0xf8] sm:$0xff] %v4864_v48  ;;  %v4862_v32 = vmax.f32 %v4830_v11, 0.0 }
 0x235   : > { %4894 = vst [vmem:[%s8810_s9 + $0xe8] sm:$0xff] %v4862_v32 }
 0x236   : > { %6173 = shalt.err (!%p6170_p5)
}
 0x237   : > { %s6174_s29 = scalar_lea.hbm %s8951_s21, 4096  ;;  %s6178_s5 = scalar_lea.hbm %s9007_s3, 8192 }
 0x238   : > { %p6175_p6 = scmp.ne.s32.totalorder %s8951_s21, %s6174_s29  ;;  %p6179_p10 = scmp.lt.s32.totalorder %s8951_s21, %s9007_s3 }
 0x239   : > { %p6180_p11 = scmp.lt.s32.totalorder %s6178_s5, %s6174_s29 }
 0x23a   : > { %p6176_p7 = pnand %p6175_p6, %p6301_p4 }
 0x23b   : > { %p6181_p12 = por %p6180_p11, %p6179_p10 }
 0x23c   : > { %p6177_p9 = pneg %p6176_p7 }
 0x23e   : > { %p6182_p13 = pnand %p6181_p12, %p6177_p9 }
 0x240   : > { %6185 = shalt.err (!%p6182_p13)
}
 0x241   : > { %s6239_s8 = smov 128   ;;  %s6240_s9 = smov 8  }
 0x242   : > { %6053 = dma.vmem_to_hbm [thread:$0]  (%p6301_p4), %s8953_s11, 4096, %s8951_s21, %s8959_s15, %s6239_s8, %s6239_s8, %s6240_s9  }
 0x243 PF: > { %p6059_p0 = scmp.ge.s32.totalorder %s6236_s17, 2  ;;  %s4930_s10 = sand.u32 1, %s6216_s12  }
 0x244   : > { %s4931_s18 = scalar_lea.sflag [#allocation3], %s4930_s10 }
 0x245   : > { %p6056_p1 = pnand %p6059_p0, %p6308_p8 }
 0x247   : > { %p6057_p2 = pneg %p6056_p1 }
 0x249   : > { %6211 = dma.done.wait (%p6057_p2), %s4931_s18, 4096  }
 0x24a   : > { %6213 = vsyncadd (%p6057_p2), %s4931_s18, 4294963200  ;;  %s16_s17 = sadd.s32 1, %s6236_s17   ;;  %s9284_s12 = smov %s6220_s13 }
 0x24b   : > { %p13_p3 = scmp.ge.s32.totalorder %s16_s17, 4   ;;  %s9285_s13 = smov %s6224_s14 }
 0x24c   : > { %s9286_s14 = smov %s6314_s25  ;;  %s9287_s15 = smov %s6232_s16 }
 0x24d   : > { %s9288_s16 = smov %s9290_s20  ;;  %15 = sbr.rel (!%p13_p3) target bundleno = 4 (0x4), region = 84 }
 0x252   :  { %4936 = vsyncpa [#allocation3], 1 }
 0x253   :  { %4938 = vsyncpa [#allocation3 + $0x1], 1 }

</bundles_post_ra>
